<compile_context>
chip_gen: v7x
topology: tpu7x:2x2x1
jax: 0.10.0
libtpu: 0.0.40
codegen_flags: <defaults>
</compile_context>

<pallas_src>
import functools

import jax
import jax.numpy as jnp
from jax.experimental import pallas as pl
from jax.experimental.pallas import tpu as pltpu


def _round_up(x, m):
    return (x + m - 1) // m * m


# ----------------------------------------------------------------------------
# Pallas kernel: full multi-layer LSTM forward (all layers, all time steps).
# ----------------------------------------------------------------------------
def _encoder_lstm_kernel(x_ref, wih0_ref, wihr_ref, whh_ref, b_ref,
                         ht_ref, ct_ref,
                         h_sc, c_sc, gx_sc, seq_sc):
    # x_ref    : (T, Bp, Ep)          padded embedded input sequence
    # wih0_ref : (Ep, 4*Hp)           layer-0 input weights (transposed, padded)
    # wihr_ref : (max(L-1,1), Hp, 4*Hp)   layers 1..L-1 input weights
    # whh_ref  : (L, Hp, 4*Hp)        recurrent weights
    # b_ref    : (L, 1, 4*Hp)         b_ih + b_hh, per-gate padded
    # ht_ref   : (L, Bp, Hp)          final hidden state per layer
    # ct_ref   : (L, Bp, Hp)          final cell state per layer
    T, Bp, Ep = x_ref.shape
    L, Hp, _ = whh_ref.shape

    for layer in range(L):
        # ---- Hoisted input projection: one big MXU matmul over all steps ----
        if layer == 0:
            x2d = x_ref[...].reshape(T * Bp, Ep)          # tile-aligned merge
            w_in = wih0_ref[...]
        else:
            x2d = seq_sc[...].reshape(T * Bp, Hp)
            w_in = wihr_ref[layer - 1]
        gx = jnp.dot(x2d, w_in, preferred_element_type=jnp.float32) + b_ref[layer]
        gx_sc[...] = gx.reshape(T, Bp, 4 * Hp)

        # Zero initial state (PyTorch nn.LSTM default when (h0, c0) not given).
        h_sc[...] = jnp.zeros_like(h_sc)
        c_sc[...] = jnp.zeros_like(c_sc)

        write_seq = layer < L - 1   # last layer's per-step output is unused

        def step(t, carry, _layer=layer, _write_seq=write_seq):
            # One MXU push per step: h_{t-1} @ W_hh^T; input part precomputed.
            gates = gx_sc[t] + jnp.dot(
                h_sc[...], whh_ref[_layer], preferred_element_type=jnp.float32)
            # PyTorch gate order [i, f, g, o]; each slice is lane-aligned (Hp).
            i_g = jax.nn.sigmoid(gates[:, 0 * Hp:1 * Hp])
            f_g = jax.nn.sigmoid(gates[:, 1 * Hp:2 * Hp])
            g_g = jnp.tanh(gates[:, 2 * Hp:3 * Hp])
            o_g = jax.nn.sigmoid(gates[:, 3 * Hp:4 * Hp])
            c_new = f_g * c_sc[...] + i_g * g_g
            h_new = o_g * jnp.tanh(c_new)
            c_sc[...] = c_new
            h_sc[...] = h_new
            if _write_seq:
                seq_sc[t] = h_new                         # feeds next layer
            return carry

        jax.lax.fori_loop(0, T, step, 0, unroll=(T <= 16))

        # Single final write of (h_T, c_T) for this layer.
        ht_ref[layer] = h_sc[...]
        ct_ref[layer] = c_sc[...]


def _encoder_lstm_call(x_pad, w_ih0, w_ih_rest, w_hh, bias):
    """x_pad: (T, Bp, Ep) f32 -> (ht, ct), each (L, Bp, Hp) f32."""
    T, Bp, _ = x_pad.shape
    L, Hp, _ = w_hh.shape

    vmem = pl.BlockSpec(memory_space=pltpu.MemorySpace.VMEM)
    out_shape = (
        jax.ShapeDtypeStruct((L, Bp, Hp), jnp.float32),
        jax.ShapeDtypeStruct((L, Bp, Hp), jnp.float32),
    )
    return pl.pallas_call(
        _encoder_lstm_kernel,
        out_shape=out_shape,
        in_specs=[vmem, vmem, vmem, vmem, vmem],
        out_specs=(vmem, vmem),
        scratch_shapes=[
            pltpu.VMEM((Bp, Hp), jnp.float32),          # h carry
            pltpu.VMEM((Bp, Hp), jnp.float32),          # c carry
            pltpu.VMEM((T, Bp, 4 * Hp), jnp.float32),   # hoisted input-proj gates
            pltpu.VMEM((T, Bp, Hp), jnp.float32),       # inter-layer activations
        ],
    )(x_pad, w_ih0, w_ih_rest, w_hh, bias)


# ----------------------------------------------------------------------------
# Encoder forward (glue): embedding gather + padding + kernel + unpad.
# ----------------------------------------------------------------------------
@functools.partial(jax.jit, static_argnames=("hidden_size",))
def _encoder_forward_impl(embedding, w_ih0, w_ih_rest, w_hh, bias, tokens, *,
                          hidden_size):
    T, B = tokens.shape
    Bp = _round_up(B, 8)
    # Embedding gather (table already lane-padded to Ep).
    # TODO(synk): could be fused into the kernel via scalar-prefetch row gather.
    emb = jnp.take(embedding, tokens, axis=0)             # (T, B, Ep)
    # nn.Dropout on embedding + inter-layer LSTM dropout: identity in eval mode.
    # TODO(synk): training-mode dropout (pltpu.prng_* Bernoulli masks) not applied.
    x = jnp.pad(emb, ((0, 0), (0, Bp - B), (0, 0)))       # pad batch to sublane multiple
    ht_p, ct_p = _encoder_lstm_call(x, w_ih0, w_ih_rest, w_hh, bias)
    return ht_p[:, :B, :hidden_size], ct_p[:, :B, :hidden_size]


def encoder_forward(params, tokens):
    """tokens: (T, B) int32 -> (ht, ct), each (num_layers, B, hidden_size)."""
    return _encoder_forward_impl(
        params["embedding"], params["w_ih0"], params["w_ih_rest"],
        params["w_hh"], params["bias"], tokens,
        hidden_size=params["hidden_size"])


# ----------------------------------------------------------------------------
# Deterministic parameter construction (mirrors nn.Embedding + nn.LSTM init),
# padded once to TPU-friendly shapes (per-gate padding keeps semantics exact:
# padded lanes of h/c stay identically zero through the recurrence).
# ----------------------------------------------------------------------------
def make_params(key, vocab_size, embedding_size, hidden_size, num_layers):
    E, H, L = embedding_size, hidden_size, num_layers
    Ep = _round_up(E, 128)
    Hp = _round_up(H, 128)

    keys = jax.random.split(key, 1 + 4 * L)
    emb = jax.random.normal(keys[0], (vocab_size, E), dtype=jnp.float32)

    k = 1.0 / (hidden_size ** 0.5)

    def pad_w(w, in_size, in_p):
        # w: (4H, in_size), gate order [i,f,g,o] -> (in_p, 4*Hp) per-gate padded.
        w4 = w.reshape(4, H, in_size)
        w4 = jnp.pad(w4, ((0, 0), (0, Hp - H), (0, in_p - in_size)))
        return jnp.transpose(w4.reshape(4 * Hp, in_p))

    def pad_b(b):
        # b: (4H,) -> (1, 4*Hp) per-gate padded.
        b4 = jnp.pad(b.reshape(4, H), ((0, 0), (0, Hp - H)))
        return b4.reshape(1, 4 * Hp)

    wih_list, whh_list, b_list = [], [], []
    for layer in range(L):
        in_size = E if layer == 0 else H
        in_p = Ep if layer == 0 else Hp
        kw = keys[1 + 4 * layer: 1 + 4 * (layer + 1)]
        w_ih = jax.random.uniform(kw[0], (4 * H, in_size),
                                  minval=-k, maxval=k, dtype=jnp.float32)
        w_hh = jax.random.uniform(kw[1], (4 * H, H),
                                  minval=-k, maxval=k, dtype=jnp.float32)
        b_ih = jax.random.uniform(kw[2], (4 * H,),
                                  minval=-k, maxval=k, dtype=jnp.float32)
        b_hh = jax.random.uniform(kw[3], (4 * H,),
                                  minval=-k, maxval=k, dtype=jnp.float32)
        wih_list.append(pad_w(w_ih, in_size, in_p))
        whh_list.append(pad_w(w_hh, H, Hp))
        b_list.append(pad_b(b_ih + b_hh))

    params = {
        "embedding": jnp.pad(emb, ((0, 0), (0, Ep - E))),        # (V, Ep)
        "w_ih0": wih_list[0],                                    # (Ep, 4*Hp)
        "w_ih_rest": (jnp.stack(wih_list[1:], axis=0) if L > 1
                      else jnp.zeros((1, Hp, 4 * Hp), jnp.float32)),
        "w_hh": jnp.stack(whh_list, axis=0),                     # (L, Hp, 4*Hp)
        "bias": jnp.stack(b_list, axis=0),                       # (L, 1, 4*Hp)
        "hidden_size": H,
    }
    return params


if __name__ == "__main__":
    VOCAB = 50
    EMBED = 32
    HIDDEN = 32
    NUM_LAYERS = 2
    SEQ_LEN = 8
    BATCH = 2

    key = jax.random.PRNGKey(0)
    pkey, tkey = jax.random.split(key)
    params = make_params(pkey, VOCAB, EMBED, HIDDEN, NUM_LAYERS)

    # input tokens, seq-major like PyTorch nn.LSTM default: (T, B)
    tokens = jax.random.randint(tkey, (SEQ_LEN, BATCH), 0, VOCAB, dtype=jnp.int32)

    ht, ct = encoder_forward(params, tokens)
    ht = jax.block_until_ready(ht)
    ct = jax.block_until_ready(ct)

    assert ht.shape == (NUM_LAYERS, BATCH, HIDDEN)
    assert ct.shape == (NUM_LAYERS, BATCH, HIDDEN)
    assert bool(jnp.all(jnp.isfinite(ht))) and bool(jnp.all(jnp.isfinite(ct)))

    print("KERNEL_OK")
</pallas_src>

<mosaic_0001>
module attributes {stable_mosaic.version = 11 : i64} {
  func.func @_encoder_lstm_kernel(%arg0: memref<8x8x128xf32, #tpu.memory_space<vmem>>, %arg1: memref<128x512xf32, #tpu.memory_space<vmem>>, %arg2: memref<1x128x512xf32, #tpu.memory_space<vmem>>, %arg3: memref<2x128x512xf32, #tpu.memory_space<vmem>>, %arg4: memref<2x1x512xf32, #tpu.memory_space<vmem>>, %arg5: memref<2x8x128xf32, #tpu.memory_space<vmem>>, %arg6: memref<2x8x128xf32, #tpu.memory_space<vmem>>, %arg7: memref<8x128xf32, #tpu.memory_space<vmem>>, %arg8: memref<8x128xf32, #tpu.memory_space<vmem>>, %arg9: memref<8x8x512xf32, #tpu.memory_space<vmem>>, %arg10: memref<8x8x128xf32, #tpu.memory_space<vmem>>) attributes {dimension_semantics = [], scalar_prefetch = 0 : i64, scratch_operands = 4 : i64, tpu.core_type = #tpu.core_type<tc>} {
    %c0 = arith.constant 0 : index
    %c0_0 = arith.constant 0 : index
    %c0_1 = arith.constant 0 : index
    %0 = vector.load %arg0[%c0, %c0_0, %c0_1] : memref<8x8x128xf32, #tpu.memory_space<vmem>>, vector<8x8x128xf32>
    %1 = vector.shape_cast %0 : vector<8x8x128xf32> to vector<64x128xf32>
    %c0_2 = arith.constant 0 : index
    %c0_3 = arith.constant 0 : index
    %2 = vector.load %arg1[%c0_2, %c0_3] : memref<128x512xf32, #tpu.memory_space<vmem>>, vector<128x512xf32>
    %cst = arith.constant dense<0.000000e+00> : vector<64x512xf32>
    %3 = tpu.matmul %1, %2, %cst {dimension_numbers = #tpu.dot_dimension_numbers<[1], [0], [0], [1], [0, 0, 1, 1], [], []>} : vector<64x128xf32>, vector<128x512xf32>, vector<64x512xf32> -> vector<64x512xf32>
    %c0_4 = arith.constant 0 : index
    %c0_5 = arith.constant 0 : index
    %c0_6 = arith.constant 0 : index
    %4 = vector.load %arg4[%c0_4, %c0_5, %c0_6] : memref<2x1x512xf32, #tpu.memory_space<vmem>>, vector<1x1x512xf32>
    %5 = vector.shape_cast %4 : vector<1x1x512xf32> to vector<1x512xf32>
    %6 = vector.broadcast %5 : vector<1x512xf32> to vector<64x512xf32>
    %7 = arith.addf %3, %6 : vector<64x512xf32>
    %8 = vector.shape_cast %7 : vector<64x512xf32> to vector<8x8x512xf32>
    %c0_7 = arith.constant 0 : index
    %c0_8 = arith.constant 0 : index
    %c0_9 = arith.constant 0 : index
    %9 = vector.load %arg9[%c0_7, %c0_8, %c0_9] : memref<8x8x512xf32, #tpu.memory_space<vmem>>, vector<8x8x512xf32>
    tpu.vector_store %arg9[%c0_7, %c0_8, %c0_9], %8 {strides = array<i32>} : memref<8x8x512xf32, #tpu.memory_space<vmem>>, vector<8x8x512xf32>,
    %cst_10 = arith.constant 0.000000e+00 : f32
    %10 = vector.broadcast %cst_10 : f32 to vector<8x128xf32>
    %c0_11 = arith.constant 0 : index
    %c0_12 = arith.constant 0 : index
    %11 = vector.load %arg7[%c0_11, %c0_12] : memref<8x128xf32, #tpu.memory_space<vmem>>, vector<8x128xf32>
    tpu.vector_store %arg7[%c0_11, %c0_12], %10 {strides = array<i32>} : memref<8x128xf32, #tpu.memory_space<vmem>>, vector<8x128xf32>,
    %cst_13 = arith.constant 0.000000e+00 : f32
    %12 = vector.broadcast %cst_13 : f32 to vector<8x128xf32>
    %c0_14 = arith.constant 0 : index
    %c0_15 = arith.constant 0 : index
    %13 = vector.load %arg8[%c0_14, %c0_15] : memref<8x128xf32, #tpu.memory_space<vmem>>, vector<8x128xf32>
    tpu.vector_store %arg8[%c0_14, %c0_15], %12 {strides = array<i32>} : memref<8x128xf32, #tpu.memory_space<vmem>>, vector<8x128xf32>,
    %c0_i32 = arith.constant 0 : i32
    %14 = arith.index_cast %c0_i32 : i32 to index
    %c0_16 = arith.constant 0 : index
    %c0_17 = arith.constant 0 : index
    %15 = vector.load %arg9[%14, %c0_16, %c0_17] : memref<8x8x512xf32, #tpu.memory_space<vmem>>, vector<1x8x512xf32>
    %16 = vector.shape_cast %15 : vector<1x8x512xf32> to vector<8x512xf32>
    %c0_18 = arith.constant 0 : index
    %c0_19 = arith.constant 0 : index
    %17 = vector.load %arg7[%c0_18, %c0_19] : memref<8x128xf32, #tpu.memory_space<vmem>>, vector<8x128xf32>
    %c0_20 = arith.constant 0 : index
    %c0_21 = arith.constant 0 : index
    %c0_22 = arith.constant 0 : index
    %18 = vector.load %arg3[%c0_20, %c0_21, %c0_22] : memref<2x128x512xf32, #tpu.memory_space<vmem>>, vector<1x128x512xf32>
    %19 = vector.shape_cast %18 : vector<1x128x512xf32> to vector<128x512xf32>
    %cst_23 = arith.constant dense<0.000000e+00> : vector<8x512xf32>
    %20 = tpu.matmul %17, %19, %cst_23 {dimension_numbers = #tpu.dot_dimension_numbers<[1], [0], [0], [1], [0, 0, 1, 1], [], []>} : vector<8x128xf32>, vector<128x512xf32>, vector<8x512xf32> -> vector<8x512xf32>
    %21 = arith.addf %16, %20 : vector<8x512xf32>
    %22 = vector.extract_strided_slice %21 {offsets = [0, 0], sizes = [8, 128], strides = [1, 1]} : vector<8x512xf32> to vector<8x128xf32>
    %23 = arith.negf %22 : vector<8x128xf32>
    %24 = math.exp %23 : vector<8x128xf32>
    %cst_24 = arith.constant 1.000000e+00 : f32
    %25 = vector.broadcast %cst_24 : f32 to vector<8x128xf32>
    %26 = arith.addf %25, %24 : vector<8x128xf32>
    %27 = arith.divf %25, %26 : vector<8x128xf32>
    %28 = vector.extract_strided_slice %21 {offsets = [0, 128], sizes = [8, 128], strides = [1, 1]} : vector<8x512xf32> to vector<8x128xf32>
    %29 = arith.negf %28 : vector<8x128xf32>
    %30 = math.exp %29 : vector<8x128xf32>
    %cst_25 = arith.constant 1.000000e+00 : f32
    %31 = vector.broadcast %cst_25 : f32 to vector<8x128xf32>
    %32 = arith.addf %31, %30 : vector<8x128xf32>
    %33 = arith.divf %31, %32 : vector<8x128xf32>
    %34 = vector.extract_strided_slice %21 {offsets = [0, 256], sizes = [8, 128], strides = [1, 1]} : vector<8x512xf32> to vector<8x128xf32>
    %35 = math.tanh %34 : vector<8x128xf32>
    %36 = vector.extract_strided_slice %21 {offsets = [0, 384], sizes = [8, 128], strides = [1, 1]} : vector<8x512xf32> to vector<8x128xf32>
    %37 = arith.negf %36 : vector<8x128xf32>
    %38 = math.exp %37 : vector<8x128xf32>
    %cst_26 = arith.constant 1.000000e+00 : f32
    %39 = vector.broadcast %cst_26 : f32 to vector<8x128xf32>
    %40 = arith.addf %39, %38 : vector<8x128xf32>
    %41 = arith.divf %39, %40 : vector<8x128xf32>
    %c0_27 = arith.constant 0 : index
    %c0_28 = arith.constant 0 : index
    %42 = vector.load %arg8[%c0_27, %c0_28] : memref<8x128xf32, #tpu.memory_space<vmem>>, vector<8x128xf32>
    %43 = arith.mulf %33, %42 : vector<8x128xf32>
    %44 = arith.mulf %27, %35 : vector<8x128xf32>
    %45 = arith.addf %43, %44 : vector<8x128xf32>
    %46 = math.tanh %45 : vector<8x128xf32>
    %47 = arith.mulf %41, %46 : vector<8x128xf32>
    %c0_29 = arith.constant 0 : index
    %c0_30 = arith.constant 0 : index
    %48 = vector.load %arg8[%c0_29, %c0_30] : memref<8x128xf32, #tpu.memory_space<vmem>>, vector<8x128xf32>
    tpu.vector_store %arg8[%c0_29, %c0_30], %45 {strides = array<i32>} : memref<8x128xf32, #tpu.memory_space<vmem>>, vector<8x128xf32>,
    %c0_31 = arith.constant 0 : index
    %c0_32 = arith.constant 0 : index
    %49 = vector.load %arg7[%c0_31, %c0_32] : memref<8x128xf32, #tpu.memory_space<vmem>>, vector<8x128xf32>
    tpu.vector_store %arg7[%c0_31, %c0_32], %47 {strides = array<i32>} : memref<8x128xf32, #tpu.memory_space<vmem>>, vector<8x128xf32>,
    %50 = arith.index_cast %c0_i32 : i32 to index
    %c0_33 = arith.constant 0 : index
    %c0_34 = arith.constant 0 : index
    %51 = vector.load %arg10[%50, %c0_33, %c0_34] : memref<8x8x128xf32, #tpu.memory_space<vmem>>, vector<1x8x128xf32>
    %52 = vector.shape_cast %51 : vector<1x8x128xf32> to vector<8x128xf32>
    %53 = vector.shape_cast %47 : vector<8x128xf32> to vector<1x8x128xf32>
    tpu.vector_store %arg10[%50, %c0_33, %c0_34], %53 {strides = array<i32>} : memref<8x8x128xf32, #tpu.memory_space<vmem>>, vector<1x8x128xf32>,
    %c1_i32 = arith.constant 1 : i32
    %54 = arith.index_cast %c1_i32 : i32 to index
    %c0_35 = arith.constant 0 : index
    %c0_36 = arith.constant 0 : index
    %55 = vector.load %arg9[%54, %c0_35, %c0_36] : memref<8x8x512xf32, #tpu.memory_space<vmem>>, vector<1x8x512xf32>
    %56 = vector.shape_cast %55 : vector<1x8x512xf32> to vector<8x512xf32>
    %c0_37 = arith.constant 0 : index
    %c0_38 = arith.constant 0 : index
    %57 = vector.load %arg7[%c0_37, %c0_38] : memref<8x128xf32, #tpu.memory_space<vmem>>, vector<8x128xf32>
    %c0_39 = arith.constant 0 : index
    %c0_40 = arith.constant 0 : index
    %c0_41 = arith.constant 0 : index
    %58 = vector.load %arg3[%c0_39, %c0_40, %c0_41] : memref<2x128x512xf32, #tpu.memory_space<vmem>>, vector<1x128x512xf32>
    %59 = vector.shape_cast %58 : vector<1x128x512xf32> to vector<128x512xf32>
    %cst_42 = arith.constant dense<0.000000e+00> : vector<8x512xf32>
    %60 = tpu.matmul %57, %59, %cst_42 {dimension_numbers = #tpu.dot_dimension_numbers<[1], [0], [0], [1], [0, 0, 1, 1], [], []>} : vector<8x128xf32>, vector<128x512xf32>, vector<8x512xf32> -> vector<8x512xf32>
    %61 = arith.addf %56, %60 : vector<8x512xf32>
    %62 = vector.extract_strided_slice %61 {offsets = [0, 0], sizes = [8, 128], strides = [1, 1]} : vector<8x512xf32> to vector<8x128xf32>
    %63 = arith.negf %62 : vector<8x128xf32>
    %64 = math.exp %63 : vector<8x128xf32>
    %cst_43 = arith.constant 1.000000e+00 : f32
    %65 = vector.broadcast %cst_43 : f32 to vector<8x128xf32>
    %66 = arith.addf %65, %64 : vector<8x128xf32>
    %67 = arith.divf %65, %66 : vector<8x128xf32>
    %68 = vector.extract_strided_slice %61 {offsets = [0, 128], sizes = [8, 128], strides = [1, 1]} : vector<8x512xf32> to vector<8x128xf32>
    %69 = arith.negf %68 : vector<8x128xf32>
    %70 = math.exp %69 : vector<8x128xf32>
    %cst_44 = arith.constant 1.000000e+00 : f32
    %71 = vector.broadcast %cst_44 : f32 to vector<8x128xf32>
    %72 = arith.addf %71, %70 : vector<8x128xf32>
    %73 = arith.divf %71, %72 : vector<8x128xf32>
    %74 = vector.extract_strided_slice %61 {offsets = [0, 256], sizes = [8, 128], strides = [1, 1]} : vector<8x512xf32> to vector<8x128xf32>
    %75 = math.tanh %74 : vector<8x128xf32>
    %76 = vector.extract_strided_slice %61 {offsets = [0, 384], sizes = [8, 128], strides = [1, 1]} : vector<8x512xf32> to vector<8x128xf32>
    %77 = arith.negf %76 : vector<8x128xf32>
    %78 = math.exp %77 : vector<8x128xf32>
    %cst_45 = arith.constant 1.000000e+00 : f32
    %79 = vector.broadcast %cst_45 : f32 to vector<8x128xf32>
    %80 = arith.addf %79, %78 : vector<8x128xf32>
    %81 = arith.divf %79, %80 : vector<8x128xf32>
    %c0_46 = arith.constant 0 : index
    %c0_47 = arith.constant 0 : index
    %82 = vector.load %arg8[%c0_46, %c0_47] : memref<8x128xf32, #tpu.memory_space<vmem>>, vector<8x128xf32>
    %83 = arith.mulf %73, %82 : vector<8x128xf32>
    %84 = arith.mulf %67, %75 : vector<8x128xf32>
    %85 = arith.addf %83, %84 : vector<8x128xf32>
    %86 = math.tanh %85 : vector<8x128xf32>
    %87 = arith.mulf %81, %86 : vector<8x128xf32>
    %c0_48 = arith.constant 0 : index
    %c0_49 = arith.constant 0 : index
    %88 = vector.load %arg8[%c0_48, %c0_49] : memref<8x128xf32, #tpu.memory_space<vmem>>, vector<8x128xf32>
    tpu.vector_store %arg8[%c0_48, %c0_49], %85 {strides = array<i32>} : memref<8x128xf32, #tpu.memory_space<vmem>>, vector<8x128xf32>,
    %c0_50 = arith.constant 0 : index
    %c0_51 = arith.constant 0 : index
    %89 = vector.load %arg7[%c0_50, %c0_51] : memref<8x128xf32, #tpu.memory_space<vmem>>, vector<8x128xf32>
    tpu.vector_store %arg7[%c0_50, %c0_51], %87 {strides = array<i32>} : memref<8x128xf32, #tpu.memory_space<vmem>>, vector<8x128xf32>,
    %90 = arith.index_cast %c1_i32 : i32 to index
    %c0_52 = arith.constant 0 : index
    %c0_53 = arith.constant 0 : index
    %91 = vector.load %arg10[%90, %c0_52, %c0_53] : memref<8x8x128xf32, #tpu.memory_space<vmem>>, vector<1x8x128xf32>
    %92 = vector.shape_cast %91 : vector<1x8x128xf32> to vector<8x128xf32>
    %93 = vector.shape_cast %87 : vector<8x128xf32> to vector<1x8x128xf32>
    tpu.vector_store %arg10[%90, %c0_52, %c0_53], %93 {strides = array<i32>} : memref<8x8x128xf32, #tpu.memory_space<vmem>>, vector<1x8x128xf32>,
    %c2_i32 = arith.constant 2 : i32
    %94 = arith.index_cast %c2_i32 : i32 to index
    %c0_54 = arith.constant 0 : index
    %c0_55 = arith.constant 0 : index
    %95 = vector.load %arg9[%94, %c0_54, %c0_55] : memref<8x8x512xf32, #tpu.memory_space<vmem>>, vector<1x8x512xf32>
    %96 = vector.shape_cast %95 : vector<1x8x512xf32> to vector<8x512xf32>
    %c0_56 = arith.constant 0 : index
    %c0_57 = arith.constant 0 : index
    %97 = vector.load %arg7[%c0_56, %c0_57] : memref<8x128xf32, #tpu.memory_space<vmem>>, vector<8x128xf32>
    %c0_58 = arith.constant 0 : index
    %c0_59 = arith.constant 0 : index
    %c0_60 = arith.constant 0 : index
    %98 = vector.load %arg3[%c0_58, %c0_59, %c0_60] : memref<2x128x512xf32, #tpu.memory_space<vmem>>, vector<1x128x512xf32>
    %99 = vector.shape_cast %98 : vector<1x128x512xf32> to vector<128x512xf32>
    %cst_61 = arith.constant dense<0.000000e+00> : vector<8x512xf32>
    %100 = tpu.matmul %97, %99, %cst_61 {dimension_numbers = #tpu.dot_dimension_numbers<[1], [0], [0], [1], [0, 0, 1, 1], [], []>} : vector<8x128xf32>, vector<128x512xf32>, vector<8x512xf32> -> vector<8x512xf32>
    %101 = arith.addf %96, %100 : vector<8x512xf32>
    %102 = vector.extract_strided_slice %101 {offsets = [0, 0], sizes = [8, 128], strides = [1, 1]} : vector<8x512xf32> to vector<8x128xf32>
    %103 = arith.negf %102 : vector<8x128xf32>
    %104 = math.exp %103 : vector<8x128xf32>
    %cst_62 = arith.constant 1.000000e+00 : f32
    %105 = vector.broadcast %cst_62 : f32 to vector<8x128xf32>
    %106 = arith.addf %105, %104 : vector<8x128xf32>
    %107 = arith.divf %105, %106 : vector<8x128xf32>
    %108 = vector.extract_strided_slice %101 {offsets = [0, 128], sizes = [8, 128], strides = [1, 1]} : vector<8x512xf32> to vector<8x128xf32>
    %109 = arith.negf %108 : vector<8x128xf32>
    %110 = math.exp %109 : vector<8x128xf32>
    %cst_63 = arith.constant 1.000000e+00 : f32
    %111 = vector.broadcast %cst_63 : f32 to vector<8x128xf32>
    %112 = arith.addf %111, %110 : vector<8x128xf32>
    %113 = arith.divf %111, %112 : vector<8x128xf32>
    %114 = vector.extract_strided_slice %101 {offsets = [0, 256], sizes = [8, 128], strides = [1, 1]} : vector<8x512xf32> to vector<8x128xf32>
    %115 = math.tanh %114 : vector<8x128xf32>
    %116 = vector.extract_strided_slice %101 {offsets = [0, 384], sizes = [8, 128], strides = [1, 1]} : vector<8x512xf32> to vector<8x128xf32>
    %117 = arith.negf %116 : vector<8x128xf32>
    %118 = math.exp %117 : vector<8x128xf32>
    %cst_64 = arith.constant 1.000000e+00 : f32
    %119 = vector.broadcast %cst_64 : f32 to vector<8x128xf32>
    %120 = arith.addf %119, %118 : vector<8x128xf32>
    %121 = arith.divf %119, %120 : vector<8x128xf32>
    %c0_65 = arith.constant 0 : index
    %c0_66 = arith.constant 0 : index
    %122 = vector.load %arg8[%c0_65, %c0_66] : memref<8x128xf32, #tpu.memory_space<vmem>>, vector<8x128xf32>
    %123 = arith.mulf %113, %122 : vector<8x128xf32>
    %124 = arith.mulf %107, %115 : vector<8x128xf32>
    %125 = arith.addf %123, %124 : vector<8x128xf32>
    %126 = math.tanh %125 : vector<8x128xf32>
    %127 = arith.mulf %121, %126 : vector<8x128xf32>
    %c0_67 = arith.constant 0 : index
    %c0_68 = arith.constant 0 : index
    %128 = vector.load %arg8[%c0_67, %c0_68] : memref<8x128xf32, #tpu.memory_space<vmem>>, vector<8x128xf32>
    tpu.vector_store %arg8[%c0_67, %c0_68], %125 {strides = array<i32>} : memref<8x128xf32, #tpu.memory_space<vmem>>, vector<8x128xf32>,
    %c0_69 = arith.constant 0 : index
    %c0_70 = arith.constant 0 : index
    %129 = vector.load %arg7[%c0_69, %c0_70] : memref<8x128xf32, #tpu.memory_space<vmem>>, vector<8x128xf32>
    tpu.vector_store %arg7[%c0_69, %c0_70], %127 {strides = array<i32>} : memref<8x128xf32, #tpu.memory_space<vmem>>, vector<8x128xf32>,
    %130 = arith.index_cast %c2_i32 : i32 to index
    %c0_71 = arith.constant 0 : index
    %c0_72 = arith.constant 0 : index
    %131 = vector.load %arg10[%130, %c0_71, %c0_72] : memref<8x8x128xf32, #tpu.memory_space<vmem>>, vector<1x8x128xf32>
    %132 = vector.shape_cast %131 : vector<1x8x128xf32> to vector<8x128xf32>
    %133 = vector.shape_cast %127 : vector<8x128xf32> to vector<1x8x128xf32>
    tpu.vector_store %arg10[%130, %c0_71, %c0_72], %133 {strides = array<i32>} : memref<8x8x128xf32, #tpu.memory_space<vmem>>, vector<1x8x128xf32>,
    %c3_i32 = arith.constant 3 : i32
    %134 = arith.index_cast %c3_i32 : i32 to index
    %c0_73 = arith.constant 0 : index
    %c0_74 = arith.constant 0 : index
    %135 = vector.load %arg9[%134, %c0_73, %c0_74] : memref<8x8x512xf32, #tpu.memory_space<vmem>>, vector<1x8x512xf32>
    %136 = vector.shape_cast %135 : vector<1x8x512xf32> to vector<8x512xf32>
    %c0_75 = arith.constant 0 : index
    %c0_76 = arith.constant 0 : index
    %137 = vector.load %arg7[%c0_75, %c0_76] : memref<8x128xf32, #tpu.memory_space<vmem>>, vector<8x128xf32>
    %c0_77 = arith.constant 0 : index
    %c0_78 = arith.constant 0 : index
    %c0_79 = arith.constant 0 : index
    %138 = vector.load %arg3[%c0_77, %c0_78, %c0_79] : memref<2x128x512xf32, #tpu.memory_space<vmem>>, vector<1x128x512xf32>
    %139 = vector.shape_cast %138 : vector<1x128x512xf32> to vector<128x512xf32>
    %cst_80 = arith.constant dense<0.000000e+00> : vector<8x512xf32>
    %140 = tpu.matmul %137, %139, %cst_80 {dimension_numbers = #tpu.dot_dimension_numbers<[1], [0], [0], [1], [0, 0, 1, 1], [], []>} : vector<8x128xf32>, vector<128x512xf32>, vector<8x512xf32> -> vector<8x512xf32>
    %141 = arith.addf %136, %140 : vector<8x512xf32>
    %142 = vector.extract_strided_slice %141 {offsets = [0, 0], sizes = [8, 128], strides = [1, 1]} : vector<8x512xf32> to vector<8x128xf32>
    %143 = arith.negf %142 : vector<8x128xf32>
    %144 = math.exp %143 : vector<8x128xf32>
    %cst_81 = arith.constant 1.000000e+00 : f32
    %145 = vector.broadcast %cst_81 : f32 to vector<8x128xf32>
    %146 = arith.addf %145, %144 : vector<8x128xf32>
    %147 = arith.divf %145, %146 : vector<8x128xf32>
    %148 = vector.extract_strided_slice %141 {offsets = [0, 128], sizes = [8, 128], strides = [1, 1]} : vector<8x512xf32> to vector<8x128xf32>
    %149 = arith.negf %148 : vector<8x128xf32>
    %150 = math.exp %149 : vector<8x128xf32>
    %cst_82 = arith.constant 1.000000e+00 : f32
    %151 = vector.broadcast %cst_82 : f32 to vector<8x128xf32>
    %152 = arith.addf %151, %150 : vector<8x128xf32>
    %153 = arith.divf %151, %152 : vector<8x128xf32>
    %154 = vector.extract_strided_slice %141 {offsets = [0, 256], sizes = [8, 128], strides = [1, 1]} : vector<8x512xf32> to vector<8x128xf32>
    %155 = math.tanh %154 : vector<8x128xf32>
    %156 = vector.extract_strided_slice %141 {offsets = [0, 384], sizes = [8, 128], strides = [1, 1]} : vector<8x512xf32> to vector<8x128xf32>
    %157 = arith.negf %156 : vector<8x128xf32>
    %158 = math.exp %157 : vector<8x128xf32>
    %cst_83 = arith.constant 1.000000e+00 : f32
    %159 = vector.broadcast %cst_83 : f32 to vector<8x128xf32>
    %160 = arith.addf %159, %158 : vector<8x128xf32>
    %161 = arith.divf %159, %160 : vector<8x128xf32>
    %c0_84 = arith.constant 0 : index
    %c0_85 = arith.constant 0 : index
    %162 = vector.load %arg8[%c0_84, %c0_85] : memref<8x128xf32, #tpu.memory_space<vmem>>, vector<8x128xf32>
    %163 = arith.mulf %153, %162 : vector<8x128xf32>
    %164 = arith.mulf %147, %155 : vector<8x128xf32>
    %165 = arith.addf %163, %164 : vector<8x128xf32>
    %166 = math.tanh %165 : vector<8x128xf32>
    %167 = arith.mulf %161, %166 : vector<8x128xf32>
    %c0_86 = arith.constant 0 : index
    %c0_87 = arith.constant 0 : index
    %168 = vector.load %arg8[%c0_86, %c0_87] : memref<8x128xf32, #tpu.memory_space<vmem>>, vector<8x128xf32>
    tpu.vector_store %arg8[%c0_86, %c0_87], %165 {strides = array<i32>} : memref<8x128xf32, #tpu.memory_space<vmem>>, vector<8x128xf32>,
    %c0_88 = arith.constant 0 : index
    %c0_89 = arith.constant 0 : index
    %169 = vector.load %arg7[%c0_88, %c0_89] : memref<8x128xf32, #tpu.memory_space<vmem>>, vector<8x128xf32>
    tpu.vector_store %arg7[%c0_88, %c0_89], %167 {strides = array<i32>} : memref<8x128xf32, #tpu.memory_space<vmem>>, vector<8x128xf32>,
    %170 = arith.index_cast %c3_i32 : i32 to index
    %c0_90 = arith.constant 0 : index
    %c0_91 = arith.constant 0 : index
    %171 = vector.load %arg10[%170, %c0_90, %c0_91] : memref<8x8x128xf32, #tpu.memory_space<vmem>>, vector<1x8x128xf32>
    %172 = vector.shape_cast %171 : vector<1x8x128xf32> to vector<8x128xf32>
    %173 = vector.shape_cast %167 : vector<8x128xf32> to vector<1x8x128xf32>
    tpu.vector_store %arg10[%170, %c0_90, %c0_91], %173 {strides = array<i32>} : memref<8x8x128xf32, #tpu.memory_space<vmem>>, vector<1x8x128xf32>,
    %c4_i32 = arith.constant 4 : i32
    %174 = arith.index_cast %c4_i32 : i32 to index
    %c0_92 = arith.constant 0 : index
    %c0_93 = arith.constant 0 : index
    %175 = vector.load %arg9[%174, %c0_92, %c0_93] : memref<8x8x512xf32, #tpu.memory_space<vmem>>, vector<1x8x512xf32>
    %176 = vector.shape_cast %175 : vector<1x8x512xf32> to vector<8x512xf32>
    %c0_94 = arith.constant 0 : index
    %c0_95 = arith.constant 0 : index
    %177 = vector.load %arg7[%c0_94, %c0_95] : memref<8x128xf32, #tpu.memory_space<vmem>>, vector<8x128xf32>
    %c0_96 = arith.constant 0 : index
    %c0_97 = arith.constant 0 : index
    %c0_98 = arith.constant 0 : index
    %178 = vector.load %arg3[%c0_96, %c0_97, %c0_98] : memref<2x128x512xf32, #tpu.memory_space<vmem>>, vector<1x128x512xf32>
    %179 = vector.shape_cast %178 : vector<1x128x512xf32> to vector<128x512xf32>
    %cst_99 = arith.constant dense<0.000000e+00> : vector<8x512xf32>
    %180 = tpu.matmul %177, %179, %cst_99 {dimension_numbers = #tpu.dot_dimension_numbers<[1], [0], [0], [1], [0, 0, 1, 1], [], []>} : vector<8x128xf32>, vector<128x512xf32>, vector<8x512xf32> -> vector<8x512xf32>
    %181 = arith.addf %176, %180 : vector<8x512xf32>
    %182 = vector.extract_strided_slice %181 {offsets = [0, 0], sizes = [8, 128], strides = [1, 1]} : vector<8x512xf32> to vector<8x128xf32>
    %183 = arith.negf %182 : vector<8x128xf32>
    %184 = math.exp %183 : vector<8x128xf32>
    %cst_100 = arith.constant 1.000000e+00 : f32
    %185 = vector.broadcast %cst_100 : f32 to vector<8x128xf32>
    %186 = arith.addf %185, %184 : vector<8x128xf32>
    %187 = arith.divf %185, %186 : vector<8x128xf32>
    %188 = vector.extract_strided_slice %181 {offsets = [0, 128], sizes = [8, 128], strides = [1, 1]} : vector<8x512xf32> to vector<8x128xf32>
    %189 = arith.negf %188 : vector<8x128xf32>
    %190 = math.exp %189 : vector<8x128xf32>
    %cst_101 = arith.constant 1.000000e+00 : f32
    %191 = vector.broadcast %cst_101 : f32 to vector<8x128xf32>
    %192 = arith.addf %191, %190 : vector<8x128xf32>
    %193 = arith.divf %191, %192 : vector<8x128xf32>
    %194 = vector.extract_strided_slice %181 {offsets = [0, 256], sizes = [8, 128], strides = [1, 1]} : vector<8x512xf32> to vector<8x128xf32>
    %195 = math.tanh %194 : vector<8x128xf32>
    %196 = vector.extract_strided_slice %181 {offsets = [0, 384], sizes = [8, 128], strides = [1, 1]} : vector<8x512xf32> to vector<8x128xf32>
    %197 = arith.negf %196 : vector<8x128xf32>
    %198 = math.exp %197 : vector<8x128xf32>
    %cst_102 = arith.constant 1.000000e+00 : f32
    %199 = vector.broadcast %cst_102 : f32 to vector<8x128xf32>
    %200 = arith.addf %199, %198 : vector<8x128xf32>
    %201 = arith.divf %199, %200 : vector<8x128xf32>
    %c0_103 = arith.constant 0 : index
    %c0_104 = arith.constant 0 : index
    %202 = vector.load %arg8[%c0_103, %c0_104] : memref<8x128xf32, #tpu.memory_space<vmem>>, vector<8x128xf32>
    %203 = arith.mulf %193, %202 : vector<8x128xf32>
    %204 = arith.mulf %187, %195 : vector<8x128xf32>
    %205 = arith.addf %203, %204 : vector<8x128xf32>
    %206 = math.tanh %205 : vector<8x128xf32>
    %207 = arith.mulf %201, %206 : vector<8x128xf32>
    %c0_105 = arith.constant 0 : index
    %c0_106 = arith.constant 0 : index
    %208 = vector.load %arg8[%c0_105, %c0_106] : memref<8x128xf32, #tpu.memory_space<vmem>>, vector<8x128xf32>
    tpu.vector_store %arg8[%c0_105, %c0_106], %205 {strides = array<i32>} : memref<8x128xf32, #tpu.memory_space<vmem>>, vector<8x128xf32>,
    %c0_107 = arith.constant 0 : index
    %c0_108 = arith.constant 0 : index
    %209 = vector.load %arg7[%c0_107, %c0_108] : memref<8x128xf32, #tpu.memory_space<vmem>>, vector<8x128xf32>
    tpu.vector_store %arg7[%c0_107, %c0_108], %207 {strides = array<i32>} : memref<8x128xf32, #tpu.memory_space<vmem>>, vector<8x128xf32>,
    %210 = arith.index_cast %c4_i32 : i32 to index
    %c0_109 = arith.constant 0 : index
    %c0_110 = arith.constant 0 : index
    %211 = vector.load %arg10[%210, %c0_109, %c0_110] : memref<8x8x128xf32, #tpu.memory_space<vmem>>, vector<1x8x128xf32>
    %212 = vector.shape_cast %211 : vector<1x8x128xf32> to vector<8x128xf32>
    %213 = vector.shape_cast %207 : vector<8x128xf32> to vector<1x8x128xf32>
    tpu.vector_store %arg10[%210, %c0_109, %c0_110], %213 {strides = array<i32>} : memref<8x8x128xf32, #tpu.memory_space<vmem>>, vector<1x8x128xf32>,
    %c5_i32 = arith.constant 5 : i32
    %214 = arith.index_cast %c5_i32 : i32 to index
    %c0_111 = arith.constant 0 : index
    %c0_112 = arith.constant 0 : index
    %215 = vector.load %arg9[%214, %c0_111, %c0_112] : memref<8x8x512xf32, #tpu.memory_space<vmem>>, vector<1x8x512xf32>
    %216 = vector.shape_cast %215 : vector<1x8x512xf32> to vector<8x512xf32>
    %c0_113 = arith.constant 0 : index
    %c0_114 = arith.constant 0 : index
    %217 = vector.load %arg7[%c0_113, %c0_114] : memref<8x128xf32, #tpu.memory_space<vmem>>, vector<8x128xf32>
    %c0_115 = arith.constant 0 : index
    %c0_116 = arith.constant 0 : index
    %c0_117 = arith.constant 0 : index
    %218 = vector.load %arg3[%c0_115, %c0_116, %c0_117] : memref<2x128x512xf32, #tpu.memory_space<vmem>>, vector<1x128x512xf32>
    %219 = vector.shape_cast %218 : vector<1x128x512xf32> to vector<128x512xf32>
    %cst_118 = arith.constant dense<0.000000e+00> : vector<8x512xf32>
    %220 = tpu.matmul %217, %219, %cst_118 {dimension_numbers = #tpu.dot_dimension_numbers<[1], [0], [0], [1], [0, 0, 1, 1], [], []>} : vector<8x128xf32>, vector<128x512xf32>, vector<8x512xf32> -> vector<8x512xf32>
    %221 = arith.addf %216, %220 : vector<8x512xf32>
    %222 = vector.extract_strided_slice %221 {offsets = [0, 0], sizes = [8, 128], strides = [1, 1]} : vector<8x512xf32> to vector<8x128xf32>
    %223 = arith.negf %222 : vector<8x128xf32>
    %224 = math.exp %223 : vector<8x128xf32>
    %cst_119 = arith.constant 1.000000e+00 : f32
    %225 = vector.broadcast %cst_119 : f32 to vector<8x128xf32>
    %226 = arith.addf %225, %224 : vector<8x128xf32>
    %227 = arith.divf %225, %226 : vector<8x128xf32>
    %228 = vector.extract_strided_slice %221 {offsets = [0, 128], sizes = [8, 128], strides = [1, 1]} : vector<8x512xf32> to vector<8x128xf32>
    %229 = arith.negf %228 : vector<8x128xf32>
    %230 = math.exp %229 : vector<8x128xf32>
    %cst_120 = arith.constant 1.000000e+00 : f32
    %231 = vector.broadcast %cst_120 : f32 to vector<8x128xf32>
    %232 = arith.addf %231, %230 : vector<8x128xf32>
    %233 = arith.divf %231, %232 : vector<8x128xf32>
    %234 = vector.extract_strided_slice %221 {offsets = [0, 256], sizes = [8, 128], strides = [1, 1]} : vector<8x512xf32> to vector<8x128xf32>
    %235 = math.tanh %234 : vector<8x128xf32>
    %236 = vector.extract_strided_slice %221 {offsets = [0, 384], sizes = [8, 128], strides = [1, 1]} : vector<8x512xf32> to vector<8x128xf32>
    %237 = arith.negf %236 : vector<8x128xf32>
    %238 = math.exp %237 : vector<8x128xf32>
    %cst_121 = arith.constant 1.000000e+00 : f32
    %239 = vector.broadcast %cst_121 : f32 to vector<8x128xf32>
    %240 = arith.addf %239, %238 : vector<8x128xf32>
    %241 = arith.divf %239, %240 : vector<8x128xf32>
    %c0_122 = arith.constant 0 : index
    %c0_123 = arith.constant 0 : index
    %242 = vector.load %arg8[%c0_122, %c0_123] : memref<8x128xf32, #tpu.memory_space<vmem>>, vector<8x128xf32>
    %243 = arith.mulf %233, %242 : vector<8x128xf32>
    %244 = arith.mulf %227, %235 : vector<8x128xf32>
    %245 = arith.addf %243, %244 : vector<8x128xf32>
    %246 = math.tanh %245 : vector<8x128xf32>
    %247 = arith.mulf %241, %246 : vector<8x128xf32>
    %c0_124 = arith.constant 0 : index
    %c0_125 = arith.constant 0 : index
    %248 = vector.load %arg8[%c0_124, %c0_125] : memref<8x128xf32, #tpu.memory_space<vmem>>, vector<8x128xf32>
    tpu.vector_store %arg8[%c0_124, %c0_125], %245 {strides = array<i32>} : memref<8x128xf32, #tpu.memory_space<vmem>>, vector<8x128xf32>,
    %c0_126 = arith.constant 0 : index
    %c0_127 = arith.constant 0 : index
    %249 = vector.load %arg7[%c0_126, %c0_127] : memref<8x128xf32, #tpu.memory_space<vmem>>, vector<8x128xf32>
    tpu.vector_store %arg7[%c0_126, %c0_127], %247 {strides = array<i32>} : memref<8x128xf32, #tpu.memory_space<vmem>>, vector<8x128xf32>,
    %250 = arith.index_cast %c5_i32 : i32 to index
    %c0_128 = arith.constant 0 : index
    %c0_129 = arith.constant 0 : index
    %251 = vector.load %arg10[%250, %c0_128, %c0_129] : memref<8x8x128xf32, #tpu.memory_space<vmem>>, vector<1x8x128xf32>
    %252 = vector.shape_cast %251 : vector<1x8x128xf32> to vector<8x128xf32>
    %253 = vector.shape_cast %247 : vector<8x128xf32> to vector<1x8x128xf32>
    tpu.vector_store %arg10[%250, %c0_128, %c0_129], %253 {strides = array<i32>} : memref<8x8x128xf32, #tpu.memory_space<vmem>>, vector<1x8x128xf32>,
    %c6_i32 = arith.constant 6 : i32
    %254 = arith.index_cast %c6_i32 : i32 to index
    %c0_130 = arith.constant 0 : index
    %c0_131 = arith.constant 0 : index
    %255 = vector.load %arg9[%254, %c0_130, %c0_131] : memref<8x8x512xf32, #tpu.memory_space<vmem>>, vector<1x8x512xf32>
    %256 = vector.shape_cast %255 : vector<1x8x512xf32> to vector<8x512xf32>
    %c0_132 = arith.constant 0 : index
    %c0_133 = arith.constant 0 : index
    %257 = vector.load %arg7[%c0_132, %c0_133] : memref<8x128xf32, #tpu.memory_space<vmem>>, vector<8x128xf32>
    %c0_134 = arith.constant 0 : index
    %c0_135 = arith.constant 0 : index
    %c0_136 = arith.constant 0 : index
    %258 = vector.load %arg3[%c0_134, %c0_135, %c0_136] : memref<2x128x512xf32, #tpu.memory_space<vmem>>, vector<1x128x512xf32>
    %259 = vector.shape_cast %258 : vector<1x128x512xf32> to vector<128x512xf32>
    %cst_137 = arith.constant dense<0.000000e+00> : vector<8x512xf32>
    %260 = tpu.matmul %257, %259, %cst_137 {dimension_numbers = #tpu.dot_dimension_numbers<[1], [0], [0], [1], [0, 0, 1, 1], [], []>} : vector<8x128xf32>, vector<128x512xf32>, vector<8x512xf32> -> vector<8x512xf32>
    %261 = arith.addf %256, %260 : vector<8x512xf32>
    %262 = vector.extract_strided_slice %261 {offsets = [0, 0], sizes = [8, 128], strides = [1, 1]} : vector<8x512xf32> to vector<8x128xf32>
    %263 = arith.negf %262 : vector<8x128xf32>
    %264 = math.exp %263 : vector<8x128xf32>
    %cst_138 = arith.constant 1.000000e+00 : f32
    %265 = vector.broadcast %cst_138 : f32 to vector<8x128xf32>
    %266 = arith.addf %265, %264 : vector<8x128xf32>
    %267 = arith.divf %265, %266 : vector<8x128xf32>
    %268 = vector.extract_strided_slice %261 {offsets = [0, 128], sizes = [8, 128], strides = [1, 1]} : vector<8x512xf32> to vector<8x128xf32>
    %269 = arith.negf %268 : vector<8x128xf32>
    %270 = math.exp %269 : vector<8x128xf32>
    %cst_139 = arith.constant 1.000000e+00 : f32
    %271 = vector.broadcast %cst_139 : f32 to vector<8x128xf32>
    %272 = arith.addf %271, %270 : vector<8x128xf32>
    %273 = arith.divf %271, %272 : vector<8x128xf32>
    %274 = vector.extract_strided_slice %261 {offsets = [0, 256], sizes = [8, 128], strides = [1, 1]} : vector<8x512xf32> to vector<8x128xf32>
    %275 = math.tanh %274 : vector<8x128xf32>
    %276 = vector.extract_strided_slice %261 {offsets = [0, 384], sizes = [8, 128], strides = [1, 1]} : vector<8x512xf32> to vector<8x128xf32>
    %277 = arith.negf %276 : vector<8x128xf32>
    %278 = math.exp %277 : vector<8x128xf32>
    %cst_140 = arith.constant 1.000000e+00 : f32
    %279 = vector.broadcast %cst_140 : f32 to vector<8x128xf32>
    %280 = arith.addf %279, %278 : vector<8x128xf32>
    %281 = arith.divf %279, %280 : vector<8x128xf32>
    %c0_141 = arith.constant 0 : index
    %c0_142 = arith.constant 0 : index
    %282 = vector.load %arg8[%c0_141, %c0_142] : memref<8x128xf32, #tpu.memory_space<vmem>>, vector<8x128xf32>
    %283 = arith.mulf %273, %282 : vector<8x128xf32>
    %284 = arith.mulf %267, %275 : vector<8x128xf32>
    %285 = arith.addf %283, %284 : vector<8x128xf32>
    %286 = math.tanh %285 : vector<8x128xf32>
    %287 = arith.mulf %281, %286 : vector<8x128xf32>
    %c0_143 = arith.constant 0 : index
    %c0_144 = arith.constant 0 : index
    %288 = vector.load %arg8[%c0_143, %c0_144] : memref<8x128xf32, #tpu.memory_space<vmem>>, vector<8x128xf32>
    tpu.vector_store %arg8[%c0_143, %c0_144], %285 {strides = array<i32>} : memref<8x128xf32, #tpu.memory_space<vmem>>, vector<8x128xf32>,
    %c0_145 = arith.constant 0 : index
    %c0_146 = arith.constant 0 : index
    %289 = vector.load %arg7[%c0_145, %c0_146] : memref<8x128xf32, #tpu.memory_space<vmem>>, vector<8x128xf32>
    tpu.vector_store %arg7[%c0_145, %c0_146], %287 {strides = array<i32>} : memref<8x128xf32, #tpu.memory_space<vmem>>, vector<8x128xf32>,
    %290 = arith.index_cast %c6_i32 : i32 to index
    %c0_147 = arith.constant 0 : index
    %c0_148 = arith.constant 0 : index
    %291 = vector.load %arg10[%290, %c0_147, %c0_148] : memref<8x8x128xf32, #tpu.memory_space<vmem>>, vector<1x8x128xf32>
    %292 = vector.shape_cast %291 : vector<1x8x128xf32> to vector<8x128xf32>
    %293 = vector.shape_cast %287 : vector<8x128xf32> to vector<1x8x128xf32>
    tpu.vector_store %arg10[%290, %c0_147, %c0_148], %293 {strides = array<i32>} : memref<8x8x128xf32, #tpu.memory_space<vmem>>, vector<1x8x128xf32>,
    %c7_i32 = arith.constant 7 : i32
    %294 = arith.index_cast %c7_i32 : i32 to index
    %c0_149 = arith.constant 0 : index
    %c0_150 = arith.constant 0 : index
    %295 = vector.load %arg9[%294, %c0_149, %c0_150] : memref<8x8x512xf32, #tpu.memory_space<vmem>>, vector<1x8x512xf32>
    %296 = vector.shape_cast %295 : vector<1x8x512xf32> to vector<8x512xf32>
    %c0_151 = arith.constant 0 : index
    %c0_152 = arith.constant 0 : index
    %297 = vector.load %arg7[%c0_151, %c0_152] : memref<8x128xf32, #tpu.memory_space<vmem>>, vector<8x128xf32>
    %c0_153 = arith.constant 0 : index
    %c0_154 = arith.constant 0 : index
    %c0_155 = arith.constant 0 : index
    %298 = vector.load %arg3[%c0_153, %c0_154, %c0_155] : memref<2x128x512xf32, #tpu.memory_space<vmem>>, vector<1x128x512xf32>
    %299 = vector.shape_cast %298 : vector<1x128x512xf32> to vector<128x512xf32>
    %cst_156 = arith.constant dense<0.000000e+00> : vector<8x512xf32>
    %300 = tpu.matmul %297, %299, %cst_156 {dimension_numbers = #tpu.dot_dimension_numbers<[1], [0], [0], [1], [0, 0, 1, 1], [], []>} : vector<8x128xf32>, vector<128x512xf32>, vector<8x512xf32> -> vector<8x512xf32>
    %301 = arith.addf %296, %300 : vector<8x512xf32>
    %302 = vector.extract_strided_slice %301 {offsets = [0, 0], sizes = [8, 128], strides = [1, 1]} : vector<8x512xf32> to vector<8x128xf32>
    %303 = arith.negf %302 : vector<8x128xf32>
    %304 = math.exp %303 : vector<8x128xf32>
    %cst_157 = arith.constant 1.000000e+00 : f32
    %305 = vector.broadcast %cst_157 : f32 to vector<8x128xf32>
    %306 = arith.addf %305, %304 : vector<8x128xf32>
    %307 = arith.divf %305, %306 : vector<8x128xf32>
    %308 = vector.extract_strided_slice %301 {offsets = [0, 128], sizes = [8, 128], strides = [1, 1]} : vector<8x512xf32> to vector<8x128xf32>
    %309 = arith.negf %308 : vector<8x128xf32>
    %310 = math.exp %309 : vector<8x128xf32>
    %cst_158 = arith.constant 1.000000e+00 : f32
    %311 = vector.broadcast %cst_158 : f32 to vector<8x128xf32>
    %312 = arith.addf %311, %310 : vector<8x128xf32>
    %313 = arith.divf %311, %312 : vector<8x128xf32>
    %314 = vector.extract_strided_slice %301 {offsets = [0, 256], sizes = [8, 128], strides = [1, 1]} : vector<8x512xf32> to vector<8x128xf32>
    %315 = math.tanh %314 : vector<8x128xf32>
    %316 = vector.extract_strided_slice %301 {offsets = [0, 384], sizes = [8, 128], strides = [1, 1]} : vector<8x512xf32> to vector<8x128xf32>
    %317 = arith.negf %316 : vector<8x128xf32>
    %318 = math.exp %317 : vector<8x128xf32>
    %cst_159 = arith.constant 1.000000e+00 : f32
    %319 = vector.broadcast %cst_159 : f32 to vector<8x128xf32>
    %320 = arith.addf %319, %318 : vector<8x128xf32>
    %321 = arith.divf %319, %320 : vector<8x128xf32>
    %c0_160 = arith.constant 0 : index
    %c0_161 = arith.constant 0 : index
    %322 = vector.load %arg8[%c0_160, %c0_161] : memref<8x128xf32, #tpu.memory_space<vmem>>, vector<8x128xf32>
    %323 = arith.mulf %313, %322 : vector<8x128xf32>
    %324 = arith.mulf %307, %315 : vector<8x128xf32>
    %325 = arith.addf %323, %324 : vector<8x128xf32>
    %326 = math.tanh %325 : vector<8x128xf32>
    %327 = arith.mulf %321, %326 : vector<8x128xf32>
    %c0_162 = arith.constant 0 : index
    %c0_163 = arith.constant 0 : index
    %328 = vector.load %arg8[%c0_162, %c0_163] : memref<8x128xf32, #tpu.memory_space<vmem>>, vector<8x128xf32>
    tpu.vector_store %arg8[%c0_162, %c0_163], %325 {strides = array<i32>} : memref<8x128xf32, #tpu.memory_space<vmem>>, vector<8x128xf32>,
    %c0_164 = arith.constant 0 : index
    %c0_165 = arith.constant 0 : index
    %329 = vector.load %arg7[%c0_164, %c0_165] : memref<8x128xf32, #tpu.memory_space<vmem>>, vector<8x128xf32>
    tpu.vector_store %arg7[%c0_164, %c0_165], %327 {strides = array<i32>} : memref<8x128xf32, #tpu.memory_space<vmem>>, vector<8x128xf32>,
    %330 = arith.index_cast %c7_i32 : i32 to index
    %c0_166 = arith.constant 0 : index
    %c0_167 = arith.constant 0 : index
    %331 = vector.load %arg10[%330, %c0_166, %c0_167] : memref<8x8x128xf32, #tpu.memory_space<vmem>>, vector<1x8x128xf32>
    %332 = vector.shape_cast %331 : vector<1x8x128xf32> to vector<8x128xf32>
    %333 = vector.shape_cast %327 : vector<8x128xf32> to vector<1x8x128xf32>
    tpu.vector_store %arg10[%330, %c0_166, %c0_167], %333 {strides = array<i32>} : memref<8x8x128xf32, #tpu.memory_space<vmem>>, vector<1x8x128xf32>,
    %c8_i32 = arith.constant 8 : i32
    %c0_168 = arith.constant 0 : index
    %c0_169 = arith.constant 0 : index
    %334 = vector.load %arg7[%c0_168, %c0_169] : memref<8x128xf32, #tpu.memory_space<vmem>>, vector<8x128xf32>
    %c0_170 = arith.constant 0 : index
    %c0_171 = arith.constant 0 : index
    %c0_172 = arith.constant 0 : index
    %335 = vector.load %arg5[%c0_170, %c0_171, %c0_172] : memref<2x8x128xf32, #tpu.memory_space<vmem>>, vector<1x8x128xf32>
    %336 = vector.shape_cast %335 : vector<1x8x128xf32> to vector<8x128xf32>
    %337 = vector.shape_cast %334 : vector<8x128xf32> to vector<1x8x128xf32>
    tpu.vector_store %arg5[%c0_170, %c0_171, %c0_172], %337 {strides = array<i32>} : memref<2x8x128xf32, #tpu.memory_space<vmem>>, vector<1x8x128xf32>,
    %c0_173 = arith.constant 0 : index
    %c0_174 = arith.constant 0 : index
    %338 = vector.load %arg8[%c0_173, %c0_174] : memref<8x128xf32, #tpu.memory_space<vmem>>, vector<8x128xf32>
    %c0_175 = arith.constant 0 : index
    %c0_176 = arith.constant 0 : index
    %c0_177 = arith.constant 0 : index
    %339 = vector.load %arg6[%c0_175, %c0_176, %c0_177] : memref<2x8x128xf32, #tpu.memory_space<vmem>>, vector<1x8x128xf32>
    %340 = vector.shape_cast %339 : vector<1x8x128xf32> to vector<8x128xf32>
    %341 = vector.shape_cast %338 : vector<8x128xf32> to vector<1x8x128xf32>
    tpu.vector_store %arg6[%c0_175, %c0_176, %c0_177], %341 {strides = array<i32>} : memref<2x8x128xf32, #tpu.memory_space<vmem>>, vector<1x8x128xf32>,
    %c0_178 = arith.constant 0 : index
    %c0_179 = arith.constant 0 : index
    %c0_180 = arith.constant 0 : index
    %342 = vector.load %arg10[%c0_178, %c0_179, %c0_180] : memref<8x8x128xf32, #tpu.memory_space<vmem>>, vector<8x8x128xf32>
    %343 = vector.shape_cast %342 : vector<8x8x128xf32> to vector<64x128xf32>
    %c0_181 = arith.constant 0 : index
    %c0_182 = arith.constant 0 : index
    %c0_183 = arith.constant 0 : index
    %344 = vector.load %arg2[%c0_181, %c0_182, %c0_183] : memref<1x128x512xf32, #tpu.memory_space<vmem>>, vector<1x128x512xf32>
    %345 = vector.shape_cast %344 : vector<1x128x512xf32> to vector<128x512xf32>
    %cst_184 = arith.constant dense<0.000000e+00> : vector<64x512xf32>
    %346 = tpu.matmul %343, %345, %cst_184 {dimension_numbers = #tpu.dot_dimension_numbers<[1], [0], [0], [1], [0, 0, 1, 1], [], []>} : vector<64x128xf32>, vector<128x512xf32>, vector<64x512xf32> -> vector<64x512xf32>
    %c1 = arith.constant 1 : index
    %c0_185 = arith.constant 0 : index
    %c0_186 = arith.constant 0 : index
    %347 = vector.load %arg4[%c1, %c0_185, %c0_186] : memref<2x1x512xf32, #tpu.memory_space<vmem>>, vector<1x1x512xf32>
    %348 = vector.shape_cast %347 : vector<1x1x512xf32> to vector<1x512xf32>
    %349 = vector.broadcast %348 : vector<1x512xf32> to vector<64x512xf32>
    %350 = arith.addf %346, %349 : vector<64x512xf32>
    %351 = vector.shape_cast %350 : vector<64x512xf32> to vector<8x8x512xf32>
    %c0_187 = arith.constant 0 : index
    %c0_188 = arith.constant 0 : index
    %c0_189 = arith.constant 0 : index
    %352 = vector.load %arg9[%c0_187, %c0_188, %c0_189] : memref<8x8x512xf32, #tpu.memory_space<vmem>>, vector<8x8x512xf32>
    tpu.vector_store %arg9[%c0_187, %c0_188, %c0_189], %351 {strides = array<i32>} : memref<8x8x512xf32, #tpu.memory_space<vmem>>, vector<8x8x512xf32>,
    %cst_190 = arith.constant 0.000000e+00 : f32
    %353 = vector.broadcast %cst_190 : f32 to vector<8x128xf32>
    %c0_191 = arith.constant 0 : index
    %c0_192 = arith.constant 0 : index
    %354 = vector.load %arg7[%c0_191, %c0_192] : memref<8x128xf32, #tpu.memory_space<vmem>>, vector<8x128xf32>
    tpu.vector_store %arg7[%c0_191, %c0_192], %353 {strides = array<i32>} : memref<8x128xf32, #tpu.memory_space<vmem>>, vector<8x128xf32>,
    %cst_193 = arith.constant 0.000000e+00 : f32
    %355 = vector.broadcast %cst_193 : f32 to vector<8x128xf32>
    %c0_194 = arith.constant 0 : index
    %c0_195 = arith.constant 0 : index
    %356 = vector.load %arg8[%c0_194, %c0_195] : memref<8x128xf32, #tpu.memory_space<vmem>>, vector<8x128xf32>
    tpu.vector_store %arg8[%c0_194, %c0_195], %355 {strides = array<i32>} : memref<8x128xf32, #tpu.memory_space<vmem>>, vector<8x128xf32>,
    %c0_i32_196 = arith.constant 0 : i32
    %357 = arith.index_cast %c0_i32_196 : i32 to index
    %c0_197 = arith.constant 0 : index
    %c0_198 = arith.constant 0 : index
    %358 = vector.load %arg9[%357, %c0_197, %c0_198] : memref<8x8x512xf32, #tpu.memory_space<vmem>>, vector<1x8x512xf32>
    %359 = vector.shape_cast %358 : vector<1x8x512xf32> to vector<8x512xf32>
    %c0_199 = arith.constant 0 : index
    %c0_200 = arith.constant 0 : index
    %360 = vector.load %arg7[%c0_199, %c0_200] : memref<8x128xf32, #tpu.memory_space<vmem>>, vector<8x128xf32>
    %c1_201 = arith.constant 1 : index
    %c0_202 = arith.constant 0 : index
    %c0_203 = arith.constant 0 : index
    %361 = vector.load %arg3[%c1_201, %c0_202, %c0_203] : memref<2x128x512xf32, #tpu.memory_space<vmem>>, vector<1x128x512xf32>
    %362 = vector.shape_cast %361 : vector<1x128x512xf32> to vector<128x512xf32>
    %cst_204 = arith.constant dense<0.000000e+00> : vector<8x512xf32>
    %363 = tpu.matmul %360, %362, %cst_204 {dimension_numbers = #tpu.dot_dimension_numbers<[1], [0], [0], [1], [0, 0, 1, 1], [], []>} : vector<8x128xf32>, vector<128x512xf32>, vector<8x512xf32> -> vector<8x512xf32>
    %364 = arith.addf %359, %363 : vector<8x512xf32>
    %365 = vector.extract_strided_slice %364 {offsets = [0, 0], sizes = [8, 128], strides = [1, 1]} : vector<8x512xf32> to vector<8x128xf32>
    %366 = arith.negf %365 : vector<8x128xf32>
    %367 = math.exp %366 : vector<8x128xf32>
    %cst_205 = arith.constant 1.000000e+00 : f32
    %368 = vector.broadcast %cst_205 : f32 to vector<8x128xf32>
    %369 = arith.addf %368, %367 : vector<8x128xf32>
    %370 = arith.divf %368, %369 : vector<8x128xf32>
    %371 = vector.extract_strided_slice %364 {offsets = [0, 128], sizes = [8, 128], strides = [1, 1]} : vector<8x512xf32> to vector<8x128xf32>
    %372 = arith.negf %371 : vector<8x128xf32>
    %373 = math.exp %372 : vector<8x128xf32>
    %cst_206 = arith.constant 1.000000e+00 : f32
    %374 = vector.broadcast %cst_206 : f32 to vector<8x128xf32>
    %375 = arith.addf %374, %373 : vector<8x128xf32>
    %376 = arith.divf %374, %375 : vector<8x128xf32>
    %377 = vector.extract_strided_slice %364 {offsets = [0, 256], sizes = [8, 128], strides = [1, 1]} : vector<8x512xf32> to vector<8x128xf32>
    %378 = math.tanh %377 : vector<8x128xf32>
    %379 = vector.extract_strided_slice %364 {offsets = [0, 384], sizes = [8, 128], strides = [1, 1]} : vector<8x512xf32> to vector<8x128xf32>
    %380 = arith.negf %379 : vector<8x128xf32>
    %381 = math.exp %380 : vector<8x128xf32>
    %cst_207 = arith.constant 1.000000e+00 : f32
    %382 = vector.broadcast %cst_207 : f32 to vector<8x128xf32>
    %383 = arith.addf %382, %381 : vector<8x128xf32>
    %384 = arith.divf %382, %383 : vector<8x128xf32>
    %c0_208 = arith.constant 0 : index
    %c0_209 = arith.constant 0 : index
    %385 = vector.load %arg8[%c0_208, %c0_209] : memref<8x128xf32, #tpu.memory_space<vmem>>, vector<8x128xf32>
    %386 = arith.mulf %376, %385 : vector<8x128xf32>
    %387 = arith.mulf %370, %378 : vector<8x128xf32>
    %388 = arith.addf %386, %387 : vector<8x128xf32>
    %389 = math.tanh %388 : vector<8x128xf32>
    %390 = arith.mulf %384, %389 : vector<8x128xf32>
    %c0_210 = arith.constant 0 : index
    %c0_211 = arith.constant 0 : index
    %391 = vector.load %arg8[%c0_210, %c0_211] : memref<8x128xf32, #tpu.memory_space<vmem>>, vector<8x128xf32>
    tpu.vector_store %arg8[%c0_210, %c0_211], %388 {strides = array<i32>} : memref<8x128xf32, #tpu.memory_space<vmem>>, vector<8x128xf32>,
    %c0_212 = arith.constant 0 : index
    %c0_213 = arith.constant 0 : index
    %392 = vector.load %arg7[%c0_212, %c0_213] : memref<8x128xf32, #tpu.memory_space<vmem>>, vector<8x128xf32>
    tpu.vector_store %arg7[%c0_212, %c0_213], %390 {strides = array<i32>} : memref<8x128xf32, #tpu.memory_space<vmem>>, vector<8x128xf32>,
    %c1_i32_214 = arith.constant 1 : i32
    %393 = arith.index_cast %c1_i32_214 : i32 to index
    %c0_215 = arith.constant 0 : index
    %c0_216 = arith.constant 0 : index
    %394 = vector.load %arg9[%393, %c0_215, %c0_216] : memref<8x8x512xf32, #tpu.memory_space<vmem>>, vector<1x8x512xf32>
    %395 = vector.shape_cast %394 : vector<1x8x512xf32> to vector<8x512xf32>
    %c0_217 = arith.constant 0 : index
    %c0_218 = arith.constant 0 : index
    %396 = vector.load %arg7[%c0_217, %c0_218] : memref<8x128xf32, #tpu.memory_space<vmem>>, vector<8x128xf32>
    %c1_219 = arith.constant 1 : index
    %c0_220 = arith.constant 0 : index
    %c0_221 = arith.constant 0 : index
    %397 = vector.load %arg3[%c1_219, %c0_220, %c0_221] : memref<2x128x512xf32, #tpu.memory_space<vmem>>, vector<1x128x512xf32>
    %398 = vector.shape_cast %397 : vector<1x128x512xf32> to vector<128x512xf32>
    %cst_222 = arith.constant dense<0.000000e+00> : vector<8x512xf32>
    %399 = tpu.matmul %396, %398, %cst_222 {dimension_numbers = #tpu.dot_dimension_numbers<[1], [0], [0], [1], [0, 0, 1, 1], [], []>} : vector<8x128xf32>, vector<128x512xf32>, vector<8x512xf32> -> vector<8x512xf32>
    %400 = arith.addf %395, %399 : vector<8x512xf32>
    %401 = vector.extract_strided_slice %400 {offsets = [0, 0], sizes = [8, 128], strides = [1, 1]} : vector<8x512xf32> to vector<8x128xf32>
    %402 = arith.negf %401 : vector<8x128xf32>
    %403 = math.exp %402 : vector<8x128xf32>
    %cst_223 = arith.constant 1.000000e+00 : f32
    %404 = vector.broadcast %cst_223 : f32 to vector<8x128xf32>
    %405 = arith.addf %404, %403 : vector<8x128xf32>
    %406 = arith.divf %404, %405 : vector<8x128xf32>
    %407 = vector.extract_strided_slice %400 {offsets = [0, 128], sizes = [8, 128], strides = [1, 1]} : vector<8x512xf32> to vector<8x128xf32>
    %408 = arith.negf %407 : vector<8x128xf32>
    %409 = math.exp %408 : vector<8x128xf32>
    %cst_224 = arith.constant 1.000000e+00 : f32
    %410 = vector.broadcast %cst_224 : f32 to vector<8x128xf32>
    %411 = arith.addf %410, %409 : vector<8x128xf32>
    %412 = arith.divf %410, %411 : vector<8x128xf32>
    %413 = vector.extract_strided_slice %400 {offsets = [0, 256], sizes = [8, 128], strides = [1, 1]} : vector<8x512xf32> to vector<8x128xf32>
    %414 = math.tanh %413 : vector<8x128xf32>
    %415 = vector.extract_strided_slice %400 {offsets = [0, 384], sizes = [8, 128], strides = [1, 1]} : vector<8x512xf32> to vector<8x128xf32>
    %416 = arith.negf %415 : vector<8x128xf32>
    %417 = math.exp %416 : vector<8x128xf32>
    %cst_225 = arith.constant 1.000000e+00 : f32
    %418 = vector.broadcast %cst_225 : f32 to vector<8x128xf32>
    %419 = arith.addf %418, %417 : vector<8x128xf32>
    %420 = arith.divf %418, %419 : vector<8x128xf32>
    %c0_226 = arith.constant 0 : index
    %c0_227 = arith.constant 0 : index
    %421 = vector.load %arg8[%c0_226, %c0_227] : memref<8x128xf32, #tpu.memory_space<vmem>>, vector<8x128xf32>
    %422 = arith.mulf %412, %421 : vector<8x128xf32>
    %423 = arith.mulf %406, %414 : vector<8x128xf32>
    %424 = arith.addf %422, %423 : vector<8x128xf32>
    %425 = math.tanh %424 : vector<8x128xf32>
    %426 = arith.mulf %420, %425 : vector<8x128xf32>
    %c0_228 = arith.constant 0 : index
    %c0_229 = arith.constant 0 : index
    %427 = vector.load %arg8[%c0_228, %c0_229] : memref<8x128xf32, #tpu.memory_space<vmem>>, vector<8x128xf32>
    tpu.vector_store %arg8[%c0_228, %c0_229], %424 {strides = array<i32>} : memref<8x128xf32, #tpu.memory_space<vmem>>, vector<8x128xf32>,
    %c0_230 = arith.constant 0 : index
    %c0_231 = arith.constant 0 : index
    %428 = vector.load %arg7[%c0_230, %c0_231] : memref<8x128xf32, #tpu.memory_space<vmem>>, vector<8x128xf32>
    tpu.vector_store %arg7[%c0_230, %c0_231], %426 {strides = array<i32>} : memref<8x128xf32, #tpu.memory_space<vmem>>, vector<8x128xf32>,
    %c2_i32_232 = arith.constant 2 : i32
    %429 = arith.index_cast %c2_i32_232 : i32 to index
    %c0_233 = arith.constant 0 : index
    %c0_234 = arith.constant 0 : index
    %430 = vector.load %arg9[%429, %c0_233, %c0_234] : memref<8x8x512xf32, #tpu.memory_space<vmem>>, vector<1x8x512xf32>
    %431 = vector.shape_cast %430 : vector<1x8x512xf32> to vector<8x512xf32>
    %c0_235 = arith.constant 0 : index
    %c0_236 = arith.constant 0 : index
    %432 = vector.load %arg7[%c0_235, %c0_236] : memref<8x128xf32, #tpu.memory_space<vmem>>, vector<8x128xf32>
    %c1_237 = arith.constant 1 : index
    %c0_238 = arith.constant 0 : index
    %c0_239 = arith.constant 0 : index
    %433 = vector.load %arg3[%c1_237, %c0_238, %c0_239] : memref<2x128x512xf32, #tpu.memory_space<vmem>>, vector<1x128x512xf32>
    %434 = vector.shape_cast %433 : vector<1x128x512xf32> to vector<128x512xf32>
    %cst_240 = arith.constant dense<0.000000e+00> : vector<8x512xf32>
    %435 = tpu.matmul %432, %434, %cst_240 {dimension_numbers = #tpu.dot_dimension_numbers<[1], [0], [0], [1], [0, 0, 1, 1], [], []>} : vector<8x128xf32>, vector<128x512xf32>, vector<8x512xf32> -> vector<8x512xf32>
    %436 = arith.addf %431, %435 : vector<8x512xf32>
    %437 = vector.extract_strided_slice %436 {offsets = [0, 0], sizes = [8, 128], strides = [1, 1]} : vector<8x512xf32> to vector<8x128xf32>
    %438 = arith.negf %437 : vector<8x128xf32>
    %439 = math.exp %438 : vector<8x128xf32>
    %cst_241 = arith.constant 1.000000e+00 : f32
    %440 = vector.broadcast %cst_241 : f32 to vector<8x128xf32>
    %441 = arith.addf %440, %439 : vector<8x128xf32>
    %442 = arith.divf %440, %441 : vector<8x128xf32>
    %443 = vector.extract_strided_slice %436 {offsets = [0, 128], sizes = [8, 128], strides = [1, 1]} : vector<8x512xf32> to vector<8x128xf32>
    %444 = arith.negf %443 : vector<8x128xf32>
    %445 = math.exp %444 : vector<8x128xf32>
    %cst_242 = arith.constant 1.000000e+00 : f32
    %446 = vector.broadcast %cst_242 : f32 to vector<8x128xf32>
    %447 = arith.addf %446, %445 : vector<8x128xf32>
    %448 = arith.divf %446, %447 : vector<8x128xf32>
    %449 = vector.extract_strided_slice %436 {offsets = [0, 256], sizes = [8, 128], strides = [1, 1]} : vector<8x512xf32> to vector<8x128xf32>
    %450 = math.tanh %449 : vector<8x128xf32>
    %451 = vector.extract_strided_slice %436 {offsets = [0, 384], sizes = [8, 128], strides = [1, 1]} : vector<8x512xf32> to vector<8x128xf32>
    %452 = arith.negf %451 : vector<8x128xf32>
    %453 = math.exp %452 : vector<8x128xf32>
    %cst_243 = arith.constant 1.000000e+00 : f32
    %454 = vector.broadcast %cst_243 : f32 to vector<8x128xf32>
    %455 = arith.addf %454, %453 : vector<8x128xf32>
    %456 = arith.divf %454, %455 : vector<8x128xf32>
    %c0_244 = arith.constant 0 : index
    %c0_245 = arith.constant 0 : index
    %457 = vector.load %arg8[%c0_244, %c0_245] : memref<8x128xf32, #tpu.memory_space<vmem>>, vector<8x128xf32>
    %458 = arith.mulf %448, %457 : vector<8x128xf32>
    %459 = arith.mulf %442, %450 : vector<8x128xf32>
    %460 = arith.addf %458, %459 : vector<8x128xf32>
    %461 = math.tanh %460 : vector<8x128xf32>
    %462 = arith.mulf %456, %461 : vector<8x128xf32>
    %c0_246 = arith.constant 0 : index
    %c0_247 = arith.constant 0 : index
    %463 = vector.load %arg8[%c0_246, %c0_247] : memref<8x128xf32, #tpu.memory_space<vmem>>, vector<8x128xf32>
    tpu.vector_store %arg8[%c0_246, %c0_247], %460 {strides = array<i32>} : memref<8x128xf32, #tpu.memory_space<vmem>>, vector<8x128xf32>,
    %c0_248 = arith.constant 0 : index
    %c0_249 = arith.constant 0 : index
    %464 = vector.load %arg7[%c0_248, %c0_249] : memref<8x128xf32, #tpu.memory_space<vmem>>, vector<8x128xf32>
    tpu.vector_store %arg7[%c0_248, %c0_249], %462 {strides = array<i32>} : memref<8x128xf32, #tpu.memory_space<vmem>>, vector<8x128xf32>,
    %c3_i32_250 = arith.constant 3 : i32
    %465 = arith.index_cast %c3_i32_250 : i32 to index
    %c0_251 = arith.constant 0 : index
    %c0_252 = arith.constant 0 : index
    %466 = vector.load %arg9[%465, %c0_251, %c0_252] : memref<8x8x512xf32, #tpu.memory_space<vmem>>, vector<1x8x512xf32>
    %467 = vector.shape_cast %466 : vector<1x8x512xf32> to vector<8x512xf32>
    %c0_253 = arith.constant 0 : index
    %c0_254 = arith.constant 0 : index
    %468 = vector.load %arg7[%c0_253, %c0_254] : memref<8x128xf32, #tpu.memory_space<vmem>>, vector<8x128xf32>
    %c1_255 = arith.constant 1 : index
    %c0_256 = arith.constant 0 : index
    %c0_257 = arith.constant 0 : index
    %469 = vector.load %arg3[%c1_255, %c0_256, %c0_257] : memref<2x128x512xf32, #tpu.memory_space<vmem>>, vector<1x128x512xf32>
    %470 = vector.shape_cast %469 : vector<1x128x512xf32> to vector<128x512xf32>
    %cst_258 = arith.constant dense<0.000000e+00> : vector<8x512xf32>
    %471 = tpu.matmul %468, %470, %cst_258 {dimension_numbers = #tpu.dot_dimension_numbers<[1], [0], [0], [1], [0, 0, 1, 1], [], []>} : vector<8x128xf32>, vector<128x512xf32>, vector<8x512xf32> -> vector<8x512xf32>
    %472 = arith.addf %467, %471 : vector<8x512xf32>
    %473 = vector.extract_strided_slice %472 {offsets = [0, 0], sizes = [8, 128], strides = [1, 1]} : vector<8x512xf32> to vector<8x128xf32>
    %474 = arith.negf %473 : vector<8x128xf32>
    %475 = math.exp %474 : vector<8x128xf32>
    %cst_259 = arith.constant 1.000000e+00 : f32
    %476 = vector.broadcast %cst_259 : f32 to vector<8x128xf32>
    %477 = arith.addf %476, %475 : vector<8x128xf32>
    %478 = arith.divf %476, %477 : vector<8x128xf32>
    %479 = vector.extract_strided_slice %472 {offsets = [0, 128], sizes = [8, 128], strides = [1, 1]} : vector<8x512xf32> to vector<8x128xf32>
    %480 = arith.negf %479 : vector<8x128xf32>
    %481 = math.exp %480 : vector<8x128xf32>
    %cst_260 = arith.constant 1.000000e+00 : f32
    %482 = vector.broadcast %cst_260 : f32 to vector<8x128xf32>
    %483 = arith.addf %482, %481 : vector<8x128xf32>
    %484 = arith.divf %482, %483 : vector<8x128xf32>
    %485 = vector.extract_strided_slice %472 {offsets = [0, 256], sizes = [8, 128], strides = [1, 1]} : vector<8x512xf32> to vector<8x128xf32>
    %486 = math.tanh %485 : vector<8x128xf32>
    %487 = vector.extract_strided_slice %472 {offsets = [0, 384], sizes = [8, 128], strides = [1, 1]} : vector<8x512xf32> to vector<8x128xf32>
    %488 = arith.negf %487 : vector<8x128xf32>
    %489 = math.exp %488 : vector<8x128xf32>
    %cst_261 = arith.constant 1.000000e+00 : f32
    %490 = vector.broadcast %cst_261 : f32 to vector<8x128xf32>
    %491 = arith.addf %490, %489 : vector<8x128xf32>
    %492 = arith.divf %490, %491 : vector<8x128xf32>
    %c0_262 = arith.constant 0 : index
    %c0_263 = arith.constant 0 : index
    %493 = vector.load %arg8[%c0_262, %c0_263] : memref<8x128xf32, #tpu.memory_space<vmem>>, vector<8x128xf32>
    %494 = arith.mulf %484, %493 : vector<8x128xf32>
    %495 = arith.mulf %478, %486 : vector<8x128xf32>
    %496 = arith.addf %494, %495 : vector<8x128xf32>
    %497 = math.tanh %496 : vector<8x128xf32>
    %498 = arith.mulf %492, %497 : vector<8x128xf32>
    %c0_264 = arith.constant 0 : index
    %c0_265 = arith.constant 0 : index
    %499 = vector.load %arg8[%c0_264, %c0_265] : memref<8x128xf32, #tpu.memory_space<vmem>>, vector<8x128xf32>
    tpu.vector_store %arg8[%c0_264, %c0_265], %496 {strides = array<i32>} : memref<8x128xf32, #tpu.memory_space<vmem>>, vector<8x128xf32>,
    %c0_266 = arith.constant 0 : index
    %c0_267 = arith.constant 0 : index
    %500 = vector.load %arg7[%c0_266, %c0_267] : memref<8x128xf32, #tpu.memory_space<vmem>>, vector<8x128xf32>
    tpu.vector_store %arg7[%c0_266, %c0_267], %498 {strides = array<i32>} : memref<8x128xf32, #tpu.memory_space<vmem>>, vector<8x128xf32>,
    %c4_i32_268 = arith.constant 4 : i32
    %501 = arith.index_cast %c4_i32_268 : i32 to index
    %c0_269 = arith.constant 0 : index
    %c0_270 = arith.constant 0 : index
    %502 = vector.load %arg9[%501, %c0_269, %c0_270] : memref<8x8x512xf32, #tpu.memory_space<vmem>>, vector<1x8x512xf32>
    %503 = vector.shape_cast %502 : vector<1x8x512xf32> to vector<8x512xf32>
    %c0_271 = arith.constant 0 : index
    %c0_272 = arith.constant 0 : index
    %504 = vector.load %arg7[%c0_271, %c0_272] : memref<8x128xf32, #tpu.memory_space<vmem>>, vector<8x128xf32>
    %c1_273 = arith.constant 1 : index
    %c0_274 = arith.constant 0 : index
    %c0_275 = arith.constant 0 : index
    %505 = vector.load %arg3[%c1_273, %c0_274, %c0_275] : memref<2x128x512xf32, #tpu.memory_space<vmem>>, vector<1x128x512xf32>
    %506 = vector.shape_cast %505 : vector<1x128x512xf32> to vector<128x512xf32>
    %cst_276 = arith.constant dense<0.000000e+00> : vector<8x512xf32>
    %507 = tpu.matmul %504, %506, %cst_276 {dimension_numbers = #tpu.dot_dimension_numbers<[1], [0], [0], [1], [0, 0, 1, 1], [], []>} : vector<8x128xf32>, vector<128x512xf32>, vector<8x512xf32> -> vector<8x512xf32>
    %508 = arith.addf %503, %507 : vector<8x512xf32>
    %509 = vector.extract_strided_slice %508 {offsets = [0, 0], sizes = [8, 128], strides = [1, 1]} : vector<8x512xf32> to vector<8x128xf32>
    %510 = arith.negf %509 : vector<8x128xf32>
    %511 = math.exp %510 : vector<8x128xf32>
    %cst_277 = arith.constant 1.000000e+00 : f32
    %512 = vector.broadcast %cst_277 : f32 to vector<8x128xf32>
    %513 = arith.addf %512, %511 : vector<8x128xf32>
    %514 = arith.divf %512, %513 : vector<8x128xf32>
    %515 = vector.extract_strided_slice %508 {offsets = [0, 128], sizes = [8, 128], strides = [1, 1]} : vector<8x512xf32> to vector<8x128xf32>
    %516 = arith.negf %515 : vector<8x128xf32>
    %517 = math.exp %516 : vector<8x128xf32>
    %cst_278 = arith.constant 1.000000e+00 : f32
    %518 = vector.broadcast %cst_278 : f32 to vector<8x128xf32>
    %519 = arith.addf %518, %517 : vector<8x128xf32>
    %520 = arith.divf %518, %519 : vector<8x128xf32>
    %521 = vector.extract_strided_slice %508 {offsets = [0, 256], sizes = [8, 128], strides = [1, 1]} : vector<8x512xf32> to vector<8x128xf32>
    %522 = math.tanh %521 : vector<8x128xf32>
    %523 = vector.extract_strided_slice %508 {offsets = [0, 384], sizes = [8, 128], strides = [1, 1]} : vector<8x512xf32> to vector<8x128xf32>
    %524 = arith.negf %523 : vector<8x128xf32>
    %525 = math.exp %524 : vector<8x128xf32>
    %cst_279 = arith.constant 1.000000e+00 : f32
    %526 = vector.broadcast %cst_279 : f32 to vector<8x128xf32>
    %527 = arith.addf %526, %525 : vector<8x128xf32>
    %528 = arith.divf %526, %527 : vector<8x128xf32>
    %c0_280 = arith.constant 0 : index
    %c0_281 = arith.constant 0 : index
    %529 = vector.load %arg8[%c0_280, %c0_281] : memref<8x128xf32, #tpu.memory_space<vmem>>, vector<8x128xf32>
    %530 = arith.mulf %520, %529 : vector<8x128xf32>
    %531 = arith.mulf %514, %522 : vector<8x128xf32>
    %532 = arith.addf %530, %531 : vector<8x128xf32>
    %533 = math.tanh %532 : vector<8x128xf32>
    %534 = arith.mulf %528, %533 : vector<8x128xf32>
    %c0_282 = arith.constant 0 : index
    %c0_283 = arith.constant 0 : index
    %535 = vector.load %arg8[%c0_282, %c0_283] : memref<8x128xf32, #tpu.memory_space<vmem>>, vector<8x128xf32>
    tpu.vector_store %arg8[%c0_282, %c0_283], %532 {strides = array<i32>} : memref<8x128xf32, #tpu.memory_space<vmem>>, vector<8x128xf32>,
    %c0_284 = arith.constant 0 : index
    %c0_285 = arith.constant 0 : index
    %536 = vector.load %arg7[%c0_284, %c0_285] : memref<8x128xf32, #tpu.memory_space<vmem>>, vector<8x128xf32>
    tpu.vector_store %arg7[%c0_284, %c0_285], %534 {strides = array<i32>} : memref<8x128xf32, #tpu.memory_space<vmem>>, vector<8x128xf32>,
    %c5_i32_286 = arith.constant 5 : i32
    %537 = arith.index_cast %c5_i32_286 : i32 to index
    %c0_287 = arith.constant 0 : index
    %c0_288 = arith.constant 0 : index
    %538 = vector.load %arg9[%537, %c0_287, %c0_288] : memref<8x8x512xf32, #tpu.memory_space<vmem>>, vector<1x8x512xf32>
    %539 = vector.shape_cast %538 : vector<1x8x512xf32> to vector<8x512xf32>
    %c0_289 = arith.constant 0 : index
    %c0_290 = arith.constant 0 : index
    %540 = vector.load %arg7[%c0_289, %c0_290] : memref<8x128xf32, #tpu.memory_space<vmem>>, vector<8x128xf32>
    %c1_291 = arith.constant 1 : index
    %c0_292 = arith.constant 0 : index
    %c0_293 = arith.constant 0 : index
    %541 = vector.load %arg3[%c1_291, %c0_292, %c0_293] : memref<2x128x512xf32, #tpu.memory_space<vmem>>, vector<1x128x512xf32>
    %542 = vector.shape_cast %541 : vector<1x128x512xf32> to vector<128x512xf32>
    %cst_294 = arith.constant dense<0.000000e+00> : vector<8x512xf32>
    %543 = tpu.matmul %540, %542, %cst_294 {dimension_numbers = #tpu.dot_dimension_numbers<[1], [0], [0], [1], [0, 0, 1, 1], [], []>} : vector<8x128xf32>, vector<128x512xf32>, vector<8x512xf32> -> vector<8x512xf32>
    %544 = arith.addf %539, %543 : vector<8x512xf32>
    %545 = vector.extract_strided_slice %544 {offsets = [0, 0], sizes = [8, 128], strides = [1, 1]} : vector<8x512xf32> to vector<8x128xf32>
    %546 = arith.negf %545 : vector<8x128xf32>
    %547 = math.exp %546 : vector<8x128xf32>
    %cst_295 = arith.constant 1.000000e+00 : f32
    %548 = vector.broadcast %cst_295 : f32 to vector<8x128xf32>
    %549 = arith.addf %548, %547 : vector<8x128xf32>
    %550 = arith.divf %548, %549 : vector<8x128xf32>
    %551 = vector.extract_strided_slice %544 {offsets = [0, 128], sizes = [8, 128], strides = [1, 1]} : vector<8x512xf32> to vector<8x128xf32>
    %552 = arith.negf %551 : vector<8x128xf32>
    %553 = math.exp %552 : vector<8x128xf32>
    %cst_296 = arith.constant 1.000000e+00 : f32
    %554 = vector.broadcast %cst_296 : f32 to vector<8x128xf32>
    %555 = arith.addf %554, %553 : vector<8x128xf32>
    %556 = arith.divf %554, %555 : vector<8x128xf32>
    %557 = vector.extract_strided_slice %544 {offsets = [0, 256], sizes = [8, 128], strides = [1, 1]} : vector<8x512xf32> to vector<8x128xf32>
    %558 = math.tanh %557 : vector<8x128xf32>
    %559 = vector.extract_strided_slice %544 {offsets = [0, 384], sizes = [8, 128], strides = [1, 1]} : vector<8x512xf32> to vector<8x128xf32>
    %560 = arith.negf %559 : vector<8x128xf32>
    %561 = math.exp %560 : vector<8x128xf32>
    %cst_297 = arith.constant 1.000000e+00 : f32
    %562 = vector.broadcast %cst_297 : f32 to vector<8x128xf32>
    %563 = arith.addf %562, %561 : vector<8x128xf32>
    %564 = arith.divf %562, %563 : vector<8x128xf32>
    %c0_298 = arith.constant 0 : index
    %c0_299 = arith.constant 0 : index
    %565 = vector.load %arg8[%c0_298, %c0_299] : memref<8x128xf32, #tpu.memory_space<vmem>>, vector<8x128xf32>
    %566 = arith.mulf %556, %565 : vector<8x128xf32>
    %567 = arith.mulf %550, %558 : vector<8x128xf32>
    %568 = arith.addf %566, %567 : vector<8x128xf32>
    %569 = math.tanh %568 : vector<8x128xf32>
    %570 = arith.mulf %564, %569 : vector<8x128xf32>
    %c0_300 = arith.constant 0 : index
    %c0_301 = arith.constant 0 : index
    %571 = vector.load %arg8[%c0_300, %c0_301] : memref<8x128xf32, #tpu.memory_space<vmem>>, vector<8x128xf32>
    tpu.vector_store %arg8[%c0_300, %c0_301], %568 {strides = array<i32>} : memref<8x128xf32, #tpu.memory_space<vmem>>, vector<8x128xf32>,
    %c0_302 = arith.constant 0 : index
    %c0_303 = arith.constant 0 : index
    %572 = vector.load %arg7[%c0_302, %c0_303] : memref<8x128xf32, #tpu.memory_space<vmem>>, vector<8x128xf32>
    tpu.vector_store %arg7[%c0_302, %c0_303], %570 {strides = array<i32>} : memref<8x128xf32, #tpu.memory_space<vmem>>, vector<8x128xf32>,
    %c6_i32_304 = arith.constant 6 : i32
    %573 = arith.index_cast %c6_i32_304 : i32 to index
    %c0_305 = arith.constant 0 : index
    %c0_306 = arith.constant 0 : index
    %574 = vector.load %arg9[%573, %c0_305, %c0_306] : memref<8x8x512xf32, #tpu.memory_space<vmem>>, vector<1x8x512xf32>
    %575 = vector.shape_cast %574 : vector<1x8x512xf32> to vector<8x512xf32>
    %c0_307 = arith.constant 0 : index
    %c0_308 = arith.constant 0 : index
    %576 = vector.load %arg7[%c0_307, %c0_308] : memref<8x128xf32, #tpu.memory_space<vmem>>, vector<8x128xf32>
    %c1_309 = arith.constant 1 : index
    %c0_310 = arith.constant 0 : index
    %c0_311 = arith.constant 0 : index
    %577 = vector.load %arg3[%c1_309, %c0_310, %c0_311] : memref<2x128x512xf32, #tpu.memory_space<vmem>>, vector<1x128x512xf32>
    %578 = vector.shape_cast %577 : vector<1x128x512xf32> to vector<128x512xf32>
    %cst_312 = arith.constant dense<0.000000e+00> : vector<8x512xf32>
    %579 = tpu.matmul %576, %578, %cst_312 {dimension_numbers = #tpu.dot_dimension_numbers<[1], [0], [0], [1], [0, 0, 1, 1], [], []>} : vector<8x128xf32>, vector<128x512xf32>, vector<8x512xf32> -> vector<8x512xf32>
    %580 = arith.addf %575, %579 : vector<8x512xf32>
    %581 = vector.extract_strided_slice %580 {offsets = [0, 0], sizes = [8, 128], strides = [1, 1]} : vector<8x512xf32> to vector<8x128xf32>
    %582 = arith.negf %581 : vector<8x128xf32>
    %583 = math.exp %582 : vector<8x128xf32>
    %cst_313 = arith.constant 1.000000e+00 : f32
    %584 = vector.broadcast %cst_313 : f32 to vector<8x128xf32>
    %585 = arith.addf %584, %583 : vector<8x128xf32>
    %586 = arith.divf %584, %585 : vector<8x128xf32>
    %587 = vector.extract_strided_slice %580 {offsets = [0, 128], sizes = [8, 128], strides = [1, 1]} : vector<8x512xf32> to vector<8x128xf32>
    %588 = arith.negf %587 : vector<8x128xf32>
    %589 = math.exp %588 : vector<8x128xf32>
    %cst_314 = arith.constant 1.000000e+00 : f32
    %590 = vector.broadcast %cst_314 : f32 to vector<8x128xf32>
    %591 = arith.addf %590, %589 : vector<8x128xf32>
    %592 = arith.divf %590, %591 : vector<8x128xf32>
    %593 = vector.extract_strided_slice %580 {offsets = [0, 256], sizes = [8, 128], strides = [1, 1]} : vector<8x512xf32> to vector<8x128xf32>
    %594 = math.tanh %593 : vector<8x128xf32>
    %595 = vector.extract_strided_slice %580 {offsets = [0, 384], sizes = [8, 128], strides = [1, 1]} : vector<8x512xf32> to vector<8x128xf32>
    %596 = arith.negf %595 : vector<8x128xf32>
    %597 = math.exp %596 : vector<8x128xf32>
    %cst_315 = arith.constant 1.000000e+00 : f32
    %598 = vector.broadcast %cst_315 : f32 to vector<8x128xf32>
    %599 = arith.addf %598, %597 : vector<8x128xf32>
    %600 = arith.divf %598, %599 : vector<8x128xf32>
    %c0_316 = arith.constant 0 : index
    %c0_317 = arith.constant 0 : index
    %601 = vector.load %arg8[%c0_316, %c0_317] : memref<8x128xf32, #tpu.memory_space<vmem>>, vector<8x128xf32>
    %602 = arith.mulf %592, %601 : vector<8x128xf32>
    %603 = arith.mulf %586, %594 : vector<8x128xf32>
    %604 = arith.addf %602, %603 : vector<8x128xf32>
    %605 = math.tanh %604 : vector<8x128xf32>
    %606 = arith.mulf %600, %605 : vector<8x128xf32>
    %c0_318 = arith.constant 0 : index
    %c0_319 = arith.constant 0 : index
    %607 = vector.load %arg8[%c0_318, %c0_319] : memref<8x128xf32, #tpu.memory_space<vmem>>, vector<8x128xf32>
    tpu.vector_store %arg8[%c0_318, %c0_319], %604 {strides = array<i32>} : memref<8x128xf32, #tpu.memory_space<vmem>>, vector<8x128xf32>,
    %c0_320 = arith.constant 0 : index
    %c0_321 = arith.constant 0 : index
    %608 = vector.load %arg7[%c0_320, %c0_321] : memref<8x128xf32, #tpu.memory_space<vmem>>, vector<8x128xf32>
    tpu.vector_store %arg7[%c0_320, %c0_321], %606 {strides = array<i32>} : memref<8x128xf32, #tpu.memory_space<vmem>>, vector<8x128xf32>,
    %c7_i32_322 = arith.constant 7 : i32
    %609 = arith.index_cast %c7_i32_322 : i32 to index
    %c0_323 = arith.constant 0 : index
    %c0_324 = arith.constant 0 : index
    %610 = vector.load %arg9[%609, %c0_323, %c0_324] : memref<8x8x512xf32, #tpu.memory_space<vmem>>, vector<1x8x512xf32>
    %611 = vector.shape_cast %610 : vector<1x8x512xf32> to vector<8x512xf32>
    %c0_325 = arith.constant 0 : index
    %c0_326 = arith.constant 0 : index
    %612 = vector.load %arg7[%c0_325, %c0_326] : memref<8x128xf32, #tpu.memory_space<vmem>>, vector<8x128xf32>
    %c1_327 = arith.constant 1 : index
    %c0_328 = arith.constant 0 : index
    %c0_329 = arith.constant 0 : index
    %613 = vector.load %arg3[%c1_327, %c0_328, %c0_329] : memref<2x128x512xf32, #tpu.memory_space<vmem>>, vector<1x128x512xf32>
    %614 = vector.shape_cast %613 : vector<1x128x512xf32> to vector<128x512xf32>
    %cst_330 = arith.constant dense<0.000000e+00> : vector<8x512xf32>
    %615 = tpu.matmul %612, %614, %cst_330 {dimension_numbers = #tpu.dot_dimension_numbers<[1], [0], [0], [1], [0, 0, 1, 1], [], []>} : vector<8x128xf32>, vector<128x512xf32>, vector<8x512xf32> -> vector<8x512xf32>
    %616 = arith.addf %611, %615 : vector<8x512xf32>
    %617 = vector.extract_strided_slice %616 {offsets = [0, 0], sizes = [8, 128], strides = [1, 1]} : vector<8x512xf32> to vector<8x128xf32>
    %618 = arith.negf %617 : vector<8x128xf32>
    %619 = math.exp %618 : vector<8x128xf32>
    %cst_331 = arith.constant 1.000000e+00 : f32
    %620 = vector.broadcast %cst_331 : f32 to vector<8x128xf32>
    %621 = arith.addf %620, %619 : vector<8x128xf32>
    %622 = arith.divf %620, %621 : vector<8x128xf32>
    %623 = vector.extract_strided_slice %616 {offsets = [0, 128], sizes = [8, 128], strides = [1, 1]} : vector<8x512xf32> to vector<8x128xf32>
    %624 = arith.negf %623 : vector<8x128xf32>
    %625 = math.exp %624 : vector<8x128xf32>
    %cst_332 = arith.constant 1.000000e+00 : f32
    %626 = vector.broadcast %cst_332 : f32 to vector<8x128xf32>
    %627 = arith.addf %626, %625 : vector<8x128xf32>
    %628 = arith.divf %626, %627 : vector<8x128xf32>
    %629 = vector.extract_strided_slice %616 {offsets = [0, 256], sizes = [8, 128], strides = [1, 1]} : vector<8x512xf32> to vector<8x128xf32>
    %630 = math.tanh %629 : vector<8x128xf32>
    %631 = vector.extract_strided_slice %616 {offsets = [0, 384], sizes = [8, 128], strides = [1, 1]} : vector<8x512xf32> to vector<8x128xf32>
    %632 = arith.negf %631 : vector<8x128xf32>
    %633 = math.exp %632 : vector<8x128xf32>
    %cst_333 = arith.constant 1.000000e+00 : f32
    %634 = vector.broadcast %cst_333 : f32 to vector<8x128xf32>
    %635 = arith.addf %634, %633 : vector<8x128xf32>
    %636 = arith.divf %634, %635 : vector<8x128xf32>
    %c0_334 = arith.constant 0 : index
    %c0_335 = arith.constant 0 : index
    %637 = vector.load %arg8[%c0_334, %c0_335] : memref<8x128xf32, #tpu.memory_space<vmem>>, vector<8x128xf32>
    %638 = arith.mulf %628, %637 : vector<8x128xf32>
    %639 = arith.mulf %622, %630 : vector<8x128xf32>
    %640 = arith.addf %638, %639 : vector<8x128xf32>
    %641 = math.tanh %640 : vector<8x128xf32>
    %642 = arith.mulf %636, %641 : vector<8x128xf32>
    %c0_336 = arith.constant 0 : index
    %c0_337 = arith.constant 0 : index
    %643 = vector.load %arg8[%c0_336, %c0_337] : memref<8x128xf32, #tpu.memory_space<vmem>>, vector<8x128xf32>
    tpu.vector_store %arg8[%c0_336, %c0_337], %640 {strides = array<i32>} : memref<8x128xf32, #tpu.memory_space<vmem>>, vector<8x128xf32>,
    %c0_338 = arith.constant 0 : index
    %c0_339 = arith.constant 0 : index
    %644 = vector.load %arg7[%c0_338, %c0_339] : memref<8x128xf32, #tpu.memory_space<vmem>>, vector<8x128xf32>
    tpu.vector_store %arg7[%c0_338, %c0_339], %642 {strides = array<i32>} : memref<8x128xf32, #tpu.memory_space<vmem>>, vector<8x128xf32>,
    %c8_i32_340 = arith.constant 8 : i32
    %c0_341 = arith.constant 0 : index
    %c0_342 = arith.constant 0 : index
    %645 = vector.load %arg7[%c0_341, %c0_342] : memref<8x128xf32, #tpu.memory_space<vmem>>, vector<8x128xf32>
    %c1_343 = arith.constant 1 : index
    %c0_344 = arith.constant 0 : index
    %c0_345 = arith.constant 0 : index
    %646 = vector.load %arg5[%c1_343, %c0_344, %c0_345] : memref<2x8x128xf32, #tpu.memory_space<vmem>>, vector<1x8x128xf32>
    %647 = vector.shape_cast %646 : vector<1x8x128xf32> to vector<8x128xf32>
    %648 = vector.shape_cast %645 : vector<8x128xf32> to vector<1x8x128xf32>
    tpu.vector_store %arg5[%c1_343, %c0_344, %c0_345], %648 {strides = array<i32>} : memref<2x8x128xf32, #tpu.memory_space<vmem>>, vector<1x8x128xf32>,
    %c0_346 = arith.constant 0 : index
    %c0_347 = arith.constant 0 : index
    %649 = vector.load %arg8[%c0_346, %c0_347] : memref<8x128xf32, #tpu.memory_space<vmem>>, vector<8x128xf32>
    %c1_348 = arith.constant 1 : index
    %c0_349 = arith.constant 0 : index
    %c0_350 = arith.constant 0 : index
    %650 = vector.load %arg6[%c1_348, %c0_349, %c0_350] : memref<2x8x128xf32, #tpu.memory_space<vmem>>, vector<1x8x128xf32>
    %651 = vector.shape_cast %650 : vector<1x8x128xf32> to vector<8x128xf32>
    %652 = vector.shape_cast %649 : vector<8x128xf32> to vector<1x8x128xf32>
    tpu.vector_store %arg6[%c1_348, %c0_349, %c0_350], %652 {strides = array<i32>} : memref<2x8x128xf32, #tpu.memory_space<vmem>>, vector<1x8x128xf32>,
    return
  }
}

</mosaic_0001>

<bundles_post_ra>
// kernel: _encoder_forward_impl.1
= control target key start
LH: loop header
LB: loop body
LE: loop exit
PB: predicated region body
PF: predicated region fallthrough
CT: control target
= control target key end

     0   :  { %12 = vsyncpa [#allocation7], 0  ;;  %s7509_s0 = inlined_call_operand.vmem [shape: f32[8,8,128], index: 0, kind: input, shape index: {}]   ;;  %s7510_s1 = inlined_call_operand.hbm [shape: f32[128,512], index: 1, kind: input, shape index: {}]   ;;  %s7511_s2 = inlined_call_operand.hbm [shape: f32[1,128,512], index: 2, kind: input, shape index: {}]   ;;  %s7512_s3 = inlined_call_operand.hbm [shape: f32[2,128,512], index: 3, kind: input, shape index: {}]   ;;  %s7513_s4 = inlined_call_operand.vmem [shape: f32[2,1,512], index: 4, kind: input, shape index: {}]   ;;  %s7514_s5 = inlined_call_operand.vmem [shape: f32[2,8,128], index: 5, kind: output, shape index: {0}]   ;;  %s7515_s6 = inlined_call_operand.vmem [shape: f32[2,8,128], index: 6, kind: output, shape index: {1}]  }
   0x1   :  { %13 = vsyncpa [#allocation9], 0  ;;  %s6350_s21 = smov [#allocation8]   ;;  %s6351_s23 = smov [#allocation6]  }
   0x2   :  { %s33_s22 = sshll.u32 %s6350_s21, 4  ;;  %s21_s24 = sshll.u32 %s6351_s23, 4  ;;  %s34_s22 = int_to_ptr.vmem [resolvable:$true] %s33_s22  ;;  %s6391_s24 = int_to_ptr.vmem [resolvable:$true] %s21_s24 }
   0x3   :  { %s6280_s27 = scalar_lea.hbm %s7511_s2, 8192 }
   0x4   :  { %p6281_p0 = scmp.ne.s32.totalorder %s7511_s2, %s6280_s27  ;;  %p6284_p1 = scmp.lt.u32.totalorder %s6280_s27, %s7511_s2 }
   0x6   :  { %p6286_p2 = pnand %p6284_p1, %p6281_p0 }
   0x8   :  { %6289 = shalt.err (!%p6286_p2)
}
   0x9   :  { %s6290_s8 = scalar_lea.vmem %s34_s22, 8192  ;;  %p6295_p4 = scmp.lt.s32.totalorder %s34_s22, %s34_s22 }
   0xa   :  { %p6291_p3 = scmp.ne.s32.totalorder %s34_s22, %s6290_s8  ;;  %p6296_p5 = scmp.lt.s32.totalorder %s6290_s8, %s6290_s8 }
   0xc   :  { %p6297_p6 = por %p6296_p5, %p6295_p4 }
   0xe   :  { %p6298_p7 = pnand %p6297_p6, %p6291_p3 }
  0x10   :  { %6301 = shalt.err (!%p6298_p7)
}
  0x11   :  { %s6352_s9 = smov 512   ;;  %s6353_s10 = smov 32  }
  0x12   :  { %39 = dma.hbm_to_vmem [thread:$0]  %s7511_s2, 8192, %s34_s22, [#allocation9], %s6352_s9, %s6352_s9, %s6353_s10  }
  0x13   :  { %s6302_s15 = scalar_lea.hbm %s7510_s1, 8192 }
  0x14   :  { %p6303_p8 = scmp.ne.s32.totalorder %s7510_s1, %s6302_s15  ;;  %p6306_p9 = scmp.lt.u32.totalorder %s6302_s15, %s7510_s1 }
  0x16   :  { %p6308_p10 = pnand %p6306_p9, %p6303_p8 }
  0x18   :  { %6311 = shalt.err (!%p6308_p10)
}
  0x19   :  { %s6312_s20 = scalar_lea.vmem %s6391_s24, 8192  ;;  %p6317_p12 = scmp.lt.s32.totalorder %s6391_s24, %s6391_s24 }
  0x1a   :  { %p6313_p11 = scmp.ne.s32.totalorder %s6391_s24, %s6312_s20  ;;  %p6318_p13 = scmp.lt.s32.totalorder %s6312_s20, %s6312_s20 }
  0x1c   :  { %p6319_p0 = por %p6318_p13, %p6317_p12 }
  0x1e   :  { %p6320_p1 = pnand %p6319_p0, %p6313_p11 }
  0x20   :  { %6323 = shalt.err (!%p6320_p1)
}
  0x21   :  { %27 = dma.hbm_to_vmem [thread:$0]  %s7510_s1, 8192, %s6391_s24, [#allocation7], %s6352_s9, %s6352_s9, %s6353_s10  }
  0x22   :  { %s6354_s22 = smov [#allocation10]   ;;  %s6324_s27 = scalar_lea.hbm %s7512_s3, 16384 }
  0x23   :  { %s45_s23 = sshll.u32 %s6354_s22, 4  ;;  %p6325_p2 = scmp.ne.s32.totalorder %s7512_s3, %s6324_s27  ;;  %s46_s23 = int_to_ptr.vmem [resolvable:$true] %s45_s23 }
  0x24   :  { %p6328_p3 = scmp.lt.u32.totalorder %s6324_s27, %s7512_s3 }
  0x26   :  { %p6330_p4 = pnand %p6328_p3, %p6325_p2 }
  0x28   :  { %6333 = shalt.err (!%p6330_p4)
}
  0x29   :  { %s6334_s8 = scalar_lea.vmem %s46_s23, 16384  ;;  %p6339_p6 = scmp.lt.s32.totalorder %s46_s23, %s46_s23 }
  0x2a   :  { %p6335_p5 = scmp.ne.s32.totalorder %s46_s23, %s6334_s8  ;;  %p6340_p7 = scmp.lt.s32.totalorder %s6334_s8, %s6334_s8 }
  0x2c   :  { %p6341_p8 = por %p6340_p7, %p6339_p6 }
  0x2e   :  { %p6342_p9 = pnand %p6341_p8, %p6335_p5 }
  0x30   :  { %6345 = shalt.err (!%p6342_p9)
}
  0x31   :  { %51 = dma.hbm_to_vmem [thread:$0]  %s7512_s3, 16384, %s46_s23, [#allocation9], %s6352_s9, %s6352_s9, %s6353_s10  }
  0x32   :  { %6346 = dma.done.wait [#allocation7], 8192  }
  0x33   :  { %6347 = vsyncadd [#allocation7], 4294959104 }
  0x34   :  { %6348 = dma.done.wait [#allocation9], 24576  }
  0x35   :  { %6349 = vsyncadd [#allocation9], 4294942720  ;;  %v6355_v0 = vmov 0.0   ;;  %v72_v1 = vld [vmem:[#allocation6 + $0x8] sm:$0xff]  ;;  %v74_v3 = vld [vmem:[#allocation6 + $0x18] sm:$0xff] }
  0x36   :  { %221 = vmatprep.mubr.f32.mxu0 %v6355_v0  ;;  %334 = vmatprep.mubr.f32.mxu1 %v6355_v0  ;;  %v76_v2 = vld [vmem:[#allocation6 + $0x28] sm:$0xff]  ;;  %v78_v5 = vld [vmem:[#allocation6 + $0x38] sm:$0xff]  ;;  %v71_v6 = vld [vmem:[#allocation6] sm:$0xff] }
  0x37   :  { %v4738_v4 = vpack.c.bf16 %v76_v2, %v72_v1  ;;  %v75_v7 = vld [vmem:[#allocation6 + $0x20] sm:$0xff]  ;;  %v4770_v8 = vpack.c.bf16 %v78_v5, %v74_v3  ;;  %v73_v10 = vld [vmem:[#allocation6 + $0x10] sm:$0xff]  ;;  %v80_v12 = vld [vmem:[#allocation6 + $0x48] sm:$0xff] }
  0x38   :  { %v4740_v9 = vpack.c.bf16 %v75_v7, %v71_v6  ;;  %v77_v11 = vld [vmem:[#allocation6 + $0x30] sm:$0xff]  ;;  %v84_v14 = vld [vmem:[#allocation6 + $0x68] sm:$0xff]  ;;  %v82_v15 = vld [vmem:[#allocation6 + $0x58] sm:$0xff] }
  0x39   :  { %4739 = vmatprep.subr.bf16.mxu0 %v4738_v4  ;;  %v4772_v13 = vpack.c.bf16 %v77_v11, %v73_v10  ;;  %v86_v16 = vld [vmem:[#allocation6 + $0x78] sm:$0xff]  ;;  %4771 = vmatprep.subr.bf16.mxu1 %v4770_v8  ;;  %v4742_v17 = vpack.c.bf16 %v84_v14, %v80_v12  ;;  %v79_v19 = vld [vmem:[#allocation6 + $0x40] sm:$0xff]  ;;  %v81_v21 = vld [vmem:[#allocation6 + $0x50] sm:$0xff] }
  0x3a   :  { %4741 = vmatpush1.bf16.msra.mxu0 %v4740_v9  ;;  %v4774_v18 = vpack.c.bf16 %v86_v16, %v82_v15  ;;  %v83_v20 = vld [vmem:[#allocation6 + $0x60] sm:$0xff]  ;;  %v85_v23 = vld [vmem:[#allocation6 + $0x70] sm:$0xff]  ;;  %v88_v24 = vld [vmem:[#allocation6 + $0x88] sm:$0xff] }
  0x3b   :  { %4773 = vmatpush1.bf16.msra.mxu1 %v4772_v13  ;;  %v4744_v22 = vpack.c.bf16 %v83_v20, %v79_v19  ;;  %v92_v25 = vld [vmem:[#allocation6 + $0xa8] sm:$0xff]  ;;  %4743 = vmatprep.subr.bf16.mxu0 %v4742_v17  ;;  %v4776_v26 = vpack.c.bf16 %v85_v23, %v81_v21  ;;  %v90_v28 = vld [vmem:[#allocation6 + $0x98] sm:$0xff]  ;;  %v87_v30 = vld [vmem:[#allocation6 + $0x80] sm:$0xff] }
  0x3c   :  { %4775 = vmatprep.subr.bf16.mxu1 %v4774_v18  ;;  %v4746_v27 = vpack.c.bf16 %v92_v25, %v88_v24  ;;  %v94_v29 = vld [vmem:[#allocation6 + $0xb8] sm:$0xff]  ;;  %v91_v32 = vld [vmem:[#allocation6 + $0xa0] sm:$0xff]  ;;  %v89_v33 = vld [vmem:[#allocation6 + $0x90] sm:$0xff] }
  0x3d   :  { %v4778_v31 = vpack.c.bf16 %v94_v29, %v90_v28  ;;  %v93_v34 = vld [vmem:[#allocation6 + $0xb0] sm:$0xff]  ;;  %v4748_v35 = vpack.c.bf16 %v91_v32, %v87_v30  ;;  %v96_v36 = vld [vmem:[#allocation6 + $0xc8] sm:$0xff]  ;;  %v98_v38 = vld [vmem:[#allocation6 + $0xd8] sm:$0xff] }
  0x3e   :  { %4745 = vmatpush1.bf16.msra.mxu0 %v4744_v22  ;;  %v100_v37 = vld [vmem:[#allocation6 + $0xe8] sm:$0xff]  ;;  %v4780_v39 = vpack.c.bf16 %v93_v34, %v89_v33  ;;  %v102_v41 = vld [vmem:[#allocation6 + $0xf8] sm:$0xff]  ;;  %v95_v42 = vld [vmem:[#allocation6 + $0xc0] sm:$0xff] }
  0x3f   :  { %4777 = vmatpush1.bf16.msra.mxu1 %v4776_v26  ;;  %4747 = vmatprep.subr.bf16.mxu0 %v4746_v27  ;;  %v4750_v40 = vpack.c.bf16 %v100_v37, %v96_v36  ;;  %v99_v43 = vld [vmem:[#allocation6 + $0xe0] sm:$0xff]  ;;  %v4782_v44 = vpack.c.bf16 %v102_v41, %v98_v38  ;;  %v97_v45 = vld [vmem:[#allocation6 + $0xd0] sm:$0xff]  ;;  %v104_v47 = vld [vmem:[#allocation6 + $0x108] sm:$0xff] }
  0x40   :  { %4779 = vmatprep.subr.bf16.mxu1 %v4778_v31  ;;  %v101_v46 = vld [vmem:[#allocation6 + $0xf0] sm:$0xff]  ;;  %v108_v48 = vld [vmem:[#allocation6 + $0x128] sm:$0xff]  ;;  %v106_v49 = vld [vmem:[#allocation6 + $0x118] sm:$0xff]  ;;  %v4752_v51 = vpack.c.bf16 %v99_v43, %v95_v42 }
  0x41   :  { %v110_v50 = vld [vmem:[#allocation6 + $0x138] sm:$0xff]  ;;  %v4784_v52 = vpack.c.bf16 %v101_v46, %v97_v45  ;;  %v4754_v53 = vpack.c.bf16 %v108_v48, %v104_v47  ;;  %v103_v54 = vld [vmem:[#allocation6 + $0x100] sm:$0xff]  ;;  %v105_v56 = vld [vmem:[#allocation6 + $0x110] sm:$0xff] }
  0x42   :  { %4749 = vmatpush1.bf16.msra.mxu0 %v4748_v35  ;;  %v107_v55 = vld [vmem:[#allocation6 + $0x120] sm:$0xff]  ;;  %v4786_v57 = vpack.c.bf16 %v110_v50, %v106_v49  ;;  %v109_v58 = vld [vmem:[#allocation6 + $0x130] sm:$0xff]  ;;  %v112_v59 = vld [vmem:[#allocation6 + $0x148] sm:$0xff] }
  0x43   :  { %4781 = vmatpush1.bf16.msra.mxu1 %v4780_v39  ;;  %4751 = vmatprep.subr.bf16.mxu0 %v4750_v40  ;;  %v116_v60 = vld [vmem:[#allocation6 + $0x168] sm:$0xff]  ;;  %v114_v61 = vld [vmem:[#allocation6 + $0x158] sm:$0xff]  ;;  %v4756_v63 = vpack.c.bf16 %v107_v55, %v103_v54  ;;  %v4788_v1 = vpack.c.bf16 %v109_v58, %v105_v56  ;;  %v111_v3 = vld [vmem:[#allocation6 + $0x140] sm:$0xff] }
  0x44   :  { %4783 = vmatprep.subr.bf16.mxu1 %v4782_v44  ;;  %v118_v62 = vld [vmem:[#allocation6 + $0x178] sm:$0xff]  ;;  %v4758_v2 = vpack.c.bf16 %v116_v60, %v112_v59  ;;  %v115_v4 = vld [vmem:[#allocation6 + $0x160] sm:$0xff]  ;;  %v113_v5 = vld [vmem:[#allocation6 + $0x150] sm:$0xff] }
  0x45   :  { %v4790_v6 = vpack.c.bf16 %v118_v62, %v114_v61  ;;  %v117_v7 = vld [vmem:[#allocation6 + $0x170] sm:$0xff]  ;;  %v120_v8 = vld [vmem:[#allocation6 + $0x188] sm:$0xff]  ;;  %v122_v10 = vld [vmem:[#allocation6 + $0x198] sm:$0xff]  ;;  %v4760_v12 = vpack.c.bf16 %v115_v4, %v111_v3 }
  0x46   :  { %4753 = vmatpush1.bf16.msra.mxu0 %v4752_v51  ;;  %v124_v9 = vld [vmem:[#allocation6 + $0x1a8] sm:$0xff]  ;;  %v126_v11 = vld [vmem:[#allocation6 + $0x1b8] sm:$0xff]  ;;  %v4792_v13 = vpack.c.bf16 %v117_v7, %v113_v5  ;;  %v119_v15 = vld [vmem:[#allocation6 + $0x180] sm:$0xff] }
  0x47   :  { %4785 = vmatpush1.bf16.msra.mxu1 %v4784_v52  ;;  %4755 = vmatprep.subr.bf16.mxu0 %v4754_v53  ;;  %v4762_v14 = vpack.c.bf16 %v124_v9, %v120_v8  ;;  %v123_v16 = vld [vmem:[#allocation6 + $0x1a0] sm:$0xff]  ;;  %v121_v17 = vld [vmem:[#allocation6 + $0x190] sm:$0xff]  ;;  %v4794_v18 = vpack.c.bf16 %v126_v11, %v122_v10  ;;  %v128_v20 = vld [vmem:[#allocation6 + $0x1c8] sm:$0xff] }
  0x48   :  { %4787 = vmatprep.subr.bf16.mxu1 %v4786_v57  ;;  %v125_v19 = vld [vmem:[#allocation6 + $0x1b0] sm:$0xff]  ;;  %v132_v21 = vld [vmem:[#allocation6 + $0x1e8] sm:$0xff]  ;;  %v130_v22 = vld [vmem:[#allocation6 + $0x1d8] sm:$0xff]  ;;  %v4764_v24 = vpack.c.bf16 %v123_v16, %v119_v15 }
  0x49   :  { %v134_v23 = vld [vmem:[#allocation6 + $0x1f8] sm:$0xff]  ;;  %v4796_v25 = vpack.c.bf16 %v125_v19, %v121_v17  ;;  %v4766_v26 = vpack.c.bf16 %v132_v21, %v128_v20  ;;  %v127_v27 = vld [vmem:[#allocation6 + $0x1c0] sm:$0xff]  ;;  %v129_v29 = vld [vmem:[#allocation6 + $0x1d0] sm:$0xff] }
  0x4a   :  { %4757 = vmatpush1.bf16.msra.mxu0 %v4756_v63  ;;  %v131_v28 = vld [vmem:[#allocation6 + $0x1e0] sm:$0xff]  ;;  %v4798_v30 = vpack.c.bf16 %v134_v23, %v130_v22  ;;  %v133_v31 = vld [vmem:[#allocation6 + $0x1f0] sm:$0xff]  ;;  %v423_v32 = vld [vmem:[#allocation10 + $0x8] sm:$0xff] }
  0x4b   :  { %4789 = vmatpush1.bf16.msra.mxu1 %v4788_v1  ;;  %4759 = vmatprep.subr.bf16.mxu0 %v4758_v2  ;;  %v427_v33 = vld [vmem:[#allocation10 + $0x28] sm:$0xff]  ;;  %v425_v34 = vld [vmem:[#allocation10 + $0x18] sm:$0xff]  ;;  %v4768_v36 = vpack.c.bf16 %v131_v28, %v127_v27  ;;  %v4800_v37 = vpack.c.bf16 %v133_v31, %v129_v29  ;;  %v422_v39 = vld [vmem:[#allocation10] sm:$0xff] }
  0x4c   :  { %4791 = vmatprep.subr.bf16.mxu1 %v4790_v6  ;;  %v429_v35 = vld [vmem:[#allocation10 + $0x38] sm:$0xff]  ;;  %v6445_v38 = vpack.c.bf16 %v427_v33, %v423_v32  ;;  %v426_v40 = vld [vmem:[#allocation10 + $0x20] sm:$0xff]  ;;  %v424_v42 = vld [vmem:[#allocation10 + $0x10] sm:$0xff] }
  0x4d   :  { %v6447_v41 = vpack.c.bf16 %v429_v35, %v425_v34  ;;  %v428_v43 = vld [vmem:[#allocation10 + $0x30] sm:$0xff]  ;;  %v431_v44 = vld [vmem:[#allocation10 + $0x48] sm:$0xff]  ;;  %v63_v46 = vld [vmem:[%s7509_s0] sm:$0xff]  ;;  %v6452_v47 = vpack.c.bf16 %v426_v40, %v422_v39 }
  0x4e   :  { %4761 = vmatpush1.bf16.msra.mxu0 %v4760_v12  ;;  %v435_v45 = vld [vmem:[#allocation10 + $0x68] sm:$0xff]  ;;  %v433_v48 = vld [vmem:[#allocation10 + $0x58] sm:$0xff]  ;;  %v6455_v50 = vpack.c.bf16 %v428_v43, %v424_v42  ;;  %v430_v51 = vld [vmem:[#allocation10 + $0x40] sm:$0xff] }
  0x4f   :  { %4793 = vmatpush1.bf16.msra.mxu1 %v4792_v13  ;;  %4763 = vmatprep.subr.bf16.mxu0 %v4762_v14  ;;  %v437_v49 = vld [vmem:[#allocation10 + $0x78] sm:$0xff]  ;;  %v434_v52 = vld [vmem:[#allocation10 + $0x60] sm:$0xff]  ;;  %v6458_v53 = vpack.c.bf16 %v435_v45, %v431_v44  ;;  %v432_v54 = vld [vmem:[#allocation10 + $0x50] sm:$0xff] }
  0x50   :  { %4795 = vmatprep.subr.bf16.mxu1 %v4794_v18  ;;  %v436_v55 = vld [vmem:[#allocation10 + $0x70] sm:$0xff]  ;;  %v6460_v56 = vpack.c.bf16 %v437_v49, %v433_v48  ;;  %v439_v57 = vld [vmem:[#allocation10 + $0x88] sm:$0xff]  ;;  %v6466_v60 = vpack.c.bf16 %v434_v52, %v430_v51  ;;  %v441_v61 = vld [vmem:[#allocation10 + $0x98] sm:$0xff] }
  0x51   :  { %v443_v58 = vld [vmem:[#allocation10 + $0xa8] sm:$0xff]  ;;  %v445_v62 = vld [vmem:[#allocation10 + $0xb8] sm:$0xff]  ;;  %v6470_v63 = vpack.c.bf16 %v436_v55, %v432_v54  ;;  %v438_v1 = vld [vmem:[#allocation10 + $0x80] sm:$0xff] }
  0x52   :  { %4765 = vmatpush1.bf16.msra.mxu0 %v4764_v24  ;;  %v64_v59 = vld [vmem:[%s7509_s0 + $0x8] sm:$0xff]  ;;  %v442_v2 = vld [vmem:[#allocation10 + $0xa0] sm:$0xff]  ;;  %v6474_v3 = vpack.c.bf16 %v443_v58, %v439_v57  ;;  %v440_v4 = vld [vmem:[#allocation10 + $0x90] sm:$0xff]  ;;  %v6477_v6 = vpack.c.bf16 %v445_v62, %v441_v61 }
  0x53   :  { %4797 = vmatpush1.bf16.msra.mxu1 %v4796_v25  ;;  %4767 = vmatprep.subr.bf16.mxu0 %v4766_v26  ;;  %v444_v5 = vld [vmem:[#allocation10 + $0xb0] sm:$0xff]  ;;  %v447_v7 = vld [vmem:[#allocation10 + $0xc8] sm:$0xff]  ;;  %v6483_v10 = vpack.c.bf16 %v442_v2, %v438_v1  ;;  %v449_v11 = vld [vmem:[#allocation10 + $0xd8] sm:$0xff] }
  0x54   :  { %4799 = vmatprep.subr.bf16.mxu1 %v4798_v30  ;;  %v451_v8 = vld [vmem:[#allocation10 + $0xe8] sm:$0xff]  ;;  %v65_v9 = vld [vmem:[%s7509_s0 + $0x10] sm:$0xff]  ;;  %v453_v12 = vld [vmem:[#allocation10 + $0xf8] sm:$0xff]  ;;  %v6487_v13 = vpack.c.bf16 %v444_v5, %v440_v4 }
  0x55   :  { %v446_v14 = vld [vmem:[#allocation10 + $0xc0] sm:$0xff]  ;;  %v6491_v16 = vpack.c.bf16 %v451_v8, %v447_v7  ;;  %v448_v17 = vld [vmem:[#allocation10 + $0xd0] sm:$0xff]  ;;  %v6494_v19 = vpack.c.bf16 %v453_v12, %v449_v11  ;;  %v455_v20 = vld [vmem:[#allocation10 + $0x108] sm:$0xff] }
  0x56   :  { %4769 = vmatpush1.bf16.msra.mxu0 %v4768_v36  ;;  %v450_v15 = vld [vmem:[#allocation10 + $0xe0] sm:$0xff]  ;;  %v452_v18 = vld [vmem:[#allocation10 + $0xf0] sm:$0xff]  ;;  %v459_v21 = vld [vmem:[#allocation10 + $0x128] sm:$0xff] }
  0x57   :  { %4801 = vmatpush1.bf16.msra.mxu1 %v4800_v37  ;;  %4803 = vmatprep.subr.bf16.mxu0 %v6445_v38  ;;  %v66_v22 = vld [vmem:[%s7509_s0 + $0x18] sm:$0xff]  ;;  %v6500_v23 = vpack.c.bf16 %v450_v15, %v446_v14  ;;  %v6504_v26 = vpack.c.bf16 %v452_v18, %v448_v17  ;;  %v454_v27 = vld [vmem:[#allocation10 + $0x100] sm:$0xff]  ;;  %v6508_v29 = vpack.c.bf16 %v459_v21, %v455_v20  ;;  %v456_v30 = vld [vmem:[#allocation10 + $0x110] sm:$0xff] }
  0x58   :  { %4835 = vmatprep.subr.bf16.mxu1 %v6447_v41  ;;  %v457_v24 = vld [vmem:[#allocation10 + $0x118] sm:$0xff]  ;;  %v458_v28 = vld [vmem:[#allocation10 + $0x120] sm:$0xff]  ;;  %v460_v31 = vld [vmem:[#allocation10 + $0x130] sm:$0xff] }
  0x59   :  { %222 = vmatmul.mubr.f32.vlgmr.msra.gmra.mrb[0].mxu0 %v63_v46  ;;  %v461_v25 = vld [vmem:[#allocation10 + $0x138] sm:$0xff]  ;;  %v463_v33 = vld [vmem:[#allocation10 + $0x148] sm:$0xff]  ;;  %v67_v35 = vld [vmem:[%s7509_s0 + $0x20] sm:$0xff]  ;;  %v6517_v36 = vpack.c.bf16 %v458_v28, %v454_v27  ;;  %v6521_v40 = vpack.c.bf16 %v460_v31, %v456_v30  ;;  %v137_v28 = vlaneseq }
  0x5a   :  { %335 = vmatmul.mubr.f32.vlgmr.msra.gmra.mrb[0].mxu1 %v63_v46  ;;  %4805 = vmatpush1.bf16.msra.mxu0 %v6452_v47  ;;  %v6511_v32 = vpack.c.bf16 %v461_v25, %v457_v24  ;;  %v467_v34 = vld [vmem:[#allocation10 + $0x168] sm:$0xff]  ;;  %v465_v37 = vld [vmem:[#allocation10 + $0x158] sm:$0xff]  ;;  %v462_v42 = vld [vmem:[#allocation10 + $0x140] sm:$0xff] }
  0x5b   :  { %4837 = vmatpush1.bf16.msra.mxu1 %v6455_v50  ;;  %227 = vmatprep.mubr.f32.mxu0 %v6355_v0  ;;  %v469_v39 = vld [vmem:[#allocation10 + $0x178] sm:$0xff]  ;;  %v466_v43 = vld [vmem:[#allocation10 + $0x160] sm:$0xff]  ;;  %v6525_v44 = vpack.c.bf16 %v467_v34, %v463_v33  ;;  %v464_v45 = vld [vmem:[#allocation10 + $0x150] sm:$0xff]  ;;  %v6619_v30 = vshrl.u32 %v137_v28, 7 }
  0x5c   :  { %340 = vmatprep.mubr.f32.mxu1 %v6355_v0  ;;  %4807 = vmatprep.subr.bf16.mxu0 %v6458_v53  ;;  %v468_v46 = vld [vmem:[#allocation10 + $0x170] sm:$0xff]  ;;  %v6528_v48 = vpack.c.bf16 %v469_v39, %v465_v37  ;;  %v471_v49 = vld [vmem:[#allocation10 + $0x188] sm:$0xff]  ;;  %v6534_v54 = vpack.c.bf16 %v466_v43, %v462_v42  ;;  %v473_v55 = vld [vmem:[#allocation10 + $0x198] sm:$0xff] }
  0x5d   :  { %228 = vmatmul.mubr.f32.gmra.mrb[2].mxu0 %v64_v59  ;;  %4839 = vmatprep.subr.bf16.mxu1 %v6460_v56  ;;  %v475_v51 = vld [vmem:[#allocation10 + $0x1a8] sm:$0xff]  ;;  %v477_v57 = vld [vmem:[#allocation10 + $0x1b8] sm:$0xff]  ;;  %v6538_v58 = vpack.c.bf16 %v468_v46, %v464_v45  ;;  %v474_v61 = vld [vmem:[#allocation10 + $0x1a0] sm:$0xff]  ;;  %v139_v31 = vsub.s32 0, %v6619_v30  ;;  %v143_v34 = vsub.s32 1, %v6619_v30  ;;  %v151_v37 = vsub.s32 3, %v6619_v30 }
  0x5e   :  { %341 = vmatmul.mubr.f32.gmra.mrb[2].mxu1 %v64_v59  ;;  %4809 = vmatpush1.bf16.msra.mxu0 %v6466_v60  ;;  %v68_v52 = vld [vmem:[%s7509_s0 + $0x28] sm:$0xff]  ;;  %v470_v59 = vld [vmem:[#allocation10 + $0x180] sm:$0xff]  ;;  %v6542_v62 = vpack.c.bf16 %v475_v51, %v471_v49  ;;  %v472_v1 = vld [vmem:[#allocation10 + $0x190] sm:$0xff]  ;;  %v6545_v4 = vpack.c.bf16 %v477_v57, %v473_v55  ;;  %v147_v55 = vsub.s32 2, %v6619_v30 }
  0x5f   :  { %4841 = vmatpush1.bf16.msra.mxu1 %v6470_v63  ;;  %233 = vmatprep.mubr.f32.mxu0 %v6355_v0  ;;  %v476_v2 = vld [vmem:[#allocation10 + $0x1b0] sm:$0xff]  ;;  %v479_v5 = vld [vmem:[#allocation10 + $0x1c8] sm:$0xff]  ;;  %v481_v11 = vld [vmem:[#allocation10 + $0x1d8] sm:$0xff] }
  0x60   :  { %346 = vmatprep.mubr.f32.mxu1 %v6355_v0  ;;  %4811 = vmatprep.subr.bf16.mxu0 %v6474_v3  ;;  %v483_v7 = vld [vmem:[#allocation10 + $0x1e8] sm:$0xff]  ;;  %v69_v8 = vld [vmem:[%s7509_s0 + $0x30] sm:$0xff]  ;;  %v485_v12 = vld [vmem:[#allocation10 + $0x1f8] sm:$0xff]  ;;  %v6555_v14 = vpack.c.bf16 %v476_v2, %v472_v1 }
  0x61   :  { %234 = vmatmul.mubr.f32.gmra.mrb[4].mxu0 %v65_v9  ;;  %4843 = vmatprep.subr.bf16.mxu1 %v6477_v6  ;;  %v478_v15 = vld [vmem:[#allocation10 + $0x1c0] sm:$0xff]  ;;  %v6559_v18 = vpack.c.bf16 %v483_v7, %v479_v5  ;;  %v480_v20 = vld [vmem:[#allocation10 + $0x1d0] sm:$0xff]  ;;  %v70_v24 = vld [vmem:[%s7509_s0 + $0x38] sm:$0xff] }
  0x62   :  { %347 = vmatmul.mubr.f32.gmra.mrb[4].mxu1 %v65_v9  ;;  %4813 = vmatpush1.bf16.msra.mxu0 %v6483_v10  ;;  %v6551_v9 = vpack.c.bf16 %v474_v61, %v470_v59  ;;  %v482_v17 = vld [vmem:[#allocation10 + $0x1e0] sm:$0xff]  ;;  %v484_v21 = vld [vmem:[#allocation10 + $0x1f0] sm:$0xff] }
  0x63   :  { %4845 = vmatpush1.bf16.msra.mxu1 %v6487_v13  ;;  %239 = vmatprep.mubr.f32.mxu0 %v6355_v0  ;;  %v6568_v25 = vpack.c.bf16 %v482_v17, %v478_v15  ;;  %v6572_v27 = vpack.c.bf16 %v484_v21, %v480_v20  ;;  %v135_v33 = vld [vmem:[%s7513_s4] sm:$0xf] }
  0x64   :  { %352 = vmatprep.mubr.f32.mxu1 %v6355_v0  ;;  %4815 = vmatprep.subr.bf16.mxu0 %v6491_v16  ;;  %v6645_v59 = vrot.slane %v135_v33, %v147_v55 }
  0x65   :  { %240 = vmatmul.mubr.f32.gmra.mrb[6].mxu0 %v66_v22  ;;  %4847 = vmatprep.subr.bf16.mxu1 %v6494_v19 }
  0x66   :  { %353 = vmatmul.mubr.f32.gmra.mrb[6].mxu1 %v66_v22  ;;  %4817 = vmatpush1.bf16.msra.mxu0 %v6500_v23  ;;  %v6562_v22 = vpack.c.bf16 %v485_v12, %v481_v11 }
  0x67   :  { %4849 = vmatpush1.bf16.msra.mxu1 %v6504_v26  ;;  %245 = vmatprep.mubr.f32.mxu0 %v6355_v0 }
  0x68   :  { %358 = vmatprep.mubr.f32.mxu1 %v6355_v0  ;;  %4819 = vmatprep.subr.bf16.mxu0 %v6508_v29 }
  0x69   :  { %246 = vmatmul.mubr.f32.gmra.mrb[8].mxu0 %v67_v35  ;;  %4851 = vmatprep.subr.bf16.mxu1 %v6511_v32 }
  0x6a   :  { %359 = vmatmul.mubr.f32.gmra.mrb[8].mxu1 %v67_v35  ;;  %4821 = vmatpush1.bf16.msra.mxu0 %v6517_v36  ;;  %v6628_v35 = vrot.slane %v135_v33, %v139_v31 }
  0x6b   :  { %4853 = vmatpush1.bf16.msra.mxu1 %v6521_v40  ;;  %251 = vmatprep.mubr.f32.mxu0 %v6355_v0 }
  0x6c   :  { %364 = vmatprep.mubr.f32.mxu1 %v6355_v0  ;;  %4823 = vmatprep.subr.bf16.mxu0 %v6525_v44 }
  0x6d   :  { %252 = vmatmul.mubr.f32.gmra.mrb[10].mxu0 %v68_v52  ;;  %4855 = vmatprep.subr.bf16.mxu1 %v6528_v48 }
  0x6e   :  { %365 = vmatmul.mubr.f32.gmra.mrb[10].mxu1 %v68_v52  ;;  %4825 = vmatpush1.bf16.msra.mxu0 %v6534_v54  ;;  %v6639_v52 = vrot.slane %v135_v33, %v151_v37 }
  0x6f   :  { %4857 = vmatpush1.bf16.msra.mxu1 %v6538_v58  ;;  %257 = vmatprep.mubr.f32.mxu0 %v6355_v0 }
  0x70   :  { %370 = vmatprep.mubr.f32.mxu1 %v6355_v0  ;;  %4827 = vmatprep.subr.bf16.mxu0 %v6542_v62 }
  0x71   :  { %258 = vmatmul.mubr.f32.gmra.mrb[12].mxu0 %v69_v8  ;;  %4859 = vmatprep.subr.bf16.mxu1 %v6545_v4 }
  0x72   :  { %371 = vmatmul.mubr.f32.gmra.mrb[12].mxu1 %v69_v8  ;;  %4829 = vmatpush1.bf16.msra.mxu0 %v6551_v9 }
  0x73   :  { %4861 = vmatpush1.bf16.msra.mxu1 %v6555_v14  ;;  %263 = vmatprep.mubr.f32.mxu0 %v6355_v0 }
  0x74   :  { %376 = vmatprep.mubr.f32.mxu1 %v6355_v0  ;;  %4831 = vmatprep.subr.bf16.mxu0 %v6559_v18 }
  0x75   :  { %264 = vmatmul.mubr.f32.gmra.mrb[14].mxu0 %v70_v24  ;;  %4863 = vmatprep.subr.bf16.mxu1 %v6562_v22 }
  0x76   :  { %377 = vmatmul.mubr.f32.gmra.mrb[14].mxu1 %v70_v24  ;;  %4833 = vmatpush1.bf16.msra.mxu0 %v6568_v25 }
  0x77   :  { %4865 = vmatpush1.bf16.msra.mxu1 %v6572_v27  ;;  %550 = vmatprep.mubr.f32.mxu0 %v6355_v0 }
  0x78   :  { %621 = vmatprep.mubr.f32.mxu1 %v6355_v0  ;;  %4867 = vmatprep.subr.bf16.mxu0 %v6445_v38 }
  0x79   :  { %551 = vmatmul.mubr.f32.vlgmr.msra.gmra.mrb[0].mxu0 %v6355_v0  ;;  %4899 = vmatprep.subr.bf16.mxu1 %v6447_v41 }
  0x7a   :  { %622 = vmatmul.mubr.f32.vlgmr.msra.gmra.mrb[0].mxu1 %v6355_v0  ;;  %4869 = vmatpush1.bf16.msra.mxu0 %v6452_v47 }
  0x7b   :  { %4901 = vmatpush1.bf16.msra.mxu1 %v6455_v50  ;;  %4871 = vmatprep.subr.bf16.mxu0 %v6458_v53 }
  0x7c   :  { %4903 = vmatprep.subr.bf16.mxu1 %v6460_v56  ;;  %794 = vmatprep.mubr.f32.mxu0 %v6355_v0 }
  0x7d   :  { %865 = vmatprep.mubr.f32.mxu1 %v6355_v0 }
  0x7e   :  { %4873 = vmatpush1.bf16.msra.mxu0 %v6466_v60 }
  0x7f   :  { %4905 = vmatpush1.bf16.msra.mxu1 %v6470_v63  ;;  %4875 = vmatprep.subr.bf16.mxu0 %v6474_v3 }
  0x80   :  { %4907 = vmatprep.subr.bf16.mxu1 %v6477_v6 }
  0x82   :  { %4877 = vmatpush1.bf16.msra.mxu0 %v6483_v10 }
  0x83   :  { %4909 = vmatpush1.bf16.msra.mxu1 %v6487_v13  ;;  %4879 = vmatprep.subr.bf16.mxu0 %v6491_v16 }
  0x84   :  { %4911 = vmatprep.subr.bf16.mxu1 %v6494_v19 }
  0x86   :  { %4881 = vmatpush1.bf16.msra.mxu0 %v6500_v23 }
  0x87   :  { %4913 = vmatpush1.bf16.msra.mxu1 %v6504_v26  ;;  %4883 = vmatprep.subr.bf16.mxu0 %v6508_v29 }
  0x88   :  { %4915 = vmatprep.subr.bf16.mxu1 %v6511_v32 }
  0x8a   :  { %4885 = vmatpush1.bf16.msra.mxu0 %v6517_v36 }
  0x8b   :  { %4917 = vmatpush1.bf16.msra.mxu1 %v6521_v40  ;;  %4887 = vmatprep.subr.bf16.mxu0 %v6525_v44 }
  0x8c   :  { %4919 = vmatprep.subr.bf16.mxu1 %v6528_v48 }
  0x8e   :  { %4889 = vmatpush1.bf16.msra.mxu0 %v6534_v54 }
  0x8f   :  { %4921 = vmatpush1.bf16.msra.mxu1 %v6538_v58  ;;  %4891 = vmatprep.subr.bf16.mxu0 %v6542_v62 }
  0x90   :  { %4923 = vmatprep.subr.bf16.mxu1 %v6545_v4 }
  0x92   :  { %4893 = vmatpush1.bf16.msra.mxu0 %v6551_v9 }
  0x93   :  { %4925 = vmatpush1.bf16.msra.mxu1 %v6555_v14  ;;  %4895 = vmatprep.subr.bf16.mxu0 %v6559_v18 }
  0x94   :  { %4927 = vmatprep.subr.bf16.mxu1 %v6562_v22 }
  0x96   :  { %4897 = vmatpush1.bf16.msra.mxu0 %v6568_v25 }
  0x97   :  { %4929 = vmatpush1.bf16.msra.mxu1 %v6572_v27  ;;  %4931 = vmatprep.subr.bf16.mxu0 %v6445_v38  ;;  %v6632_v38 = vrot.slane %v135_v33, %v143_v34 }
  0x98   :  { %4963 = vmatprep.subr.bf16.mxu1 %v6447_v41 }
 0x14c   :  { %v552_v41 = vpop.f32.mrb[0].mxu0 }
 0x14d   :  { %v5890_v39 = vadd.f32 %v552_v41, %v6628_v35  ;;  %v623_v42 = vpop.f32.mrb[0].mxu1  ;;  %v554_v43 = vpop.f32.mrb[1].mxu0 }
 0x14e   :  { %v5891_v45 = vadd.f32 %v554_v43, %v6632_v38  ;;  %v625_v46 = vpop.f32.mrb[1].mxu1  ;;  %v5906_v1 = vadd.f32 %v623_v42, %v6645_v59 }
 0x14f   :  { %v4687_v49 = vmul.f32 -1.442695, %v5890_v39  ;;  %v5907_v57 = vadd.f32 %v625_v46, %v6639_v52 }
 0x150   :  { %v4688_v51 = vmul.f32 -1.442695, %v5891_v45 }
 0x151   :  { %6024 = vpow2.f32 %v4687_v49  ;;  %v4689_v61 = vmul.f32 -1.442695, %v5907_v57 }
 0x152   :  { %6026 = vpow2.f32 %v4688_v51 }
 0x153   :  { %6028 = vpow2.f32 %v4689_v61 }
 0x154   :  { %6030 = vtanh.f32 %v5906_v1 }
 0x15b   :  { %v6025_v2 = vpop.eup %6024 }
 0x15c   :  { %v6027_v5 = vpop.eup %6026  ;;  %v635_v7 = vadd.f32 1.0, %v6025_v2 }
 0x15d   :  { %v641_v8 = vadd.f32 1.0, %v6027_v5  ;;  %v6029_v11 = vpop.eup %6028 }
 0x15e   :  { %6032 = vrcp.f32 %v635_v7  ;;  %v6031_v12 = vpop.eup %6030  ;;  %v648_v21 = vadd.f32 1.0, %v6029_v11 }
 0x15f   :  { %6034 = vrcp.f32 %v641_v8 }
 0x160   :  { %6036 = vrcp.f32 %v648_v21 }
 0x168   :  { %v6033_v15 = vpop.eup %6032 }
 0x169   :  { %v6035_v17 = vpop.eup %6034  ;;  %v653_v20 = vmul.f32 %v6033_v15, %v6031_v12 }
 0x16a   :  { %v652_v24 = vmul.f32 0.0, %v6035_v17  ;;  %v6037_v33 = vpop.eup %6036 }
 0x16c   :  { %v6648_v28 = vadd.f32 %v653_v20, %v652_v24 }
 0x16e   :  { %6038 = vtanh.f32 %v6648_v28 }
 0x178   :  { %v6039_v41 = vpop.eup %6038 }
 0x179   :  { %v6651_v39 = vmul.f32 %v6039_v41, %v6037_v33  ;;  %v1157_v33 = vld [vmem:[#allocation10 + $0x8] sm:$0xff] }
 0x17a   :  { %v1161_v41 = vld [vmem:[#allocation10 + $0x28] sm:$0xff] }
 0x17b   :  { %795 = vmatmul.mubr.f32.vlgmr.msra.gmra.mrb[2].mxu0 %v6651_v39  ;;  %866 = vmatmul.mubr.f32.vlgmr.msra.gmra.mrb[2].mxu1 %v6651_v39 }
 0x17c   :  { %4933 = vmatpush1.bf16.msra.mxu0 %v6452_v47  ;;  %4965 = vmatpush1.bf16.msra.mxu1 %v6455_v50 }
 0x17d   :  { %4935 = vmatprep.subr.bf16.mxu0 %v6458_v53  ;;  %4967 = vmatprep.subr.bf16.mxu1 %v6460_v56 }
 0x17e   :  { %1039 = vmatprep.mubr.f32.mxu0 %v6355_v0  ;;  %1110 = vmatprep.mubr.f32.mxu1 %v6355_v0 }
 0x180   :  { %4937 = vmatpush1.bf16.msra.mxu0 %v6466_v60  ;;  %4969 = vmatpush1.bf16.msra.mxu1 %v6470_v63 }
 0x181   :  { %4939 = vmatprep.subr.bf16.mxu0 %v6474_v3  ;;  %4971 = vmatprep.subr.bf16.mxu1 %v6477_v6 }
 0x184   :  { %4941 = vmatpush1.bf16.msra.mxu0 %v6483_v10  ;;  %4973 = vmatpush1.bf16.msra.mxu1 %v6487_v13 }
 0x185   :  { %4943 = vmatprep.subr.bf16.mxu0 %v6491_v16  ;;  %4975 = vmatprep.subr.bf16.mxu1 %v6494_v19 }
 0x188   :  { %4945 = vmatpush1.bf16.msra.mxu0 %v6500_v23  ;;  %4977 = vmatpush1.bf16.msra.mxu1 %v6504_v26 }
 0x189   :  { %4947 = vmatprep.subr.bf16.mxu0 %v6508_v29  ;;  %4979 = vmatprep.subr.bf16.mxu1 %v6511_v32 }
 0x18c   :  { %4949 = vmatpush1.bf16.msra.mxu0 %v6517_v36  ;;  %4981 = vmatpush1.bf16.msra.mxu1 %v6521_v40 }
 0x18d   :  { %4951 = vmatprep.subr.bf16.mxu0 %v6525_v44  ;;  %4983 = vmatprep.subr.bf16.mxu1 %v6528_v48 }
 0x190   :  { %4953 = vmatpush1.bf16.msra.mxu0 %v6534_v54  ;;  %4985 = vmatpush1.bf16.msra.mxu1 %v6538_v58 }
 0x191   :  { %4955 = vmatprep.subr.bf16.mxu0 %v6542_v62  ;;  %4987 = vmatprep.subr.bf16.mxu1 %v6545_v4 }
 0x194   :  { %4957 = vmatpush1.bf16.msra.mxu0 %v6551_v9  ;;  %4989 = vmatpush1.bf16.msra.mxu1 %v6555_v14 }
 0x195   :  { %4959 = vmatprep.subr.bf16.mxu0 %v6559_v18  ;;  %4991 = vmatprep.subr.bf16.mxu1 %v6562_v22 }
 0x198   :  { %4961 = vmatpush1.bf16.msra.mxu0 %v6568_v25  ;;  %4993 = vmatpush1.bf16.msra.mxu1 %v6572_v27 }
 0x24e   :  { %v796_v47 = vpop.f32.mrb[2].mxu0  ;;  %v867_v50 = vpop.f32.mrb[2].mxu1 }
 0x24f   :  { %v5892_v53 = vadd.f32 %v796_v47, %v6628_v35  ;;  %v798_v56 = vpop.f32.mrb[3].mxu0  ;;  %v869_v60 = vpop.f32.mrb[3].mxu1  ;;  %v5908_v49 = vadd.f32 %v867_v50, %v6645_v59  ;;  %v6701_v47 = vpack.c.bf16 %v1161_v41, %v1157_v33  ;;  %v1163_v50 = vld [vmem:[#allocation10 + $0x38] sm:$0xff] }
 0x250   :  { %v5893_v63 = vadd.f32 %v798_v56, %v6632_v38  ;;  %v5909_v45 = vadd.f32 %v869_v60, %v6639_v52  ;;  %v1160_v56 = vld [vmem:[#allocation10 + $0x20] sm:$0xff]  ;;  %v1420_v33 = vld [vmem:[#allocation10 + $0x98] sm:$0xff] }
 0x251   :  { %v4690_v42 = vmul.f32 -1.442695, %v5892_v53  ;;  %v1156_v53 = vld [vmem:[#allocation10] sm:$0xff]  ;;  %4995 = vmatprep.subr.bf16.mxu0 %v6701_v47 }
 0x252   :  { %v4691_v43 = vmul.f32 -1.442695, %v5893_v63  ;;  %v4692_v46 = vmul.f32 -1.442695, %v5909_v45  ;;  %v6705_v63 = vpack.c.bf16 %v1160_v56, %v1156_v53  ;;  %v1421_v53 = vld [vmem:[#allocation10 + $0xa0] sm:$0xff] }
 0x253   :  { %6040 = vpow2.f32 %v4690_v42  ;;  %v1158_v42 = vld [vmem:[#allocation10 + $0x10] sm:$0xff] }
 0x254   :  { %6042 = vpow2.f32 %v4691_v43  ;;  %v1162_v43 = vld [vmem:[#allocation10 + $0x30] sm:$0xff] }
 0x255   :  { %6044 = vpow2.f32 %v4692_v46  ;;  %v6708_v45 = vpack.c.bf16 %v1162_v43, %v1158_v42  ;;  %v1165_v46 = vld [vmem:[#allocation10 + $0x48] sm:$0xff]  ;;  %v1419_v43 = vld [vmem:[#allocation10 + $0x90] sm:$0xff] }
 0x256   :  { %6046 = vtanh.f32 %v5908_v49  ;;  %v1169_v49 = vld [vmem:[#allocation10 + $0x68] sm:$0xff] }
 0x25d   :  { %v6041_v51 = vpop.eup %6040 }
 0x25e   :  { %v6043_v57 = vpop.eup %6042  ;;  %v879_v61 = vadd.f32 1.0, %v6041_v51  ;;  %v1167_v51 = vld [vmem:[#allocation10 + $0x58] sm:$0xff] }
 0x25f   :  { %v885_v1 = vadd.f32 1.0, %v6043_v57  ;;  %v6045_v2 = vpop.eup %6044  ;;  %v6713_v57 = vpack.c.bf16 %v1169_v49, %v1165_v46  ;;  %v1423_v46 = vld [vmem:[#allocation10 + $0xb0] sm:$0xff] }
 0x260   :  { %6048 = vrcp.f32 %v879_v61  ;;  %v6047_v5 = vpop.eup %6046  ;;  %v892_v12 = vadd.f32 1.0, %v6045_v2  ;;  %v1171_v61 = vld [vmem:[#allocation10 + $0x78] sm:$0xff]  ;;  %v1168_v2 = vld [vmem:[#allocation10 + $0x60] sm:$0xff]  ;;  %v6778_v49 = vpack.c.bf16 %v1423_v46, %v1419_v43  ;;  %v1454_v46 = vld [vmem:[#allocation10 + $0x1a8] sm:$0xff] }
 0x261   :  { %6050 = vrcp.f32 %v885_v1  ;;  %v1164_v1 = vld [vmem:[#allocation10 + $0x40] sm:$0xff] }
 0x262   :  { %6052 = vrcp.f32 %v892_v12 }
 0x26a   :  { %v6049_v7 = vpop.eup %6048 }
 0x26b   :  { %v6051_v8 = vpop.eup %6050  ;;  %v897_v11 = vmul.f32 %v6049_v7, %v6047_v5  ;;  %v6715_v5 = vpack.c.bf16 %v1171_v61, %v1167_v51  ;;  %v6717_v7 = vpack.c.bf16 %v1168_v2, %v1164_v1  ;;  %v1426_v51 = vld [vmem:[#allocation10 + $0xc8] sm:$0xff]  ;;  %v1428_v1 = vld [vmem:[#allocation10 + $0xd8] sm:$0xff] }
 0x26c   :  { %v896_v15 = vmul.f32 %v6051_v8, %v6648_v28  ;;  %v6053_v20 = vpop.eup %6052  ;;  %v1159_v28 = vld [vmem:[#allocation10 + $0x18] sm:$0xff]  ;;  %v1166_v8 = vld [vmem:[#allocation10 + $0x50] sm:$0xff]  ;;  %v1430_v61 = vld [vmem:[#allocation10 + $0xe8] sm:$0xff] }
 0x26d   :  { %v6703_v60 = vpack.c.bf16 %v1163_v50, %v1159_v28  ;;  %v1424_v28 = vld [vmem:[#allocation10 + $0xb8] sm:$0xff]  ;;  %v1417_v50 = vld [vmem:[#allocation10 + $0x80] sm:$0xff]  ;;  %v6783_v2 = vpack.c.bf16 %v1430_v61, %v1426_v51 }
 0x26e   :  { %v6692_v17 = vadd.f32 %v897_v11, %v896_v15  ;;  %v1170_v11 = vld [vmem:[#allocation10 + $0x70] sm:$0xff]  ;;  %v6773_v56 = vpack.c.bf16 %v1424_v28, %v1420_v33  ;;  %v6775_v42 = vpack.c.bf16 %v1421_v53, %v1417_v50  ;;  %v1450_v53 = vld [vmem:[#allocation10 + $0x188] sm:$0xff]  ;;  %v1452_v51 = vld [vmem:[#allocation10 + $0x198] sm:$0xff] }
 0x26f   :  { %5027 = vmatprep.subr.bf16.mxu1 %v6703_v60  ;;  %v6720_v12 = vpack.c.bf16 %v1170_v11, %v1166_v8  ;;  %v1432_v8 = vld [vmem:[#allocation10 + $0xf8] sm:$0xff]  ;;  %v1425_v11 = vld [vmem:[#allocation10 + $0xc0] sm:$0xff]  ;;  %v1443_v28 = vld [vmem:[#allocation10 + $0x150] sm:$0xff] }
 0x270   :  { %6054 = vtanh.f32 %v6692_v17  ;;  %v1447_v50 = vld [vmem:[#allocation10 + $0x170] sm:$0xff]  ;;  %v1456_v61 = vld [vmem:[#allocation10 + $0x1b8] sm:$0xff] }
 0x271   :  { %v6814_v43 = vpack.c.bf16 %v1447_v50, %v1443_v28 }
 0x27a   :  { %v6055_v21 = vpop.eup %6054 }
 0x27b   :  { %v6695_v24 = vmul.f32 %v6055_v21, %v6053_v20  ;;  %v1422_v21 = vld [vmem:[#allocation10 + $0xa8] sm:$0xff] }
 0x27d   :  { %1040 = vmatmul.mubr.f32.vlgmr.msra.gmra.mrb[4].mxu0 %v6695_v24  ;;  %1111 = vmatmul.mubr.f32.vlgmr.msra.gmra.mrb[4].mxu1 %v6695_v24 }
 0x27e   :  { %1284 = vmatprep.mubr.f32.mxu0 %v6355_v0  ;;  %1355 = vmatprep.mubr.f32.mxu1 %v6355_v0 }
 0x27f   :  { %4997 = vmatpush1.bf16.msra.mxu0 %v6705_v63  ;;  %5029 = vmatpush1.bf16.msra.mxu1 %v6708_v45 }
 0x280   :  { %4999 = vmatprep.subr.bf16.mxu0 %v6713_v57  ;;  %5031 = vmatprep.subr.bf16.mxu1 %v6715_v5 }
 0x283   :  { %5001 = vmatpush1.bf16.msra.mxu0 %v6717_v7  ;;  %5033 = vmatpush1.bf16.msra.mxu1 %v6720_v12 }
 0x284   :  { %5003 = vmatprep.subr.bf16.mxu0 %v6474_v3  ;;  %5035 = vmatprep.subr.bf16.mxu1 %v6477_v6 }
 0x287   :  { %5005 = vmatpush1.bf16.msra.mxu0 %v6483_v10  ;;  %5037 = vmatpush1.bf16.msra.mxu1 %v6487_v13 }
 0x288   :  { %5007 = vmatprep.subr.bf16.mxu0 %v6491_v16  ;;  %5039 = vmatprep.subr.bf16.mxu1 %v6494_v19 }
 0x28b   :  { %5009 = vmatpush1.bf16.msra.mxu0 %v6500_v23  ;;  %5041 = vmatpush1.bf16.msra.mxu1 %v6504_v26 }
 0x28c   :  { %5011 = vmatprep.subr.bf16.mxu0 %v6508_v29  ;;  %5043 = vmatprep.subr.bf16.mxu1 %v6511_v32 }
 0x28f   :  { %5013 = vmatpush1.bf16.msra.mxu0 %v6517_v36  ;;  %5045 = vmatpush1.bf16.msra.mxu1 %v6521_v40 }
 0x290   :  { %5015 = vmatprep.subr.bf16.mxu0 %v6525_v44  ;;  %5047 = vmatprep.subr.bf16.mxu1 %v6528_v48 }
 0x293   :  { %5017 = vmatpush1.bf16.msra.mxu0 %v6534_v54  ;;  %5049 = vmatpush1.bf16.msra.mxu1 %v6538_v58 }
 0x294   :  { %5019 = vmatprep.subr.bf16.mxu0 %v6542_v62  ;;  %5051 = vmatprep.subr.bf16.mxu1 %v6545_v4 }
 0x297   :  { %5021 = vmatpush1.bf16.msra.mxu0 %v6551_v9  ;;  %5053 = vmatpush1.bf16.msra.mxu1 %v6555_v14 }
 0x298   :  { %5023 = vmatprep.subr.bf16.mxu0 %v6559_v18  ;;  %5055 = vmatprep.subr.bf16.mxu1 %v6562_v22 }
 0x29b   :  { %5025 = vmatpush1.bf16.msra.mxu0 %v6568_v25  ;;  %5057 = vmatpush1.bf16.msra.mxu1 %v6572_v27 }
 0x29c   :  { %5059 = vmatprep.subr.bf16.mxu0 %v6701_v47  ;;  %5091 = vmatprep.subr.bf16.mxu1 %v6703_v60 }
 0x350   :  { %v1041_v3 = vpop.f32.mrb[4].mxu0  ;;  %v1112_v6 = vpop.f32.mrb[4].mxu1 }
 0x351   :  { %v5894_v10 = vadd.f32 %v1041_v3, %v6628_v35  ;;  %v1043_v13 = vpop.f32.mrb[5].mxu0  ;;  %v1114_v16 = vpop.f32.mrb[5].mxu1  ;;  %v5910_v36 = vadd.f32 %v1112_v6, %v6645_v59  ;;  %v1429_v3 = vld [vmem:[#allocation10 + $0xe0] sm:$0xff]  ;;  %v6785_v6 = vpack.c.bf16 %v1432_v8, %v1428_v1  ;;  %v6817_v1 = vpack.c.bf16 %v1454_v46, %v1450_v53 }
 0x352   :  { %v5895_v19 = vadd.f32 %v1043_v13, %v6632_v38  ;;  %v5911_v29 = vadd.f32 %v1114_v16, %v6639_v52  ;;  %v1427_v13 = vld [vmem:[#allocation10 + $0xd0] sm:$0xff]  ;;  %v6819_v8 = vpack.c.bf16 %v1456_v61, %v1452_v51 }
 0x353   :  { %v4693_v23 = vmul.f32 -1.442695, %v5894_v10  ;;  %v6787_v10 = vpack.c.bf16 %v1429_v3, %v1425_v11  ;;  %v1431_v16 = vld [vmem:[#allocation10 + $0xf0] sm:$0xff]  ;;  %v1449_v11 = vld [vmem:[#allocation10 + $0x180] sm:$0xff] }
 0x354   :  { %v4694_v26 = vmul.f32 -1.442695, %v5895_v19  ;;  %v4695_v32 = vmul.f32 -1.442695, %v5911_v29  ;;  %v6790_v19 = vpack.c.bf16 %v1431_v16, %v1427_v13  ;;  %v1436_v29 = vld [vmem:[#allocation10 + $0x118] sm:$0xff]  ;;  %v1453_v3 = vld [vmem:[#allocation10 + $0x1a0] sm:$0xff] }
 0x355   :  { %6056 = vpow2.f32 %v4693_v23  ;;  %v1434_v23 = vld [vmem:[#allocation10 + $0x108] sm:$0xff]  ;;  %v1451_v13 = vld [vmem:[#allocation10 + $0x190] sm:$0xff]  ;;  %v6822_v16 = vpack.c.bf16 %v1453_v3, %v1449_v11 }
 0x356   :  { %6058 = vpow2.f32 %v4694_v26  ;;  %v1438_v26 = vld [vmem:[#allocation10 + $0x128] sm:$0xff] }
 0x357   :  { %6060 = vpow2.f32 %v4695_v32  ;;  %v6795_v32 = vpack.c.bf16 %v1438_v26, %v1434_v23  ;;  %v1455_v23 = vld [vmem:[#allocation10 + $0x1b0] sm:$0xff]  ;;  %v1458_v26 = vld [vmem:[#allocation10 + $0x1c8] sm:$0xff] }
 0x358   :  { %6062 = vtanh.f32 %v5910_v36  ;;  %v1440_v36 = vld [vmem:[#allocation10 + $0x138] sm:$0xff] }
 0x35f   :  { %v6057_v40 = vpop.eup %6056 }
 0x360   :  { %v6059_v44 = vpop.eup %6058  ;;  %v1124_v48 = vadd.f32 1.0, %v6057_v40  ;;  %v1433_v40 = vld [vmem:[#allocation10 + $0x100] sm:$0xff] }
 0x361   :  { %v1130_v54 = vadd.f32 1.0, %v6059_v44  ;;  %v6061_v58 = vpop.eup %6060  ;;  %v1437_v44 = vld [vmem:[#allocation10 + $0x120] sm:$0xff] }
 0x362   :  { %6064 = vrcp.f32 %v1124_v48  ;;  %v6063_v62 = vpop.eup %6062  ;;  %v1137_v18 = vadd.f32 1.0, %v6061_v58  ;;  %v6797_v48 = vpack.c.bf16 %v1440_v36, %v1436_v29  ;;  %v1435_v58 = vld [vmem:[#allocation10 + $0x110] sm:$0xff]  ;;  %v1462_v29 = vld [vmem:[#allocation10 + $0x1e8] sm:$0xff]  ;;  %v6826_v36 = vpack.c.bf16 %v1455_v23, %v1451_v13 }
 0x363   :  { %6066 = vrcp.f32 %v1130_v54  ;;  %v6799_v54 = vpack.c.bf16 %v1437_v44, %v1433_v40  ;;  %v6828_v40 = vpack.c.bf16 %v1462_v29, %v1458_v26  ;;  %v1460_v44 = vld [vmem:[#allocation10 + $0x1d8] sm:$0xff] }
 0x364   :  { %6068 = vrcp.f32 %v1137_v18  ;;  %v1444_v18 = vld [vmem:[#allocation10 + $0x158] sm:$0xff] }
 0x36c   :  { %v6065_v4 = vpop.eup %6064 }
 0x36d   :  { %v6067_v9 = vpop.eup %6066  ;;  %v1142_v14 = vmul.f32 %v6065_v4, %v6063_v62  ;;  %v1439_v62 = vld [vmem:[#allocation10 + $0x130] sm:$0xff] }
 0x36e   :  { %v1141_v22 = vmul.f32 %v6067_v9, %v6692_v17  ;;  %v6069_v27 = vpop.eup %6068  ;;  %v1418_v17 = vld [vmem:[#allocation10 + $0x88] sm:$0xff]  ;;  %v6802_v4 = vpack.c.bf16 %v1439_v62, %v1435_v58  ;;  %v1464_v58 = vld [vmem:[#allocation10 + $0x1f8] sm:$0xff]  ;;  %v1457_v62 = vld [vmem:[#allocation10 + $0x1c0] sm:$0xff] }
 0x36f   :  { %v6771_v41 = vpack.c.bf16 %v1422_v21, %v1418_v17  ;;  %v1442_v9 = vld [vmem:[#allocation10 + $0x148] sm:$0xff]  ;;  %v1445_v17 = vld [vmem:[#allocation10 + $0x160] sm:$0xff] }
 0x370   :  { %v6756_v25 = vadd.f32 %v1142_v14, %v1141_v22  ;;  %v1446_v14 = vld [vmem:[#allocation10 + $0x168] sm:$0xff] }
 0x371   :  { %v6806_v22 = vpack.c.bf16 %v1446_v14, %v1442_v9  ;;  %v6831_v9 = vpack.c.bf16 %v1464_v58, %v1460_v44  ;;  %v1461_v14 = vld [vmem:[#allocation10 + $0x1e0] sm:$0xff] }
 0x372   :  { %6070 = vtanh.f32 %v6756_v25 }
 0x37c   :  { %v6071_v15 = vpop.eup %6070 }
 0x37d   :  { %v6759_v20 = vmul.f32 %v6071_v15, %v6069_v27  ;;  %v1448_v27 = vld [vmem:[#allocation10 + $0x178] sm:$0xff]  ;;  %v1441_v15 = vld [vmem:[#allocation10 + $0x140] sm:$0xff] }
 0x37e   :  { %v6809_v21 = vpack.c.bf16 %v1448_v27, %v1444_v18  ;;  %v6811_v33 = vpack.c.bf16 %v1445_v17, %v1441_v15  ;;  %v1459_v18 = vld [vmem:[#allocation10 + $0x1d0] sm:$0xff]  ;;  %v6834_v15 = vpack.c.bf16 %v1461_v14, %v1457_v62 }
 0x37f   :  { %1285 = vmatmul.mubr.f32.vlgmr.msra.gmra.mrb[6].mxu0 %v6759_v20  ;;  %1356 = vmatmul.mubr.f32.vlgmr.msra.gmra.mrb[6].mxu1 %v6759_v20  ;;  %v1463_v27 = vld [vmem:[#allocation10 + $0x1f0] sm:$0xff] }
 0x380   :  { %5061 = vmatpush1.bf16.msra.mxu0 %v6705_v63  ;;  %5093 = vmatpush1.bf16.msra.mxu1 %v6708_v45  ;;  %v6838_v17 = vpack.c.bf16 %v1463_v27, %v1459_v18 }
 0x381   :  { %5063 = vmatprep.subr.bf16.mxu0 %v6713_v57  ;;  %5095 = vmatprep.subr.bf16.mxu1 %v6715_v5 }
 0x382   :  { %1529 = vmatprep.mubr.f32.mxu0 %v6355_v0  ;;  %1600 = vmatprep.mubr.f32.mxu1 %v6355_v0 }
 0x384   :  { %5065 = vmatpush1.bf16.msra.mxu0 %v6717_v7  ;;  %5097 = vmatpush1.bf16.msra.mxu1 %v6720_v12 }
 0x385   :  { %5067 = vmatprep.subr.bf16.mxu0 %v6771_v41  ;;  %5099 = vmatprep.subr.bf16.mxu1 %v6773_v56 }
 0x388   :  { %5069 = vmatpush1.bf16.msra.mxu0 %v6775_v42  ;;  %5101 = vmatpush1.bf16.msra.mxu1 %v6778_v49 }
 0x389   :  { %5071 = vmatprep.subr.bf16.mxu0 %v6783_v2  ;;  %5103 = vmatprep.subr.bf16.mxu1 %v6785_v6 }
 0x38c   :  { %5073 = vmatpush1.bf16.msra.mxu0 %v6787_v10  ;;  %5105 = vmatpush1.bf16.msra.mxu1 %v6790_v19 }
 0x38d   :  { %5075 = vmatprep.subr.bf16.mxu0 %v6795_v32  ;;  %5107 = vmatprep.subr.bf16.mxu1 %v6797_v48 }
 0x390   :  { %5077 = vmatpush1.bf16.msra.mxu0 %v6799_v54  ;;  %5109 = vmatpush1.bf16.msra.mxu1 %v6802_v4 }
 0x391   :  { %5079 = vmatprep.subr.bf16.mxu0 %v6806_v22  ;;  %5111 = vmatprep.subr.bf16.mxu1 %v6809_v21 }
 0x394   :  { %5081 = vmatpush1.bf16.msra.mxu0 %v6811_v33  ;;  %5113 = vmatpush1.bf16.msra.mxu1 %v6814_v43 }
 0x395   :  { %5083 = vmatprep.subr.bf16.mxu0 %v6817_v1  ;;  %5115 = vmatprep.subr.bf16.mxu1 %v6819_v8 }
 0x398   :  { %5085 = vmatpush1.bf16.msra.mxu0 %v6822_v16  ;;  %5117 = vmatpush1.bf16.msra.mxu1 %v6826_v36 }
 0x399   :  { %5087 = vmatprep.subr.bf16.mxu0 %v6828_v40  ;;  %5119 = vmatprep.subr.bf16.mxu1 %v6831_v9 }
 0x39c   :  { %5089 = vmatpush1.bf16.msra.mxu0 %v6834_v15  ;;  %5121 = vmatpush1.bf16.msra.mxu1 %v6838_v17 }
 0x39d   :  { %5123 = vmatprep.subr.bf16.mxu0 %v6701_v47  ;;  %5155 = vmatprep.subr.bf16.mxu1 %v6703_v60 }
 0x452   :  { %v1286_v28 = vpop.f32.mrb[6].mxu0  ;;  %v1357_v50 = vpop.f32.mrb[6].mxu1 }
 0x453   :  { %v5896_v53 = vadd.f32 %v1286_v28, %v6628_v35  ;;  %v1288_v46 = vpop.f32.mrb[7].mxu0  ;;  %v1359_v51 = vpop.f32.mrb[7].mxu1  ;;  %v5912_v26 = vadd.f32 %v1357_v50, %v6645_v59 }
 0x454   :  { %v5897_v61 = vadd.f32 %v1288_v46, %v6632_v38  ;;  %v5913_v13 = vadd.f32 %v1359_v51, %v6639_v52 }
 0x455   :  { %v4696_v11 = vmul.f32 -1.442695, %v5896_v53 }
 0x456   :  { %v4697_v3 = vmul.f32 -1.442695, %v5897_v61  ;;  %v4698_v23 = vmul.f32 -1.442695, %v5913_v13 }
 0x457   :  { %6072 = vpow2.f32 %v4696_v11 }
 0x458   :  { %6074 = vpow2.f32 %v4697_v3 }
 0x459   :  { %6076 = vpow2.f32 %v4698_v23 }
 0x45a   :  { %6078 = vtanh.f32 %v5912_v26 }
 0x461   :  { %v6073_v29 = vpop.eup %6072 }
 0x462   :  { %v6075_v44 = vpop.eup %6074  ;;  %v1369_v58 = vadd.f32 1.0, %v6073_v29 }
 0x463   :  { %v1375_v62 = vadd.f32 1.0, %v6075_v44  ;;  %v6077_v14 = vpop.eup %6076 }
 0x464   :  { %6080 = vrcp.f32 %v1369_v58  ;;  %v6079_v18 = vpop.eup %6078  ;;  %v1382_v46 = vadd.f32 1.0, %v6077_v14 }
 0x465   :  { %6082 = vrcp.f32 %v1375_v62 }
 0x466   :  { %6084 = vrcp.f32 %v1382_v46 }
 0x46e   :  { %v6081_v27 = vpop.eup %6080 }
 0x46f   :  { %v6083_v28 = vpop.eup %6082  ;;  %v1387_v53 = vmul.f32 %v6081_v27, %v6079_v18 }
 0x470   :  { %v1386_v61 = vmul.f32 %v6083_v28, %v6756_v25  ;;  %v6085_v50 = vpop.eup %6084 }
 0x472   :  { %v6850_v51 = vadd.f32 %v1387_v53, %v1386_v61 }
 0x474   :  { %6086 = vtanh.f32 %v6850_v51 }
 0x47e   :  { %v6087_v11 = vpop.eup %6086 }
 0x47f   :  { %v6853_v3 = vmul.f32 %v6087_v11, %v6085_v50 }
 0x481   :  { %1530 = vmatmul.mubr.f32.vlgmr.msra.gmra.mrb[8].mxu0 %v6853_v3  ;;  %1601 = vmatmul.mubr.f32.vlgmr.msra.gmra.mrb[8].mxu1 %v6853_v3 }
 0x482   :  { %5125 = vmatpush1.bf16.msra.mxu0 %v6705_v63  ;;  %5157 = vmatpush1.bf16.msra.mxu1 %v6708_v45 }
 0x483   :  { %5127 = vmatprep.subr.bf16.mxu0 %v6713_v57  ;;  %5159 = vmatprep.subr.bf16.mxu1 %v6715_v5 }
 0x484   :  { %1774 = vmatprep.mubr.f32.mxu0 %v6355_v0  ;;  %1845 = vmatprep.mubr.f32.mxu1 %v6355_v0 }
 0x486   :  { %5129 = vmatpush1.bf16.msra.mxu0 %v6717_v7  ;;  %5161 = vmatpush1.bf16.msra.mxu1 %v6720_v12 }
 0x487   :  { %5131 = vmatprep.subr.bf16.mxu0 %v6771_v41  ;;  %5163 = vmatprep.subr.bf16.mxu1 %v6773_v56 }
 0x48a   :  { %5133 = vmatpush1.bf16.msra.mxu0 %v6775_v42  ;;  %5165 = vmatpush1.bf16.msra.mxu1 %v6778_v49 }
 0x48b   :  { %5135 = vmatprep.subr.bf16.mxu0 %v6783_v2  ;;  %5167 = vmatprep.subr.bf16.mxu1 %v6785_v6 }
 0x48e   :  { %5137 = vmatpush1.bf16.msra.mxu0 %v6787_v10  ;;  %5169 = vmatpush1.bf16.msra.mxu1 %v6790_v19 }
 0x48f   :  { %5139 = vmatprep.subr.bf16.mxu0 %v6795_v32  ;;  %5171 = vmatprep.subr.bf16.mxu1 %v6797_v48 }
 0x492   :  { %5141 = vmatpush1.bf16.msra.mxu0 %v6799_v54  ;;  %5173 = vmatpush1.bf16.msra.mxu1 %v6802_v4 }
 0x493   :  { %5143 = vmatprep.subr.bf16.mxu0 %v6806_v22  ;;  %5175 = vmatprep.subr.bf16.mxu1 %v6809_v21 }
 0x496   :  { %5145 = vmatpush1.bf16.msra.mxu0 %v6811_v33  ;;  %5177 = vmatpush1.bf16.msra.mxu1 %v6814_v43 }
 0x497   :  { %5147 = vmatprep.subr.bf16.mxu0 %v6817_v1  ;;  %5179 = vmatprep.subr.bf16.mxu1 %v6819_v8 }
 0x49a   :  { %5149 = vmatpush1.bf16.msra.mxu0 %v6822_v16  ;;  %5181 = vmatpush1.bf16.msra.mxu1 %v6826_v36 }
 0x49b   :  { %5151 = vmatprep.subr.bf16.mxu0 %v6828_v40  ;;  %5183 = vmatprep.subr.bf16.mxu1 %v6831_v9 }
 0x49e   :  { %5153 = vmatpush1.bf16.msra.mxu0 %v6834_v15  ;;  %5185 = vmatpush1.bf16.msra.mxu1 %v6838_v17 }
 0x49f   :  { %5187 = vmatprep.subr.bf16.mxu0 %v6701_v47  ;;  %5219 = vmatprep.subr.bf16.mxu1 %v6703_v60 }
 0x554   :  { %v1531_v25 = vpop.f32.mrb[8].mxu0  ;;  %v1602_v13 = vpop.f32.mrb[8].mxu1 }
 0x555   :  { %v5898_v23 = vadd.f32 %v1531_v25, %v6628_v35  ;;  %v1533_v26 = vpop.f32.mrb[9].mxu0  ;;  %v1604_v29 = vpop.f32.mrb[9].mxu1  ;;  %v5914_v27 = vadd.f32 %v1602_v13, %v6645_v59 }
 0x556   :  { %v5899_v44 = vadd.f32 %v1533_v26, %v6632_v38  ;;  %v5915_v14 = vadd.f32 %v1604_v29, %v6639_v52 }
 0x557   :  { %v4699_v58 = vmul.f32 -1.442695, %v5898_v23 }
 0x558   :  { %v4700_v62 = vmul.f32 -1.442695, %v5899_v44  ;;  %v4701_v18 = vmul.f32 -1.442695, %v5915_v14 }
 0x559   :  { %6088 = vpow2.f32 %v4699_v58 }
 0x55a   :  { %6090 = vpow2.f32 %v4700_v62 }
 0x55b   :  { %6092 = vpow2.f32 %v4701_v18 }
 0x55c   :  { %6094 = vtanh.f32 %v5914_v27 }
 0x563   :  { %v6089_v47 = vpop.eup %6088 }
 0x564   :  { %v6091_v28 = vpop.eup %6090  ;;  %v1614_v60 = vadd.f32 1.0, %v6089_v47 }
 0x565   :  { %v1620_v53 = vadd.f32 1.0, %v6091_v28  ;;  %v6093_v46 = vpop.eup %6092 }
 0x566   :  { %6096 = vrcp.f32 %v1614_v60  ;;  %v6095_v61 = vpop.eup %6094  ;;  %v1627_v23 = vadd.f32 1.0, %v6093_v46 }
 0x567   :  { %6098 = vrcp.f32 %v1620_v53 }
 0x568   :  { %6100 = vrcp.f32 %v1627_v23 }
 0x570   :  { %v6097_v50 = vpop.eup %6096 }
 0x571   :  { %v6099_v11 = vpop.eup %6098  ;;  %v1632_v25 = vmul.f32 %v6097_v50, %v6095_v61 }
 0x572   :  { %v1631_v26 = vmul.f32 %v6099_v11, %v6850_v51  ;;  %v6101_v13 = vpop.eup %6100 }
 0x574   :  { %v6896_v29 = vadd.f32 %v1632_v25, %v1631_v26 }
 0x576   :  { %6102 = vtanh.f32 %v6896_v29 }
 0x580   :  { %v6103_v44 = vpop.eup %6102 }
 0x581   :  { %v6899_v58 = vmul.f32 %v6103_v44, %v6101_v13 }
 0x583   :  { %1775 = vmatmul.mubr.f32.vlgmr.msra.gmra.mrb[10].mxu0 %v6899_v58  ;;  %1846 = vmatmul.mubr.f32.vlgmr.msra.gmra.mrb[10].mxu1 %v6899_v58 }
 0x584   :  { %5189 = vmatpush1.bf16.msra.mxu0 %v6705_v63  ;;  %5221 = vmatpush1.bf16.msra.mxu1 %v6708_v45 }
 0x585   :  { %5191 = vmatprep.subr.bf16.mxu0 %v6713_v57  ;;  %5223 = vmatprep.subr.bf16.mxu1 %v6715_v5 }
 0x586   :  { %2019 = vmatprep.mubr.f32.mxu0 %v6355_v0  ;;  %2090 = vmatprep.mubr.f32.mxu1 %v6355_v0 }
 0x588   :  { %5193 = vmatpush1.bf16.msra.mxu0 %v6717_v7  ;;  %5225 = vmatpush1.bf16.msra.mxu1 %v6720_v12 }
 0x589   :  { %5195 = vmatprep.subr.bf16.mxu0 %v6771_v41  ;;  %5227 = vmatprep.subr.bf16.mxu1 %v6773_v56 }
 0x58c   :  { %5197 = vmatpush1.bf16.msra.mxu0 %v6775_v42  ;;  %5229 = vmatpush1.bf16.msra.mxu1 %v6778_v49 }
 0x58d   :  { %5199 = vmatprep.subr.bf16.mxu0 %v6783_v2  ;;  %5231 = vmatprep.subr.bf16.mxu1 %v6785_v6 }
 0x590   :  { %5201 = vmatpush1.bf16.msra.mxu0 %v6787_v10  ;;  %5233 = vmatpush1.bf16.msra.mxu1 %v6790_v19 }
 0x591   :  { %5203 = vmatprep.subr.bf16.mxu0 %v6795_v32  ;;  %5235 = vmatprep.subr.bf16.mxu1 %v6797_v48 }
 0x594   :  { %5205 = vmatpush1.bf16.msra.mxu0 %v6799_v54  ;;  %5237 = vmatpush1.bf16.msra.mxu1 %v6802_v4 }
 0x595   :  { %5207 = vmatprep.subr.bf16.mxu0 %v6806_v22  ;;  %5239 = vmatprep.subr.bf16.mxu1 %v6809_v21 }
 0x598   :  { %5209 = vmatpush1.bf16.msra.mxu0 %v6811_v33  ;;  %5241 = vmatpush1.bf16.msra.mxu1 %v6814_v43 }
 0x599   :  { %5211 = vmatprep.subr.bf16.mxu0 %v6817_v1  ;;  %5243 = vmatprep.subr.bf16.mxu1 %v6819_v8 }
 0x59c   :  { %5213 = vmatpush1.bf16.msra.mxu0 %v6822_v16  ;;  %5245 = vmatpush1.bf16.msra.mxu1 %v6826_v36 }
 0x59d   :  { %5215 = vmatprep.subr.bf16.mxu0 %v6828_v40  ;;  %5247 = vmatprep.subr.bf16.mxu1 %v6831_v9 }
 0x5a0   :  { %5217 = vmatpush1.bf16.msra.mxu0 %v6834_v15  ;;  %5249 = vmatpush1.bf16.msra.mxu1 %v6838_v17 }
 0x656   :  { %v1776_v63 = vpop.f32.mrb[10].mxu0  ;;  %v1847_v45 = vpop.f32.mrb[10].mxu1 }
 0x657   :  { %v5900_v57 = vadd.f32 %v1776_v63, %v6628_v35  ;;  %v1778_v5 = vpop.f32.mrb[11].mxu0  ;;  %v1849_v7 = vpop.f32.mrb[11].mxu1  ;;  %v5916_v27 = vadd.f32 %v1847_v45, %v6645_v59 }
 0x658   :  { %v5901_v12 = vadd.f32 %v1778_v5, %v6632_v38  ;;  %v5917_v14 = vadd.f32 %v1849_v7, %v6639_v52  ;;  %v2141_v5 = vld [vmem:[#allocation10 + $0x28] sm:$0xff] }
 0x659   :  { %v4702_v51 = vmul.f32 -1.442695, %v5900_v57  ;;  %v2137_v57 = vld [vmem:[#allocation10 + $0x8] sm:$0xff] }
 0x65a   :  { %v4703_v62 = vmul.f32 -1.442695, %v5901_v12  ;;  %v4704_v18 = vmul.f32 -1.442695, %v5917_v14  ;;  %v5250_v7 = vpack.c.bf16 %v2141_v5, %v2137_v57  ;;  %v2143_v12 = vld [vmem:[#allocation10 + $0x38] sm:$0xff] }
 0x65b   :  { %6104 = vpow2.f32 %v4702_v51  ;;  %v2136_v51 = vld [vmem:[#allocation10] sm:$0xff] }
 0x65c   :  { %6106 = vpow2.f32 %v4703_v62  ;;  %v2140_v62 = vld [vmem:[#allocation10 + $0x20] sm:$0xff]  ;;  %5251 = vmatprep.subr.bf16.mxu0 %v5250_v7 }
 0x65d   :  { %6108 = vpow2.f32 %v4704_v18  ;;  %v5252_v18 = vpack.c.bf16 %v2140_v62, %v2136_v51  ;;  %v2387_v62 = vld [vmem:[#allocation8] sm:$0xff] }
 0x65e   :  { %6110 = vtanh.f32 %v5916_v27  ;;  %v2138_v27 = vld [vmem:[#allocation10 + $0x10] sm:$0xff] }
 0x665   :  { %v6105_v47 = vpop.eup %6104 }
 0x666   :  { %v6107_v28 = vpop.eup %6106  ;;  %v1859_v60 = vadd.f32 1.0, %v6105_v47  ;;  %v2142_v47 = vld [vmem:[#allocation10 + $0x30] sm:$0xff] }
 0x667   :  { %v1865_v53 = vadd.f32 1.0, %v6107_v28  ;;  %v6109_v46 = vpop.eup %6108  ;;  %v5284_v28 = vpack.c.bf16 %v2142_v47, %v2138_v27  ;;  %v2393_v27 = vld [vmem:[#allocation8 + $0x30] sm:$0xff]  ;;  %v2396_v47 = vld [vmem:[#allocation8 + $0x48] sm:$0xff] }
 0x668   :  { %6112 = vrcp.f32 %v1859_v60  ;;  %v6111_v61 = vpop.eup %6110  ;;  %v1872_v23 = vadd.f32 1.0, %v6109_v46  ;;  %v2145_v60 = vld [vmem:[#allocation10 + $0x48] sm:$0xff]  ;;  %v2147_v46 = vld [vmem:[#allocation10 + $0x58] sm:$0xff] }
 0x669   :  { %6114 = vrcp.f32 %v1865_v53  ;;  %v2149_v53 = vld [vmem:[#allocation10 + $0x68] sm:$0xff] }
 0x66a   :  { %6116 = vrcp.f32 %v1872_v23 }
 0x672   :  { %v6113_v50 = vpop.eup %6112 }
 0x673   :  { %v6115_v11 = vpop.eup %6114  ;;  %v1877_v25 = vmul.f32 %v6113_v50, %v6111_v61  ;;  %v5254_v61 = vpack.c.bf16 %v2149_v53, %v2145_v60  ;;  %v2151_v50 = vld [vmem:[#allocation10 + $0x78] sm:$0xff] }
 0x674   :  { %v1876_v26 = vmul.f32 %v6115_v11, %v6896_v29  ;;  %v6117_v44 = vpop.eup %6116  ;;  %v2139_v29 = vld [vmem:[#allocation10 + $0x18] sm:$0xff]  ;;  %v2144_v11 = vld [vmem:[#allocation10 + $0x40] sm:$0xff]  ;;  %v5286_v23 = vpack.c.bf16 %v2151_v50, %v2147_v46 }
 0x675   :  { %v5282_v14 = vpack.c.bf16 %v2143_v12, %v2139_v29  ;;  %v2398_v60 = vld [vmem:[#allocation8 + $0x58] sm:$0xff] }
 0x676   :  { %v6940_v13 = vadd.f32 %v1877_v25, %v1876_v26  ;;  %v2148_v25 = vld [vmem:[#allocation10 + $0x60] sm:$0xff]  ;;  %v2402_v53 = vld [vmem:[#allocation8 + $0x78] sm:$0xff] }
 0x677   :  { %5283 = vmatprep.subr.bf16.mxu1 %v5282_v14  ;;  %v5256_v26 = vpack.c.bf16 %v2148_v25, %v2144_v11  ;;  %v2391_v14 = vld [vmem:[#allocation8 + $0x20] sm:$0xff] }
 0x678   :  { %6118 = vtanh.f32 %v6940_v13  ;;  %v5316_v50 = vpack.c.bf16 %v2391_v14, %v2387_v62  ;;  %v2395_v25 = vld [vmem:[#allocation8 + $0x40] sm:$0xff] }
 0x682   :  { %v6119_v63 = vpop.eup %6118 }
 0x683   :  { %v6943_v45 = vmul.f32 %v6119_v63, %v6117_v44  ;;  %v2146_v44 = vld [vmem:[#allocation10 + $0x50] sm:$0xff] }
 0x684   :  { %v2150_v63 = vld [vmem:[#allocation10 + $0x70] sm:$0xff] }
 0x685   :  { %2020 = vmatmul.mubr.f32.vlgmr.msra.gmra.mrb[12].mxu0 %v6943_v45  ;;  %2091 = vmatmul.mubr.f32.vlgmr.msra.gmra.mrb[12].mxu1 %v6943_v45  ;;  %v5288_v57 = vpack.c.bf16 %v2150_v63, %v2146_v44  ;;  %v5350_v44 = vpack.c.bf16 %v2402_v53, %v2398_v60  ;;  %v2397_v63 = vld [vmem:[#allocation8 + $0x50] sm:$0xff] }
 0x686   :  { %2264 = vmatprep.mubr.f32.mxu0 %v6355_v0  ;;  %2335 = vmatprep.mubr.f32.mxu1 %v6355_v0  ;;  %v2421_v60 = vld [vmem:[#allocation8 + $0x110] sm:$0xff] }
 0x687   :  { %5253 = vmatpush1.bf16.msra.mxu0 %v5252_v18  ;;  %5285 = vmatpush1.bf16.msra.mxu1 %v5284_v28  ;;  %v2389_v18 = vld [vmem:[#allocation8 + $0x10] sm:$0xff]  ;;  %v2400_v28 = vld [vmem:[#allocation8 + $0x68] sm:$0xff] }
 0x688   :  { %5255 = vmatprep.subr.bf16.mxu0 %v5254_v61  ;;  %5287 = vmatprep.subr.bf16.mxu1 %v5286_v23  ;;  %v5348_v11 = vpack.c.bf16 %v2393_v27, %v2389_v18  ;;  %v2399_v23 = vld [vmem:[#allocation8 + $0x60] sm:$0xff]  ;;  %v2425_v53 = vld [vmem:[#allocation8 + $0x130] sm:$0xff] }
 0x689   :  { %v2419_v18 = vld [vmem:[#allocation8 + $0x100] sm:$0xff] }
 0x68a   :  { %v2423_v27 = vld [vmem:[#allocation8 + $0x120] sm:$0xff] }
 0x68b   :  { %5257 = vmatpush1.bf16.msra.mxu0 %v5256_v26  ;;  %5289 = vmatpush1.bf16.msra.mxu1 %v5288_v57  ;;  %v5318_v26 = vpack.c.bf16 %v2400_v28, %v2396_v47  ;;  %v2401_v57 = vld [vmem:[#allocation8 + $0x70] sm:$0xff] }
 0x68c   :  { %5259 = vmatprep.subr.bf16.mxu0 %v6771_v41  ;;  %5291 = vmatprep.subr.bf16.mxu1 %v6773_v56  ;;  %v2388_v41 = vld [vmem:[#allocation8 + $0x8] sm:$0xff] }
 0x68d   :  { %v2392_v56 = vld [vmem:[#allocation8 + $0x28] sm:$0xff] }
 0x68f   :  { %5261 = vmatpush1.bf16.msra.mxu0 %v6775_v42  ;;  %5293 = vmatpush1.bf16.msra.mxu1 %v6778_v49  ;;  %v2390_v42 = vld [vmem:[#allocation8 + $0x18] sm:$0xff] }
 0x690   :  { %5263 = vmatprep.subr.bf16.mxu0 %v6783_v2  ;;  %5295 = vmatprep.subr.bf16.mxu1 %v6785_v6  ;;  %v2394_v49 = vld [vmem:[#allocation8 + $0x38] sm:$0xff]  ;;  %v5314_v2 = vpack.c.bf16 %v2392_v56, %v2388_v41  ;;  %v2404_v41 = vld [vmem:[#allocation8 + $0x88] sm:$0xff] }
 0x691   :  { %v5346_v6 = vpack.c.bf16 %v2394_v49, %v2390_v42  ;;  %v2408_v56 = vld [vmem:[#allocation8 + $0xa8] sm:$0xff]  ;;  %v2406_v42 = vld [vmem:[#allocation8 + $0x98] sm:$0xff] }
 0x692   :  { %v2410_v49 = vld [vmem:[#allocation8 + $0xb8] sm:$0xff] }
 0x693   :  { %5265 = vmatpush1.bf16.msra.mxu0 %v6787_v10  ;;  %5297 = vmatpush1.bf16.msra.mxu1 %v6790_v19 }
 0x694   :  { %5267 = vmatprep.subr.bf16.mxu0 %v6795_v32  ;;  %5299 = vmatprep.subr.bf16.mxu1 %v6797_v48 }
 0x697   :  { %5269 = vmatpush1.bf16.msra.mxu0 %v6799_v54  ;;  %5301 = vmatpush1.bf16.msra.mxu1 %v6802_v4 }
 0x698   :  { %5271 = vmatprep.subr.bf16.mxu0 %v6806_v22  ;;  %5303 = vmatprep.subr.bf16.mxu1 %v6809_v21 }
 0x69b   :  { %5273 = vmatpush1.bf16.msra.mxu0 %v6811_v33  ;;  %5305 = vmatpush1.bf16.msra.mxu1 %v6814_v43 }
 0x69c   :  { %5275 = vmatprep.subr.bf16.mxu0 %v6817_v1  ;;  %5307 = vmatprep.subr.bf16.mxu1 %v6819_v8 }
 0x69f   :  { %5277 = vmatpush1.bf16.msra.mxu0 %v6822_v16  ;;  %5309 = vmatpush1.bf16.msra.mxu1 %v6826_v36 }
 0x6a0   :  { %5279 = vmatprep.subr.bf16.mxu0 %v6828_v40  ;;  %5311 = vmatprep.subr.bf16.mxu1 %v6831_v9 }
 0x6a3   :  { %5281 = vmatpush1.bf16.msra.mxu0 %v6834_v15  ;;  %5313 = vmatpush1.bf16.msra.mxu1 %v6838_v17 }
 0x6a4   :  { %5315 = vmatprep.subr.bf16.mxu0 %v5314_v2  ;;  %5347 = vmatprep.subr.bf16.mxu1 %v5346_v6  ;;  %v5320_v2 = vpack.c.bf16 %v2399_v23, %v2395_v25  ;;  %v5352_v6 = vpack.c.bf16 %v2401_v57, %v2397_v63  ;;  %v5332_v25 = vpack.c.bf16 %v2423_v27, %v2419_v18  ;;  %v2742_v27 = vld [vmem:[#allocation10 + $0x210] sm:$0xff] }
 0x6a5   :  { %v5364_v23 = vpack.c.bf16 %v2425_v53, %v2421_v60  ;;  %v2753_v60 = vld [vmem:[#allocation10 + $0x268] sm:$0xff]  ;;  %v2751_v53 = vld [vmem:[#allocation10 + $0x258] sm:$0xff] }
 0x758   :  { %v2021_v10 = vpop.f32.mrb[12].mxu0  ;;  %v2092_v19 = vpop.f32.mrb[12].mxu1 }
 0x759   :  { %v5902_v32 = vadd.f32 %v2021_v10, %v6628_v35  ;;  %v2023_v48 = vpop.f32.mrb[13].mxu0  ;;  %v2094_v54 = vpop.f32.mrb[13].mxu1  ;;  %v5918_v1 = vadd.f32 %v2092_v19, %v6645_v59  ;;  %v2403_v10 = vld [vmem:[#allocation8 + $0x80] sm:$0xff] }
 0x75a   :  { %v5903_v4 = vadd.f32 %v2023_v48, %v6632_v38  ;;  %v5919_v33 = vadd.f32 %v2094_v54, %v6639_v52  ;;  %v2407_v19 = vld [vmem:[#allocation8 + $0xa0] sm:$0xff]  ;;  %v5354_v48 = vpack.c.bf16 %v2410_v49, %v2406_v42  ;;  %v2405_v54 = vld [vmem:[#allocation8 + $0x90] sm:$0xff]  ;;  %v2436_v42 = vld [vmem:[#allocation8 + $0x188] sm:$0xff] }
 0x75b   :  { %v4705_v22 = vmul.f32 -1.442695, %v5902_v32  ;;  %v5322_v32 = vpack.c.bf16 %v2408_v56, %v2404_v41  ;;  %v2429_v41 = vld [vmem:[#allocation8 + $0x150] sm:$0xff]  ;;  %v2440_v49 = vld [vmem:[#allocation8 + $0x1a8] sm:$0xff] }
 0x75c   :  { %v4706_v21 = vmul.f32 -1.442695, %v5903_v4  ;;  %v4707_v43 = vmul.f32 -1.442695, %v5919_v33  ;;  %v2409_v4 = vld [vmem:[#allocation8 + $0xb0] sm:$0xff]  ;;  %v2414_v33 = vld [vmem:[#allocation8 + $0xd8] sm:$0xff] }
 0x75d   :  { %6120 = vpow2.f32 %v4705_v22  ;;  %v2412_v22 = vld [vmem:[#allocation8 + $0xc8] sm:$0xff]  ;;  %v2433_v56 = vld [vmem:[#allocation8 + $0x170] sm:$0xff] }
 0x75e   :  { %6122 = vpow2.f32 %v4706_v21  ;;  %v2416_v21 = vld [vmem:[#allocation8 + $0xe8] sm:$0xff] }
 0x75f   :  { %6124 = vpow2.f32 %v4707_v43  ;;  %v2418_v43 = vld [vmem:[#allocation8 + $0xf8] sm:$0xff] }
 0x760   :  { %6126 = vtanh.f32 %v5918_v1  ;;  %v5324_v1 = vpack.c.bf16 %v2407_v19, %v2403_v10  ;;  %v5368_v19 = vpack.c.bf16 %v2433_v56, %v2429_v41  ;;  %v2761_v41 = vld [vmem:[#allocation10 + $0x2a8] sm:$0xff]  ;;  %v2759_v56 = vld [vmem:[#allocation10 + $0x298] sm:$0xff] }
 0x767   :  { %v6121_v8 = vpop.eup %6120 }
 0x768   :  { %v6123_v16 = vpop.eup %6122  ;;  %v2104_v36 = vadd.f32 1.0, %v6121_v8  ;;  %v5356_v8 = vpack.c.bf16 %v2409_v4, %v2405_v54  ;;  %v5338_v54 = vpack.c.bf16 %v2440_v49, %v2436_v42  ;;  %v2763_v49 = vld [vmem:[#allocation10 + $0x2b8] sm:$0xff] }
 0x769   :  { %v2110_v40 = vadd.f32 1.0, %v6123_v16  ;;  %v6125_v9 = vpop.eup %6124  ;;  %v2411_v16 = vld [vmem:[#allocation8 + $0xc0] sm:$0xff] }
 0x76a   :  { %6128 = vrcp.f32 %v2104_v36  ;;  %v6127_v15 = vpop.eup %6126  ;;  %v2117_v7 = vadd.f32 1.0, %v6125_v9  ;;  %v2415_v36 = vld [vmem:[#allocation8 + $0xe0] sm:$0xff]  ;;  %v5358_v9 = vpack.c.bf16 %v2418_v43, %v2414_v33  ;;  %v2444_v33 = vld [vmem:[#allocation8 + $0x1c8] sm:$0xff] }
 0x76b   :  { %6130 = vrcp.f32 %v2110_v40  ;;  %v5326_v40 = vpack.c.bf16 %v2416_v21, %v2412_v22  ;;  %v5328_v62 = vpack.c.bf16 %v2415_v36, %v2411_v16  ;;  %v2437_v22 = vld [vmem:[#allocation8 + $0x190] sm:$0xff]  ;;  %v2448_v43 = vld [vmem:[#allocation8 + $0x1e8] sm:$0xff] }
 0x76c   :  { %6132 = vrcp.f32 %v2117_v7  ;;  %v2422_v7 = vld [vmem:[#allocation8 + $0x118] sm:$0xff]  ;;  %v2441_v21 = vld [vmem:[#allocation8 + $0x1b0] sm:$0xff] }
 0x76d   :  { %v5372_v36 = vpack.c.bf16 %v2441_v21, %v2437_v22  ;;  %v2769_v22 = vld [vmem:[#allocation10 + $0x2e8] sm:$0xff]  ;;  %v2767_v21 = vld [vmem:[#allocation10 + $0x2d8] sm:$0xff] }
 0x774   :  { %v6129_v17 = vpop.eup %6128 }
 0x775   :  { %v6131_v5 = vpop.eup %6130  ;;  %v2122_v29 = vmul.f32 %v6129_v17, %v6127_v15  ;;  %v2413_v15 = vld [vmem:[#allocation8 + $0xd0] sm:$0xff] }
 0x776   :  { %v2121_v12 = vmul.f32 %v6131_v5, %v6940_v13  ;;  %v6133_v46 = vpop.eup %6132  ;;  %v2417_v17 = vld [vmem:[#allocation8 + $0xf0] sm:$0xff]  ;;  %v2420_v5 = vld [vmem:[#allocation8 + $0x108] sm:$0xff] }
 0x777   :  { %v5360_v14 = vpack.c.bf16 %v2417_v17, %v2413_v15  ;;  %v2447_v17 = vld [vmem:[#allocation8 + $0x1e0] sm:$0xff] }
 0x778   :  { %v6978_v51 = vadd.f32 %v2122_v29, %v2121_v12  ;;  %v2424_v29 = vld [vmem:[#allocation8 + $0x128] sm:$0xff]  ;;  %v2426_v12 = vld [vmem:[#allocation8 + $0x138] sm:$0xff] }
 0x779   :  { %v5330_v47 = vpack.c.bf16 %v2424_v29, %v2420_v5  ;;  %v5362_v28 = vpack.c.bf16 %v2426_v12, %v2422_v7  ;;  %v2445_v5 = vld [vmem:[#allocation8 + $0x1d0] sm:$0xff] }
 0x77a   :  { %6134 = vtanh.f32 %v6978_v51  ;;  %v2449_v29 = vld [vmem:[#allocation8 + $0x1f0] sm:$0xff] }
 0x77b   :  { %v5376_v12 = vpack.c.bf16 %v2449_v29, %v2445_v5  ;;  %v2777_v5 = vld [vmem:[#allocation10 + $0x328] sm:$0xff]  ;;  %v2775_v29 = vld [vmem:[#allocation10 + $0x318] sm:$0xff] }
 0x784   :  { %v6135_v61 = vpop.eup %6134 }
 0x785   :  { %v6981_v13 = vmul.f32 %v6135_v61, %v6133_v46  ;;  %v2428_v46 = vld [vmem:[#allocation8 + $0x148] sm:$0xff] }
 0x786   :  { %v2432_v61 = vld [vmem:[#allocation8 + $0x168] sm:$0xff] }
 0x787   :  { %2265 = vmatmul.mubr.f32.vlgmr.msra.gmra.mrb[14].mxu0 %v6981_v13  ;;  %2336 = vmatmul.mubr.f32.vlgmr.msra.gmra.mrb[14].mxu1 %v6981_v13  ;;  %v5334_v63 = vpack.c.bf16 %v2432_v61, %v2428_v46  ;;  %v2755_v61 = vld [vmem:[#allocation10 + $0x278] sm:$0xff] }
 0x788   :  { %5317 = vmatpush1.bf16.msra.mxu0 %v5316_v50  ;;  %5349 = vmatpush1.bf16.msra.mxu1 %v5348_v11  ;;  %v2430_v50 = vld [vmem:[#allocation8 + $0x158] sm:$0xff] }
 0x789   :  { %5319 = vmatprep.subr.bf16.mxu0 %v5318_v26  ;;  %5351 = vmatprep.subr.bf16.mxu1 %v5350_v44  ;;  %v2434_v11 = vld [vmem:[#allocation8 + $0x178] sm:$0xff]  ;;  %v2427_v26 = vld [vmem:[#allocation8 + $0x140] sm:$0xff] }
 0x78a   :  { %2538 = vmatprep.mubr.f32.mxu0 %v6355_v0  ;;  %2651 = vmatprep.mubr.f32.mxu1 %v6355_v0  ;;  %v2431_v44 = vld [vmem:[#allocation8 + $0x160] sm:$0xff]  ;;  %v5366_v57 = vpack.c.bf16 %v2434_v11, %v2430_v50 }
 0x78b   :  { %v5336_v10 = vpack.c.bf16 %v2431_v44, %v2427_v26  ;;  %v2748_v50 = vld [vmem:[#allocation10 + $0x240] sm:$0xff]  ;;  %v2750_v26 = vld [vmem:[#allocation10 + $0x250] sm:$0xff] }
 0x78c   :  { %5321 = vmatpush1.bf16.msra.mxu0 %v5320_v2  ;;  %5353 = vmatpush1.bf16.msra.mxu1 %v5352_v6  ;;  %v2438_v2 = vld [vmem:[#allocation8 + $0x198] sm:$0xff]  ;;  %v2752_v11 = vld [vmem:[#allocation10 + $0x260] sm:$0xff]  ;;  %v2754_v44 = vld [vmem:[#allocation10 + $0x270] sm:$0xff] }
 0x78d   :  { %5323 = vmatprep.subr.bf16.mxu0 %v5322_v32  ;;  %5355 = vmatprep.subr.bf16.mxu1 %v5354_v48  ;;  %v2442_v6 = vld [vmem:[#allocation8 + $0x1b8] sm:$0xff]  ;;  %v2435_v32 = vld [vmem:[#allocation8 + $0x180] sm:$0xff] }
 0x78e   :  { %v2439_v48 = vld [vmem:[#allocation8 + $0x1a0] sm:$0xff]  ;;  %v5370_v4 = vpack.c.bf16 %v2442_v6, %v2438_v2 }
 0x78f   :  { %v5340_v16 = vpack.c.bf16 %v2439_v48, %v2435_v32  ;;  %v2756_v2 = vld [vmem:[#allocation10 + $0x280] sm:$0xff]  ;;  %v2758_v32 = vld [vmem:[#allocation10 + $0x290] sm:$0xff] }
 0x790   :  { %5325 = vmatpush1.bf16.msra.mxu0 %v5324_v1  ;;  %5357 = vmatpush1.bf16.msra.mxu1 %v5356_v8  ;;  %v2446_v1 = vld [vmem:[#allocation8 + $0x1d8] sm:$0xff]  ;;  %v2760_v6 = vld [vmem:[#allocation10 + $0x2a0] sm:$0xff]  ;;  %v2762_v48 = vld [vmem:[#allocation10 + $0x2b0] sm:$0xff] }
 0x791   :  { %5327 = vmatprep.subr.bf16.mxu0 %v5326_v40  ;;  %5359 = vmatprep.subr.bf16.mxu1 %v5358_v9  ;;  %v2450_v8 = vld [vmem:[#allocation8 + $0x1f8] sm:$0xff]  ;;  %v2443_v40 = vld [vmem:[#allocation8 + $0x1c0] sm:$0xff]  ;;  %v5342_v9 = vpack.c.bf16 %v2448_v43, %v2444_v33 }
 0x792   :  { %v5374_v15 = vpack.c.bf16 %v2450_v8, %v2446_v1  ;;  %v5344_v7 = vpack.c.bf16 %v2447_v17, %v2443_v40  ;;  %v2771_v43 = vld [vmem:[#allocation10 + $0x2f8] sm:$0xff]  ;;  %v2764_v1 = vld [vmem:[#allocation10 + $0x2c0] sm:$0xff]  ;;  %v2766_v40 = vld [vmem:[#allocation10 + $0x2d0] sm:$0xff] }
 0x793   :  { %v2768_v8 = vld [vmem:[#allocation10 + $0x2e0] sm:$0xff] }
 0x794   :  { %5329 = vmatpush1.bf16.msra.mxu0 %v5328_v62  ;;  %5361 = vmatpush1.bf16.msra.mxu1 %v5360_v14  ;;  %v2740_v62 = vld [vmem:[#allocation10 + $0x200] sm:$0xff] }
 0x795   :  { %5331 = vmatprep.subr.bf16.mxu0 %v5330_v47  ;;  %5363 = vmatprep.subr.bf16.mxu1 %v5362_v28  ;;  %v2746_v47 = vld [vmem:[#allocation10 + $0x230] sm:$0xff]  ;;  %v2749_v28 = vld [vmem:[#allocation10 + $0x248] sm:$0xff] }
 0x796   :  { %v7027_v46 = vpack.c.bf16 %v2753_v60, %v2749_v28 }
 0x798   :  { %5333 = vmatpush1.bf16.msra.mxu0 %v5332_v25  ;;  %5365 = vmatpush1.bf16.msra.mxu1 %v5364_v23  ;;  %v7029_v25 = vpack.c.bf16 %v2755_v61, %v2751_v53  ;;  %v7031_v23 = vpack.c.bf16 %v2752_v11, %v2748_v50  ;;  %v2783_v53 = vld [vmem:[#allocation10 + $0x358] sm:$0xff]  ;;  %v2780_v50 = vld [vmem:[#allocation10 + $0x340] sm:$0xff] }
 0x799   :  { %5335 = vmatprep.subr.bf16.mxu0 %v5334_v63  ;;  %5367 = vmatprep.subr.bf16.mxu1 %v5366_v57  ;;  %v7034_v63 = vpack.c.bf16 %v2754_v44, %v2750_v26  ;;  %v2757_v57 = vld [vmem:[#allocation10 + $0x288] sm:$0xff]  ;;  %v2787_v61 = vld [vmem:[#allocation10 + $0x378] sm:$0xff]  ;;  %v2784_v26 = vld [vmem:[#allocation10 + $0x360] sm:$0xff] }
 0x79a   :  { %v7039_v42 = vpack.c.bf16 %v2761_v41, %v2757_v57  ;;  %v7075_v11 = vpack.c.bf16 %v2787_v61, %v2783_v53  ;;  %v2782_v44 = vld [vmem:[#allocation10 + $0x350] sm:$0xff]  ;;  %v7078_v41 = vpack.c.bf16 %v2784_v26, %v2780_v50 }
 0x79b   :  { %v2786_v57 = vld [vmem:[#allocation10 + $0x370] sm:$0xff] }
 0x79c   :  { %5337 = vmatpush1.bf16.msra.mxu0 %v5336_v10  ;;  %5369 = vmatpush1.bf16.msra.mxu1 %v5368_v19  ;;  %v7041_v10 = vpack.c.bf16 %v2763_v49, %v2759_v56  ;;  %v7043_v19 = vpack.c.bf16 %v2760_v6, %v2756_v2  ;;  %v2789_v56 = vld [vmem:[#allocation10 + $0x388] sm:$0xff]  ;;  %v2791_v2 = vld [vmem:[#allocation10 + $0x398] sm:$0xff]  ;;  %v7082_v6 = vpack.c.bf16 %v2786_v57, %v2782_v44 }
 0x79d   :  { %5339 = vmatprep.subr.bf16.mxu0 %v5338_v54  ;;  %5371 = vmatprep.subr.bf16.mxu1 %v5370_v4  ;;  %v7046_v54 = vpack.c.bf16 %v2762_v48, %v2758_v32  ;;  %v2765_v4 = vld [vmem:[#allocation10 + $0x2c8] sm:$0xff]  ;;  %v2795_v48 = vld [vmem:[#allocation10 + $0x3b8] sm:$0xff] }
 0x79e   :  { %v7051_v33 = vpack.c.bf16 %v2769_v22, %v2765_v4  ;;  %v2793_v49 = vld [vmem:[#allocation10 + $0x3a8] sm:$0xff]  ;;  %v2788_v4 = vld [vmem:[#allocation10 + $0x380] sm:$0xff] }
 0x79f   :  { %v7084_v32 = vpack.c.bf16 %v2793_v49, %v2789_v56  ;;  %v2792_v22 = vld [vmem:[#allocation10 + $0x3a0] sm:$0xff] }
 0x7a0   :  { %5341 = vmatpush1.bf16.msra.mxu0 %v5340_v16  ;;  %5373 = vmatpush1.bf16.msra.mxu1 %v5372_v36  ;;  %v7053_v16 = vpack.c.bf16 %v2771_v43, %v2767_v21  ;;  %v7055_v36 = vpack.c.bf16 %v2768_v8, %v2764_v1  ;;  %v7087_v21 = vpack.c.bf16 %v2795_v48, %v2791_v2  ;;  %v2790_v43 = vld [vmem:[#allocation10 + $0x390] sm:$0xff] }
 0x7a1   :  { %5343 = vmatprep.subr.bf16.mxu0 %v5342_v9  ;;  %5375 = vmatprep.subr.bf16.mxu1 %v5374_v15  ;;  %v2770_v9 = vld [vmem:[#allocation10 + $0x2f0] sm:$0xff]  ;;  %v2773_v15 = vld [vmem:[#allocation10 + $0x308] sm:$0xff]  ;;  %v7090_v8 = vpack.c.bf16 %v2792_v22, %v2788_v4 }
 0x7a2   :  { %v7058_v17 = vpack.c.bf16 %v2770_v9, %v2766_v40  ;;  %v2794_v1 = vld [vmem:[#allocation10 + $0x3b0] sm:$0xff]  ;;  %v2797_v9 = vld [vmem:[#allocation10 + $0x3c8] sm:$0xff] }
 0x7a3   :  { %v7094_v40 = vpack.c.bf16 %v2794_v1, %v2790_v43 }
 0x7a4   :  { %5345 = vmatpush1.bf16.msra.mxu0 %v5344_v7  ;;  %5377 = vmatpush1.bf16.msra.mxu1 %v5376_v12  ;;  %v2779_v7 = vld [vmem:[#allocation10 + $0x338] sm:$0xff]  ;;  %v7062_v12 = vpack.c.bf16 %v2777_v5, %v2773_v15  ;;  %v2801_v15 = vld [vmem:[#allocation10 + $0x3e8] sm:$0xff] }
 0x7a5   :  { %v2799_v5 = vld [vmem:[#allocation10 + $0x3d8] sm:$0xff] }
 0x7a7   :  { %2539 = vmatmul.mubr.f32.vlgmr.msra.gmra.mrb[16].mxu0 %v6651_v39  ;;  %2652 = vmatmul.mubr.f32.vlgmr.msra.gmra.mrb[16].mxu1 %v6651_v39  ;;  %v2741_v39 = vld [vmem:[#allocation10 + $0x208] sm:$0xff] }
 0x7a8   :  { %2544 = vmatprep.mubr.f32.mxu0 %v6355_v0  ;;  %2657 = vmatprep.mubr.f32.mxu1 %v6355_v0 }
 0x7ab   :  { %2545 = vmatmul.mubr.f32.gmra.mrb[18].mxu0 %v6695_v24  ;;  %2658 = vmatmul.mubr.f32.gmra.mrb[18].mxu1 %v6695_v24  ;;  %v2745_v24 = vld [vmem:[#allocation10 + $0x228] sm:$0xff] }
 0x7ac   :  { %2550 = vmatprep.mubr.f32.mxu0 %v6355_v0  ;;  %2663 = vmatprep.mubr.f32.mxu1 %v6355_v0 }
 0x7af   :  { %2551 = vmatmul.mubr.f32.gmra.mrb[20].mxu0 %v6759_v20  ;;  %2664 = vmatmul.mubr.f32.gmra.mrb[20].mxu1 %v6759_v20  ;;  %v2743_v20 = vld [vmem:[#allocation10 + $0x218] sm:$0xff] }
 0x7b0   :  { %2556 = vmatprep.mubr.f32.mxu0 %v6355_v0  ;;  %2669 = vmatprep.mubr.f32.mxu1 %v6355_v0 }
 0x7b3   :  { %2557 = vmatmul.mubr.f32.gmra.mrb[22].mxu0 %v6853_v3  ;;  %2670 = vmatmul.mubr.f32.gmra.mrb[22].mxu1 %v6853_v3  ;;  %v7015_v3 = vpack.c.bf16 %v2745_v24, %v2741_v39  ;;  %v7064_v39 = vpack.c.bf16 %v2779_v7, %v2775_v29  ;;  %v2772_v24 = vld [vmem:[#allocation10 + $0x300] sm:$0xff]  ;;  %v7099_v29 = vpack.c.bf16 %v2801_v15, %v2797_v9  ;;  %v2803_v7 = vld [vmem:[#allocation10 + $0x3f8] sm:$0xff] }
 0x7b4   :  { %2562 = vmatprep.mubr.f32.mxu0 %v6355_v0  ;;  %2675 = vmatprep.mubr.f32.mxu1 %v6355_v0 }
 0x7b5   :  { %5379 = vmatprep.subr.bf16.mxu0 %v7015_v3 }
 0x7b7   :  { %2563 = vmatmul.mubr.f32.gmra.mrb[24].mxu0 %v6899_v58  ;;  %2676 = vmatmul.mubr.f32.gmra.mrb[24].mxu1 %v6899_v58  ;;  %v2747_v58 = vld [vmem:[#allocation10 + $0x238] sm:$0xff] }
 0x7b8   :  { %2568 = vmatprep.mubr.f32.mxu0 %v6355_v0  ;;  %2681 = vmatprep.mubr.f32.mxu1 %v6355_v0  ;;  %v7017_v14 = vpack.c.bf16 %v2747_v58, %v2743_v20  ;;  %v2776_v20 = vld [vmem:[#allocation10 + $0x320] sm:$0xff]  ;;  %v2774_v58 = vld [vmem:[#allocation10 + $0x310] sm:$0xff] }
 0x7ba   :  { %5411 = vmatprep.subr.bf16.mxu1 %v7017_v14 }
 0x7bb   :  { %2569 = vmatmul.mubr.f32.gmra.mrb[26].mxu0 %v6943_v45  ;;  %2682 = vmatmul.mubr.f32.gmra.mrb[26].mxu1 %v6943_v45  ;;  %v2744_v45 = vld [vmem:[#allocation10 + $0x220] sm:$0xff] }
 0x7bc   :  { %2574 = vmatprep.mubr.f32.mxu0 %v6355_v0  ;;  %2687 = vmatprep.mubr.f32.mxu1 %v6355_v0  ;;  %v7019_v18 = vpack.c.bf16 %v2744_v45, %v2740_v62  ;;  %v7067_v62 = vpack.c.bf16 %v2776_v20, %v2772_v24  ;;  %v2778_v45 = vld [vmem:[#allocation10 + $0x330] sm:$0xff]  ;;  %v2796_v24 = vld [vmem:[#allocation10 + $0x3c0] sm:$0xff] }
 0x7bd   :  { %v7071_v28 = vpack.c.bf16 %v2778_v45, %v2774_v58  ;;  %v2800_v20 = vld [vmem:[#allocation10 + $0x3e0] sm:$0xff]  ;;  %v7101_v58 = vpack.c.bf16 %v2803_v7, %v2799_v5 }
 0x7be   :  { %5381 = vmatpush1.bf16.msra.mxu0 %v7019_v18  ;;  %v7103_v45 = vpack.c.bf16 %v2800_v20, %v2796_v24 }
 0x7bf   :  { %2575 = vmatmul.mubr.f32.gmra.mrb[28].mxu0 %v6981_v13  ;;  %2688 = vmatmul.mubr.f32.gmra.mrb[28].mxu1 %v6981_v13  ;;  %v7022_v13 = vpack.c.bf16 %v2746_v47, %v2742_v27  ;;  %v2781_v27 = vld [vmem:[#allocation10 + $0x348] sm:$0xff] }
 0x7c0   :  { %2580 = vmatprep.mubr.f32.mxu0 %v6355_v0  ;;  %2693 = vmatprep.mubr.f32.mxu1 %v6355_v0  ;;  %v2785_v47 = vld [vmem:[#allocation10 + $0x368] sm:$0xff] }
 0x7c1   :  { %5413 = vmatpush1.bf16.msra.mxu1 %v7022_v13  ;;  %5383 = vmatprep.subr.bf16.mxu0 %v7027_v46  ;;  %v7073_v60 = vpack.c.bf16 %v2785_v47, %v2781_v27  ;;  %v2798_v27 = vld [vmem:[#allocation10 + $0x3d0] sm:$0xff] }
 0x7c2   :  { %5415 = vmatprep.subr.bf16.mxu1 %v7029_v25  ;;  %5385 = vmatpush1.bf16.msra.mxu0 %v7031_v23  ;;  %v2802_v47 = vld [vmem:[#allocation10 + $0x3f0] sm:$0xff] }
 0x7c3   :  { %5387 = vmatprep.subr.bf16.mxu0 %v7039_v42  ;;  %v7106_v53 = vpack.c.bf16 %v2802_v47, %v2798_v27 }
 0x7c5   :  { %5417 = vmatpush1.bf16.msra.mxu1 %v7034_v63 }
 0x7c6   :  { %5419 = vmatprep.subr.bf16.mxu1 %v7041_v10  ;;  %5389 = vmatpush1.bf16.msra.mxu0 %v7043_v19 }
 0x7c7   :  { %5391 = vmatprep.subr.bf16.mxu0 %v7051_v33 }
 0x7c9   :  { %5421 = vmatpush1.bf16.msra.mxu1 %v7046_v54 }
 0x7ca   :  { %5423 = vmatprep.subr.bf16.mxu1 %v7053_v16  ;;  %5393 = vmatpush1.bf16.msra.mxu0 %v7055_v36 }
 0x7cb   :  { %5395 = vmatprep.subr.bf16.mxu0 %v7062_v12 }
 0x7cd   :  { %5425 = vmatpush1.bf16.msra.mxu1 %v7058_v17 }
 0x7ce   :  { %5427 = vmatprep.subr.bf16.mxu1 %v7064_v39  ;;  %5397 = vmatpush1.bf16.msra.mxu0 %v7067_v62 }
 0x7cf   :  { %5399 = vmatprep.subr.bf16.mxu0 %v7073_v60 }
 0x7d1   :  { %5429 = vmatpush1.bf16.msra.mxu1 %v7071_v28 }
 0x7d2   :  { %5431 = vmatprep.subr.bf16.mxu1 %v7075_v11  ;;  %5401 = vmatpush1.bf16.msra.mxu0 %v7078_v41 }
 0x7d3   :  { %5403 = vmatprep.subr.bf16.mxu0 %v7084_v32 }
 0x7d5   :  { %5433 = vmatpush1.bf16.msra.mxu1 %v7082_v6 }
 0x7d6   :  { %5435 = vmatprep.subr.bf16.mxu1 %v7087_v21  ;;  %5405 = vmatpush1.bf16.msra.mxu0 %v7090_v8 }
 0x7d7   :  { %5407 = vmatprep.subr.bf16.mxu0 %v7099_v29 }
 0x7d9   :  { %5437 = vmatpush1.bf16.msra.mxu1 %v7094_v40 }
 0x7da   :  { %5439 = vmatprep.subr.bf16.mxu1 %v7101_v58  ;;  %5409 = vmatpush1.bf16.msra.mxu0 %v7103_v45 }
 0x7db   :  { %5443 = vmatprep.subr.bf16.mxu0 %v7015_v3 }
 0x7dd   :  { %5441 = vmatpush1.bf16.msra.mxu1 %v7106_v53 }
 0x7de   :  { %5475 = vmatprep.subr.bf16.mxu1 %v7017_v14 }
 0x85a   :  { %v2266_v61 = vpop.f32.mrb[14].mxu0  ;;  %v2337_v50 = vpop.f32.mrb[14].mxu1 }
 0x85b   :  { %v5904_v26 = vadd.f32 %v2266_v61, %v6628_v35  ;;  %v2268_v44 = vpop.f32.mrb[15].mxu0  ;;  %v2339_v57 = vpop.f32.mrb[15].mxu1  ;;  %v5920_v22 = vadd.f32 %v2337_v50, %v6645_v59 }
 0x85c   :  { %v5905_v56 = vadd.f32 %v2268_v44, %v6632_v38  ;;  %v5921_v48 = vadd.f32 %v2339_v57, %v6639_v52 }
 0x85d   :  { %v4708_v49 = vmul.f32 -1.442695, %v5904_v26 }
 0x85e   :  { %v4709_v2 = vmul.f32 -1.442695, %v5905_v56  ;;  %v4710_v4 = vmul.f32 -1.442695, %v5921_v48 }
 0x85f   :  { %6136 = vpow2.f32 %v4708_v49 }
 0x860   :  { %6138 = vpow2.f32 %v4709_v2 }
 0x861   :  { %6140 = vpow2.f32 %v4710_v4 }
 0x862   :  { %6142 = vtanh.f32 %v5920_v22 }
 0x869   :  { %v6137_v43 = vpop.eup %6136 }
 0x86a   :  { %v6139_v1 = vpop.eup %6138  ;;  %v2349_v9 = vadd.f32 1.0, %v6137_v43 }
 0x86b   :  { %v2355_v15 = vadd.f32 1.0, %v6139_v1  ;;  %v6141_v35 = vpop.eup %6140 }
 0x86c   :  { %6144 = vrcp.f32 %v2349_v9  ;;  %v6143_v5 = vpop.eup %6142  ;;  %v2362_v20 = vadd.f32 1.0, %v6141_v35 }
 0x86d   :  { %6146 = vrcp.f32 %v2355_v15 }
 0x86e   :  { %6148 = vrcp.f32 %v2362_v20 }
 0x876   :  { %v6145_v38 = vpop.eup %6144 }
 0x877   :  { %v6147_v7 = vpop.eup %6146  ;;  %v2367_v24 = vmul.f32 %v6145_v38, %v6143_v5 }
 0x878   :  { %v2366_v27 = vmul.f32 %v6147_v7, %v6978_v51  ;;  %v6149_v59 = vpop.eup %6148  ;;  %v4711_v51 = vld [vmem:[%s7513_s4 + $0x4] sm:$0xf] }
 0x879   :  { %v7167_v50 = vrot.slane %v4711_v51, %v139_v31  ;;  %v7171_v26 = vrot.slane %v4711_v51, %v143_v34  ;;  %v7177_v43 = vrot.slane %v4711_v51, %v151_v37  ;;  %v7182_v34 = vrot.slane %v4711_v51, %v147_v55 }
 0x87a   :  { %v2368_v52 = vadd.f32 %v2367_v24, %v2366_v27 }
 0x87c   :  { %6150 = vtanh.f32 %v2368_v52  ;;  %2378 = vst [vmem:[%s7515_s6] sm:$0xff] %v2368_v52 }
 0x886   :  { %v6151_v47 = vpop.eup %6150 }
 0x887   :  { %v2370_v61 = vmul.f32 %v6151_v47, %v6149_v59 }
 0x889   :  { %2376 = vst [vmem:[%s7514_s5] sm:$0xff] %v2370_v61  ;;  %2581 = vmatmul.mubr.f32.gmra.mrb[30].mxu0 %v2370_v61  ;;  %2694 = vmatmul.mubr.f32.gmra.mrb[30].mxu1 %v2370_v61 }
 0x88a   :  { %2868 = vmatprep.mubr.f32.mxu0 %v6355_v0  ;;  %2939 = vmatprep.mubr.f32.mxu1 %v6355_v0 }
 0x88d   :  { %2869 = vmatmul.mubr.f32.vlgmr.msra.gmra.mrb[16].mxu0 %v6355_v0  ;;  %2940 = vmatmul.mubr.f32.vlgmr.msra.gmra.mrb[16].mxu1 %v6355_v0 }
 0x88e   :  { %5445 = vmatpush1.bf16.msra.mxu0 %v7019_v18  ;;  %5477 = vmatpush1.bf16.msra.mxu1 %v7022_v13 }
 0x88f   :  { %5447 = vmatprep.subr.bf16.mxu0 %v7027_v46  ;;  %5479 = vmatprep.subr.bf16.mxu1 %v7029_v25 }
 0x890   :  { %3110 = vmatprep.mubr.f32.mxu0 %v6355_v0  ;;  %3181 = vmatprep.mubr.f32.mxu1 %v6355_v0 }
 0x892   :  { %5449 = vmatpush1.bf16.msra.mxu0 %v7031_v23  ;;  %5481 = vmatpush1.bf16.msra.mxu1 %v7034_v63 }
 0x893   :  { %5451 = vmatprep.subr.bf16.mxu0 %v7039_v42  ;;  %5483 = vmatprep.subr.bf16.mxu1 %v7041_v10 }
 0x896   :  { %5453 = vmatpush1.bf16.msra.mxu0 %v7043_v19  ;;  %5485 = vmatpush1.bf16.msra.mxu1 %v7046_v54 }
 0x897   :  { %5455 = vmatprep.subr.bf16.mxu0 %v7051_v33  ;;  %5487 = vmatprep.subr.bf16.mxu1 %v7053_v16 }
 0x89a   :  { %5457 = vmatpush1.bf16.msra.mxu0 %v7055_v36  ;;  %5489 = vmatpush1.bf16.msra.mxu1 %v7058_v17 }
 0x89b   :  { %5459 = vmatprep.subr.bf16.mxu0 %v7062_v12  ;;  %5491 = vmatprep.subr.bf16.mxu1 %v7064_v39 }
 0x89e   :  { %5461 = vmatpush1.bf16.msra.mxu0 %v7067_v62  ;;  %5493 = vmatpush1.bf16.msra.mxu1 %v7071_v28 }
 0x89f   :  { %5463 = vmatprep.subr.bf16.mxu0 %v7073_v60  ;;  %5495 = vmatprep.subr.bf16.mxu1 %v7075_v11 }
 0x8a2   :  { %5465 = vmatpush1.bf16.msra.mxu0 %v7078_v41  ;;  %5497 = vmatpush1.bf16.msra.mxu1 %v7082_v6 }
 0x8a3   :  { %5467 = vmatprep.subr.bf16.mxu0 %v7084_v32  ;;  %5499 = vmatprep.subr.bf16.mxu1 %v7087_v21 }
 0x8a6   :  { %5469 = vmatpush1.bf16.msra.mxu0 %v7090_v8  ;;  %5501 = vmatpush1.bf16.msra.mxu1 %v7094_v40 }
 0x8a7   :  { %5471 = vmatprep.subr.bf16.mxu0 %v7099_v29  ;;  %5503 = vmatprep.subr.bf16.mxu1 %v7101_v58 }
 0x8aa   :  { %5473 = vmatpush1.bf16.msra.mxu0 %v7103_v45  ;;  %5505 = vmatpush1.bf16.msra.mxu1 %v7106_v53 }
 0x8ab   :  { %5507 = vmatprep.subr.bf16.mxu0 %v7015_v3  ;;  %5539 = vmatprep.subr.bf16.mxu1 %v7017_v14 }
 0x960   :  { %v2870_v44 = vpop.f32.mrb[16].mxu0  ;;  %v2941_v57 = vpop.f32.mrb[16].mxu1 }
 0x961   :  { %v5922_v56 = vadd.f32 %v2870_v44, %v7167_v50  ;;  %v2872_v49 = vpop.f32.mrb[17].mxu0  ;;  %v2943_v2 = vpop.f32.mrb[17].mxu1  ;;  %v5938_v9 = vadd.f32 %v2941_v57, %v7182_v34 }
 0x962   :  { %v5923_v48 = vadd.f32 %v2872_v49, %v7171_v26  ;;  %v5939_v31 = vadd.f32 %v2943_v2, %v7177_v43 }
 0x963   :  { %v4712_v4 = vmul.f32 -1.442695, %v5922_v56 }
 0x964   :  { %v4713_v22 = vmul.f32 -1.442695, %v5923_v48  ;;  %v4714_v1 = vmul.f32 -1.442695, %v5939_v31 }
 0x965   :  { %6152 = vpow2.f32 %v4712_v4 }
 0x966   :  { %6154 = vpow2.f32 %v4713_v22 }
 0x967   :  { %6156 = vpow2.f32 %v4714_v1 }
 0x968   :  { %6158 = vtanh.f32 %v5938_v9 }
 0x96f   :  { %v6153_v15 = vpop.eup %6152 }
 0x970   :  { %v6155_v35 = vpop.eup %6154  ;;  %v2953_v5 = vadd.f32 1.0, %v6153_v15 }
 0x971   :  { %v2959_v38 = vadd.f32 1.0, %v6155_v35  ;;  %v6157_v37 = vpop.eup %6156 }
 0x972   :  { %6160 = vrcp.f32 %v2953_v5  ;;  %v6159_v7 = vpop.eup %6158  ;;  %v2966_v52 = vadd.f32 1.0, %v6157_v37 }
 0x973   :  { %6162 = vrcp.f32 %v2959_v38 }
 0x974   :  { %6164 = vrcp.f32 %v2966_v52 }
 0x97c   :  { %v6161_v24 = vpop.eup %6160 }
 0x97d   :  { %v6163_v20 = vpop.eup %6162  ;;  %v2971_v27 = vmul.f32 %v6161_v24, %v6159_v7 }
 0x97e   :  { %v2970_v30 = vmul.f32 0.0, %v6163_v20  ;;  %v6165_v59 = vpop.eup %6164 }
 0x980   :  { %v7185_v55 = vadd.f32 %v2971_v27, %v2970_v30 }
 0x982   :  { %6166 = vtanh.f32 %v7185_v55 }
 0x98c   :  { %v6167_v47 = vpop.eup %6166 }
 0x98d   :  { %v2974_v61 = vmul.f32 %v6167_v47, %v6165_v59  ;;  %v3708_v47 = vld [vmem:[#allocation10 + $0x200] sm:$0xff] }
 0x98f   :  { %3111 = vmatmul.mubr.f32.vlgmr.msra.gmra.mrb[18].mxu0 %v2974_v61  ;;  %3182 = vmatmul.mubr.f32.vlgmr.msra.gmra.mrb[18].mxu1 %v2974_v61  ;;  %v3712_v61 = vld [vmem:[#allocation10 + $0x220] sm:$0xff] }
 0x990   :  { %5509 = vmatpush1.bf16.msra.mxu0 %v7019_v18  ;;  %5541 = vmatpush1.bf16.msra.mxu1 %v7022_v13 }
 0x991   :  { %5511 = vmatprep.subr.bf16.mxu0 %v7027_v46  ;;  %5543 = vmatprep.subr.bf16.mxu1 %v7029_v25 }
 0x992   :  { %3352 = vmatprep.mubr.f32.mxu0 %v6355_v0  ;;  %3423 = vmatprep.mubr.f32.mxu1 %v6355_v0 }
 0x994   :  { %5513 = vmatpush1.bf16.msra.mxu0 %v7031_v23  ;;  %5545 = vmatpush1.bf16.msra.mxu1 %v7034_v63 }
 0x995   :  { %5515 = vmatprep.subr.bf16.mxu0 %v7039_v42  ;;  %5547 = vmatprep.subr.bf16.mxu1 %v7041_v10 }
 0x998   :  { %5517 = vmatpush1.bf16.msra.mxu0 %v7043_v19  ;;  %5549 = vmatpush1.bf16.msra.mxu1 %v7046_v54 }
 0x999   :  { %5519 = vmatprep.subr.bf16.mxu0 %v7051_v33  ;;  %5551 = vmatprep.subr.bf16.mxu1 %v7053_v16 }
 0x99c   :  { %5521 = vmatpush1.bf16.msra.mxu0 %v7055_v36  ;;  %5553 = vmatpush1.bf16.msra.mxu1 %v7058_v17 }
 0x99d   :  { %5523 = vmatprep.subr.bf16.mxu0 %v7062_v12  ;;  %5555 = vmatprep.subr.bf16.mxu1 %v7064_v39 }
 0x9a0   :  { %5525 = vmatpush1.bf16.msra.mxu0 %v7067_v62  ;;  %5557 = vmatpush1.bf16.msra.mxu1 %v7071_v28 }
 0x9a1   :  { %5527 = vmatprep.subr.bf16.mxu0 %v7073_v60  ;;  %5559 = vmatprep.subr.bf16.mxu1 %v7075_v11 }
 0x9a4   :  { %5529 = vmatpush1.bf16.msra.mxu0 %v7078_v41  ;;  %5561 = vmatpush1.bf16.msra.mxu1 %v7082_v6 }
 0x9a5   :  { %5531 = vmatprep.subr.bf16.mxu0 %v7084_v32  ;;  %5563 = vmatprep.subr.bf16.mxu1 %v7087_v21 }
 0x9a8   :  { %5533 = vmatpush1.bf16.msra.mxu0 %v7090_v8  ;;  %5565 = vmatpush1.bf16.msra.mxu1 %v7094_v40 }
 0x9a9   :  { %5535 = vmatprep.subr.bf16.mxu0 %v7099_v29  ;;  %5567 = vmatprep.subr.bf16.mxu1 %v7101_v58 }
 0x9ac   :  { %5537 = vmatpush1.bf16.msra.mxu0 %v7103_v45  ;;  %5569 = vmatpush1.bf16.msra.mxu1 %v7106_v53 }
 0x9ad   :  { %5571 = vmatprep.subr.bf16.mxu0 %v7015_v3  ;;  %5603 = vmatprep.subr.bf16.mxu1 %v7017_v14 }
 0xa62   :  { %v3112_v51 = vpop.f32.mrb[18].mxu0  ;;  %v3183_v44 = vpop.f32.mrb[18].mxu1 }
 0xa63   :  { %v5924_v57 = vadd.f32 %v3112_v51, %v7167_v50  ;;  %v3114_v56 = vpop.f32.mrb[19].mxu0  ;;  %v3185_v49 = vpop.f32.mrb[19].mxu1  ;;  %v5940_v1 = vadd.f32 %v3183_v44, %v7182_v34  ;;  %v7276_v44 = vpack.c.bf16 %v3712_v61, %v3708_v47  ;;  %v3751_v47 = vld [vmem:[#allocation10 + $0x358] sm:$0xff] }
 0xa64   :  { %v5925_v2 = vadd.f32 %v3114_v56, %v7171_v26  ;;  %v5941_v22 = vadd.f32 %v3185_v49, %v7177_v43  ;;  %v3714_v56 = vld [vmem:[#allocation10 + $0x230] sm:$0xff] }
 0xa65   :  { %v4715_v48 = vmul.f32 -1.442695, %v5924_v57  ;;  %v3710_v57 = vld [vmem:[#allocation10 + $0x210] sm:$0xff] }
 0xa66   :  { %v4716_v4 = vmul.f32 -1.442695, %v5925_v2  ;;  %v4717_v31 = vmul.f32 -1.442695, %v5941_v22  ;;  %v7279_v49 = vpack.c.bf16 %v3714_v56, %v3710_v57  ;;  %v3717_v2 = vld [vmem:[#allocation10 + $0x248] sm:$0xff]  ;;  %v3755_v57 = vld [vmem:[#allocation10 + $0x378] sm:$0xff] }
 0xa67   :  { %6168 = vpow2.f32 %v4715_v48  ;;  %v3721_v48 = vld [vmem:[#allocation10 + $0x268] sm:$0xff]  ;;  %v3748_v56 = vld [vmem:[#allocation10 + $0x340] sm:$0xff] }
 0xa68   :  { %6170 = vpow2.f32 %v4716_v4  ;;  %v3719_v4 = vld [vmem:[#allocation10 + $0x258] sm:$0xff]  ;;  %v7284_v22 = vpack.c.bf16 %v3721_v48, %v3717_v2  ;;  %v3752_v2 = vld [vmem:[#allocation10 + $0x360] sm:$0xff]  ;;  %v7334_v48 = vpack.c.bf16 %v3755_v57, %v3751_v47 }
 0xa69   :  { %6172 = vpow2.f32 %v4717_v31  ;;  %v3723_v31 = vld [vmem:[#allocation10 + $0x278] sm:$0xff] }
 0xa6a   :  { %6174 = vtanh.f32 %v5940_v1  ;;  %v3716_v1 = vld [vmem:[#allocation10 + $0x240] sm:$0xff] }
 0xa71   :  { %v6169_v3 = vpop.eup %6168 }
 0xa72   :  { %v6171_v9 = vpop.eup %6170  ;;  %v3195_v14 = vadd.f32 1.0, %v6169_v3  ;;  %v3720_v3 = vld [vmem:[#allocation10 + $0x260] sm:$0xff] }
 0xa73   :  { %v3201_v15 = vadd.f32 1.0, %v6171_v9  ;;  %v6173_v35 = vpop.eup %6172  ;;  %v7286_v9 = vpack.c.bf16 %v3723_v31, %v3719_v4  ;;  %v7336_v4 = vpack.c.bf16 %v3752_v2, %v3748_v56  ;;  %v3750_v31 = vld [vmem:[#allocation10 + $0x350] sm:$0xff] }
 0xa74   :  { %6176 = vrcp.f32 %v3195_v14  ;;  %v6175_v5 = vpop.eup %6174  ;;  %v3208_v24 = vadd.f32 1.0, %v6173_v35  ;;  %v7288_v14 = vpack.c.bf16 %v3720_v3, %v3716_v1  ;;  %v3722_v35 = vld [vmem:[#allocation10 + $0x270] sm:$0xff]  ;;  %v3757_v3 = vld [vmem:[#allocation10 + $0x388] sm:$0xff] }
 0xa75   :  { %6178 = vrcp.f32 %v3201_v15  ;;  %v3718_v15 = vld [vmem:[#allocation10 + $0x250] sm:$0xff] }
 0xa76   :  { %6180 = vrcp.f32 %v3208_v24  ;;  %v3754_v1 = vld [vmem:[#allocation10 + $0x370] sm:$0xff] }
 0xa7e   :  { %v6177_v38 = vpop.eup %6176 }
 0xa7f   :  { %v6179_v37 = vpop.eup %6178  ;;  %v3213_v7 = vmul.f32 %v6177_v38, %v6175_v5  ;;  %v7291_v5 = vpack.c.bf16 %v3722_v35, %v3718_v15  ;;  %v3725_v38 = vld [vmem:[#allocation10 + $0x288] sm:$0xff]  ;;  %v7339_v15 = vpack.c.bf16 %v3754_v1, %v3750_v31 }
 0xa80   :  { %v3212_v20 = vmul.f32 %v6179_v37, %v7185_v55  ;;  %v6181_v52 = vpop.eup %6180  ;;  %v3715_v55 = vld [vmem:[#allocation10 + $0x238] sm:$0xff]  ;;  %v3729_v37 = vld [vmem:[#allocation10 + $0x2a8] sm:$0xff] }
 0xa81   :  { %v7296_v24 = vpack.c.bf16 %v3729_v37, %v3725_v38  ;;  %v3761_v35 = vld [vmem:[#allocation10 + $0x3a8] sm:$0xff]  ;;  %v3759_v38 = vld [vmem:[#allocation10 + $0x398] sm:$0xff] }
 0xa82   :  { %v7227_v27 = vadd.f32 %v3213_v7, %v3212_v20  ;;  %v3727_v7 = vld [vmem:[#allocation10 + $0x298] sm:$0xff] }
 0xa83   :  { %v3731_v20 = vld [vmem:[#allocation10 + $0x2b8] sm:$0xff] }
 0xa84   :  { %6182 = vtanh.f32 %v7227_v27  ;;  %v3763_v37 = vld [vmem:[#allocation10 + $0x3b8] sm:$0xff] }
 0xa8e   :  { %v6183_v30 = vpop.eup %6182 }
 0xa8f   :  { %v3216_v59 = vmul.f32 %v6183_v30, %v6181_v52  ;;  %v3728_v52 = vld [vmem:[#allocation10 + $0x2a0] sm:$0xff]  ;;  %v7298_v30 = vpack.c.bf16 %v3731_v20, %v3727_v7  ;;  %v7342_v7 = vpack.c.bf16 %v3761_v35, %v3757_v3  ;;  %v7344_v20 = vpack.c.bf16 %v3763_v37, %v3759_v38 }
 0xa91   :  { %3353 = vmatmul.mubr.f32.vlgmr.msra.gmra.mrb[20].mxu0 %v3216_v59  ;;  %3424 = vmatmul.mubr.f32.vlgmr.msra.gmra.mrb[20].mxu1 %v3216_v59 }
 0xa92   :  { %5573 = vmatpush1.bf16.msra.mxu0 %v7019_v18  ;;  %5605 = vmatpush1.bf16.msra.mxu1 %v7022_v13 }
 0xa93   :  { %5575 = vmatprep.subr.bf16.mxu0 %v7027_v46  ;;  %5607 = vmatprep.subr.bf16.mxu1 %v7029_v25 }
 0xa94   :  { %3594 = vmatprep.mubr.f32.mxu0 %v6355_v0  ;;  %3665 = vmatprep.mubr.f32.mxu1 %v6355_v0 }
 0xa96   :  { %5577 = vmatpush1.bf16.msra.mxu0 %v7031_v23  ;;  %5609 = vmatpush1.bf16.msra.mxu1 %v7034_v63 }
 0xa97   :  { %5579 = vmatprep.subr.bf16.mxu0 %v7039_v42  ;;  %5611 = vmatprep.subr.bf16.mxu1 %v7041_v10 }
 0xa9a   :  { %5581 = vmatpush1.bf16.msra.mxu0 %v7043_v19  ;;  %5613 = vmatpush1.bf16.msra.mxu1 %v7046_v54 }
 0xa9b   :  { %5583 = vmatprep.subr.bf16.mxu0 %v7051_v33  ;;  %5615 = vmatprep.subr.bf16.mxu1 %v7053_v16 }
 0xa9e   :  { %5585 = vmatpush1.bf16.msra.mxu0 %v7055_v36  ;;  %5617 = vmatpush1.bf16.msra.mxu1 %v7058_v17 }
 0xa9f   :  { %5587 = vmatprep.subr.bf16.mxu0 %v7062_v12  ;;  %5619 = vmatprep.subr.bf16.mxu1 %v7064_v39 }
 0xaa2   :  { %5589 = vmatpush1.bf16.msra.mxu0 %v7067_v62  ;;  %5621 = vmatpush1.bf16.msra.mxu1 %v7071_v28 }
 0xaa3   :  { %5591 = vmatprep.subr.bf16.mxu0 %v7073_v60  ;;  %5623 = vmatprep.subr.bf16.mxu1 %v7075_v11 }
 0xaa6   :  { %5593 = vmatpush1.bf16.msra.mxu0 %v7078_v41  ;;  %5625 = vmatpush1.bf16.msra.mxu1 %v7082_v6 }
 0xaa7   :  { %5595 = vmatprep.subr.bf16.mxu0 %v7084_v32  ;;  %5627 = vmatprep.subr.bf16.mxu1 %v7087_v21 }
 0xaaa   :  { %5597 = vmatpush1.bf16.msra.mxu0 %v7090_v8  ;;  %5629 = vmatpush1.bf16.msra.mxu1 %v7094_v40 }
 0xaab   :  { %5599 = vmatprep.subr.bf16.mxu0 %v7099_v29  ;;  %5631 = vmatprep.subr.bf16.mxu1 %v7101_v58  ;;  %v3709_v29 = vld [vmem:[#allocation10 + $0x208] sm:$0xff] }
 0xaac   :  { %v3713_v58 = vld [vmem:[#allocation10 + $0x228] sm:$0xff] }
 0xaae   :  { %5601 = vmatpush1.bf16.msra.mxu0 %v7103_v45  ;;  %5633 = vmatpush1.bf16.msra.mxu1 %v7106_v53  ;;  %v3711_v45 = vld [vmem:[#allocation10 + $0x218] sm:$0xff]  ;;  %v7272_v53 = vpack.c.bf16 %v3713_v58, %v3709_v29  ;;  %v3746_v29 = vld [vmem:[#allocation10 + $0x330] sm:$0xff] }
 0xaaf   :  { %v7274_v51 = vpack.c.bf16 %v3715_v55, %v3711_v45  ;;  %v3749_v45 = vld [vmem:[#allocation10 + $0x348] sm:$0xff] }
 0xab0   :  { %5635 = vmatprep.subr.bf16.mxu0 %v7272_v53  ;;  %v3753_v55 = vld [vmem:[#allocation10 + $0x368] sm:$0xff] }
 0xab1   :  { %5667 = vmatprep.subr.bf16.mxu1 %v7274_v51  ;;  %v7331_v61 = vpack.c.bf16 %v3753_v55, %v3749_v45 }
 0xb64   :  { %v3354_v18 = vpop.f32.mrb[20].mxu0  ;;  %v3425_v13 = vpop.f32.mrb[20].mxu1 }
 0xb65   :  { %v5926_v46 = vadd.f32 %v3354_v18, %v7167_v50  ;;  %v3356_v25 = vpop.f32.mrb[21].mxu0  ;;  %v3427_v23 = vpop.f32.mrb[21].mxu1  ;;  %v5942_v33 = vadd.f32 %v3425_v13, %v7182_v34  ;;  %v3726_v18 = vld [vmem:[#allocation10 + $0x290] sm:$0xff] }
 0xb66   :  { %v5927_v63 = vadd.f32 %v3356_v25, %v7171_v26  ;;  %v5943_v19 = vadd.f32 %v3427_v23, %v7177_v43  ;;  %v3730_v13 = vld [vmem:[#allocation10 + $0x2b0] sm:$0xff]  ;;  %v3733_v25 = vld [vmem:[#allocation10 + $0x2c8] sm:$0xff] }
 0xb67   :  { %v4718_v42 = vmul.f32 -1.442695, %v5926_v46  ;;  %v7303_v46 = vpack.c.bf16 %v3730_v13, %v3726_v18  ;;  %v3737_v23 = vld [vmem:[#allocation10 + $0x2e8] sm:$0xff]  ;;  %v3758_v18 = vld [vmem:[#allocation10 + $0x390] sm:$0xff] }
 0xb68   :  { %v4719_v10 = vmul.f32 -1.442695, %v5927_v63  ;;  %v4720_v54 = vmul.f32 -1.442695, %v5943_v19  ;;  %v3735_v63 = vld [vmem:[#allocation10 + $0x2d8] sm:$0xff]  ;;  %v3732_v19 = vld [vmem:[#allocation10 + $0x2c0] sm:$0xff] }
 0xb69   :  { %6184 = vpow2.f32 %v4718_v42  ;;  %v7308_v42 = vpack.c.bf16 %v3737_v23, %v3733_v25  ;;  %v3762_v25 = vld [vmem:[#allocation10 + $0x3b0] sm:$0xff]  ;;  %v3765_v23 = vld [vmem:[#allocation10 + $0x3c8] sm:$0xff] }
 0xb6a   :  { %6186 = vpow2.f32 %v4719_v10  ;;  %v3739_v10 = vld [vmem:[#allocation10 + $0x2f8] sm:$0xff] }
 0xb6b   :  { %6188 = vpow2.f32 %v4720_v54  ;;  %v3736_v54 = vld [vmem:[#allocation10 + $0x2e0] sm:$0xff] }
 0xb6c   :  { %6190 = vtanh.f32 %v5942_v33  ;;  %v7310_v33 = vpack.c.bf16 %v3739_v10, %v3735_v63  ;;  %v3769_v63 = vld [vmem:[#allocation10 + $0x3e8] sm:$0xff]  ;;  %v7351_v10 = vpack.c.bf16 %v3762_v25, %v3758_v18 }
 0xb73   :  { %v6185_v16 = vpop.eup %6184 }
 0xb74   :  { %v6187_v36 = vpop.eup %6186  ;;  %v3437_v17 = vadd.f32 1.0, %v6185_v16  ;;  %v7312_v16 = vpack.c.bf16 %v3736_v54, %v3732_v19  ;;  %v7353_v19 = vpack.c.bf16 %v3769_v63, %v3765_v23  ;;  %v3767_v54 = vld [vmem:[#allocation10 + $0x3d8] sm:$0xff] }
 0xb75   :  { %v3443_v12 = vadd.f32 1.0, %v6187_v36  ;;  %v6189_v39 = vpop.eup %6188  ;;  %v3734_v36 = vld [vmem:[#allocation10 + $0x2d0] sm:$0xff] }
 0xb76   :  { %6192 = vrcp.f32 %v3437_v17  ;;  %v6191_v62 = vpop.eup %6190  ;;  %v3450_v41 = vadd.f32 1.0, %v6189_v39  ;;  %v3738_v17 = vld [vmem:[#allocation10 + $0x2f0] sm:$0xff]  ;;  %v3741_v39 = vld [vmem:[#allocation10 + $0x308] sm:$0xff] }
 0xb77   :  { %6194 = vrcp.f32 %v3443_v12  ;;  %v7315_v12 = vpack.c.bf16 %v3738_v17, %v3734_v36  ;;  %v3771_v36 = vld [vmem:[#allocation10 + $0x3f8] sm:$0xff]  ;;  %v3764_v17 = vld [vmem:[#allocation10 + $0x3c0] sm:$0xff] }
 0xb78   :  { %6196 = vrcp.f32 %v3450_v41  ;;  %v3740_v41 = vld [vmem:[#allocation10 + $0x300] sm:$0xff] }
 0xb80   :  { %v6193_v28 = vpop.eup %6192 }
 0xb81   :  { %v6195_v60 = vpop.eup %6194  ;;  %v3455_v11 = vmul.f32 %v6193_v28, %v6191_v62  ;;  %v3745_v62 = vld [vmem:[#allocation10 + $0x328] sm:$0xff]  ;;  %v3743_v28 = vld [vmem:[#allocation10 + $0x318] sm:$0xff] }
 0xb82   :  { %v3454_v6 = vmul.f32 %v6195_v60, %v7227_v27  ;;  %v6197_v21 = vpop.eup %6196  ;;  %v3724_v27 = vld [vmem:[#allocation10 + $0x280] sm:$0xff]  ;;  %v7320_v60 = vpack.c.bf16 %v3745_v62, %v3741_v39  ;;  %v7356_v39 = vpack.c.bf16 %v3771_v36, %v3767_v54 }
 0xb83   :  { %v7300_v59 = vpack.c.bf16 %v3728_v52, %v3724_v27  ;;  %v3756_v27 = vld [vmem:[#allocation10 + $0x380] sm:$0xff] }
 0xb84   :  { %v7267_v32 = vadd.f32 %v3455_v11, %v3454_v6  ;;  %v3747_v11 = vld [vmem:[#allocation10 + $0x338] sm:$0xff]  ;;  %v3744_v6 = vld [vmem:[#allocation10 + $0x320] sm:$0xff] }
 0xb85   :  { %v3760_v52 = vld [vmem:[#allocation10 + $0x3a0] sm:$0xff] }
 0xb86   :  { %6198 = vtanh.f32 %v7267_v32  ;;  %v7347_v13 = vpack.c.bf16 %v3760_v52, %v3756_v27  ;;  %v3768_v62 = vld [vmem:[#allocation10 + $0x3e0] sm:$0xff] }
 0xb90   :  { %v6199_v8 = vpop.eup %6198 }
 0xb91   :  { %v3458_v40 = vmul.f32 %v6199_v8, %v6197_v21  ;;  %v7322_v21 = vpack.c.bf16 %v3747_v11, %v3743_v28  ;;  %v7324_v8 = vpack.c.bf16 %v3744_v6, %v3740_v41  ;;  %v3766_v28 = vld [vmem:[#allocation10 + $0x3d0] sm:$0xff]  ;;  %v7359_v41 = vpack.c.bf16 %v3768_v62, %v3764_v17 }
 0xb92   :  { %v3770_v11 = vld [vmem:[#allocation10 + $0x3f0] sm:$0xff] }
 0xb93   :  { %3595 = vmatmul.mubr.f32.vlgmr.msra.gmra.mrb[22].mxu0 %v3458_v40  ;;  %3666 = vmatmul.mubr.f32.vlgmr.msra.gmra.mrb[22].mxu1 %v3458_v40  ;;  %v3742_v40 = vld [vmem:[#allocation10 + $0x310] sm:$0xff]  ;;  %v7363_v6 = vpack.c.bf16 %v3770_v11, %v3766_v28 }
 0xb94   :  { %3836 = vmatprep.mubr.f32.mxu0 %v6355_v0  ;;  %3907 = vmatprep.mubr.f32.mxu1 %v6355_v0  ;;  %v7327_v58 = vpack.c.bf16 %v3746_v29, %v3742_v40 }
 0xb95   :  { %5637 = vmatpush1.bf16.msra.mxu0 %v7276_v44  ;;  %5669 = vmatpush1.bf16.msra.mxu1 %v7279_v49 }
 0xb96   :  { %5639 = vmatprep.subr.bf16.mxu0 %v7284_v22  ;;  %5671 = vmatprep.subr.bf16.mxu1 %v7286_v9 }
 0xb99   :  { %5641 = vmatpush1.bf16.msra.mxu0 %v7288_v14  ;;  %5673 = vmatpush1.bf16.msra.mxu1 %v7291_v5 }
 0xb9a   :  { %5643 = vmatprep.subr.bf16.mxu0 %v7296_v24  ;;  %5675 = vmatprep.subr.bf16.mxu1 %v7298_v30 }
 0xb9d   :  { %5645 = vmatpush1.bf16.msra.mxu0 %v7300_v59  ;;  %5677 = vmatpush1.bf16.msra.mxu1 %v7303_v46 }
 0xb9e   :  { %5647 = vmatprep.subr.bf16.mxu0 %v7308_v42  ;;  %5679 = vmatprep.subr.bf16.mxu1 %v7310_v33 }
 0xba1   :  { %5649 = vmatpush1.bf16.msra.mxu0 %v7312_v16  ;;  %5681 = vmatpush1.bf16.msra.mxu1 %v7315_v12 }
 0xba2   :  { %5651 = vmatprep.subr.bf16.mxu0 %v7320_v60  ;;  %5683 = vmatprep.subr.bf16.mxu1 %v7322_v21 }
 0xba5   :  { %5653 = vmatpush1.bf16.msra.mxu0 %v7324_v8  ;;  %5685 = vmatpush1.bf16.msra.mxu1 %v7327_v58 }
 0xba6   :  { %5655 = vmatprep.subr.bf16.mxu0 %v7331_v61  ;;  %5687 = vmatprep.subr.bf16.mxu1 %v7334_v48 }
 0xba9   :  { %5657 = vmatpush1.bf16.msra.mxu0 %v7336_v4  ;;  %5689 = vmatpush1.bf16.msra.mxu1 %v7339_v15 }
 0xbaa   :  { %5659 = vmatprep.subr.bf16.mxu0 %v7342_v7  ;;  %5691 = vmatprep.subr.bf16.mxu1 %v7344_v20 }
 0xbad   :  { %5661 = vmatpush1.bf16.msra.mxu0 %v7347_v13  ;;  %5693 = vmatpush1.bf16.msra.mxu1 %v7351_v10 }
 0xbae   :  { %5663 = vmatprep.subr.bf16.mxu0 %v7353_v19  ;;  %5695 = vmatprep.subr.bf16.mxu1 %v7356_v39 }
 0xbb1   :  { %5665 = vmatpush1.bf16.msra.mxu0 %v7359_v41  ;;  %5697 = vmatpush1.bf16.msra.mxu1 %v7363_v6 }
 0xbb2   :  { %5699 = vmatprep.subr.bf16.mxu0 %v7272_v53  ;;  %5731 = vmatprep.subr.bf16.mxu1 %v7274_v51 }
 0xc66   :  { %v3596_v40 = vpop.f32.mrb[22].mxu0  ;;  %v3667_v29 = vpop.f32.mrb[22].mxu1 }
 0xc67   :  { %v5928_v45 = vadd.f32 %v3596_v40, %v7167_v50  ;;  %v3598_v55 = vpop.f32.mrb[23].mxu0  ;;  %v3669_v47 = vpop.f32.mrb[23].mxu1  ;;  %v5944_v3 = vadd.f32 %v3667_v29, %v7182_v34 }
 0xc68   :  { %v5929_v57 = vadd.f32 %v3598_v55, %v7171_v26  ;;  %v5945_v31 = vadd.f32 %v3669_v47, %v7177_v43 }
 0xc69   :  { %v4721_v56 = vmul.f32 -1.442695, %v5928_v45 }
 0xc6a   :  { %v4722_v2 = vmul.f32 -1.442695, %v5929_v57  ;;  %v4723_v1 = vmul.f32 -1.442695, %v5945_v31 }
 0xc6b   :  { %6200 = vpow2.f32 %v4721_v56 }
 0xc6c   :  { %6202 = vpow2.f32 %v4722_v2 }
 0xc6d   :  { %6204 = vpow2.f32 %v4723_v1 }
 0xc6e   :  { %6206 = vtanh.f32 %v5944_v3 }
 0xc75   :  { %v6201_v35 = vpop.eup %6200 }
 0xc76   :  { %v6203_v38 = vpop.eup %6202  ;;  %v3679_v37 = vadd.f32 1.0, %v6201_v35 }
 0xc77   :  { %v3685_v27 = vadd.f32 1.0, %v6203_v38  ;;  %v6205_v52 = vpop.eup %6204 }
 0xc78   :  { %6208 = vrcp.f32 %v3679_v37  ;;  %v6207_v18 = vpop.eup %6206  ;;  %v3692_v54 = vadd.f32 1.0, %v6205_v52 }
 0xc79   :  { %6210 = vrcp.f32 %v3685_v27 }
 0xc7a   :  { %6212 = vrcp.f32 %v3692_v54 }
 0xc82   :  { %v6209_v25 = vpop.eup %6208 }
 0xc83   :  { %v6211_v23 = vpop.eup %6210  ;;  %v3697_v63 = vmul.f32 %v6209_v25, %v6207_v18 }
 0xc84   :  { %v3696_v36 = vmul.f32 %v6211_v23, %v7267_v32  ;;  %v6213_v62 = vpop.eup %6212 }
 0xc86   :  { %v7375_v17 = vadd.f32 %v3697_v63, %v3696_v36 }
 0xc88   :  { %6214 = vtanh.f32 %v7375_v17 }
 0xc92   :  { %v6215_v28 = vpop.eup %6214 }
 0xc93   :  { %v3700_v11 = vmul.f32 %v6215_v28, %v6213_v62 }
 0xc95   :  { %3837 = vmatmul.mubr.f32.vlgmr.msra.gmra.mrb[24].mxu0 %v3700_v11  ;;  %3908 = vmatmul.mubr.f32.vlgmr.msra.gmra.mrb[24].mxu1 %v3700_v11 }
 0xc96   :  { %5701 = vmatpush1.bf16.msra.mxu0 %v7276_v44  ;;  %5733 = vmatpush1.bf16.msra.mxu1 %v7279_v49 }
 0xc97   :  { %5703 = vmatprep.subr.bf16.mxu0 %v7284_v22  ;;  %5735 = vmatprep.subr.bf16.mxu1 %v7286_v9 }
 0xc98   :  { %4078 = vmatprep.mubr.f32.mxu0 %v6355_v0  ;;  %4149 = vmatprep.mubr.f32.mxu1 %v6355_v0 }
 0xc9a   :  { %5705 = vmatpush1.bf16.msra.mxu0 %v7288_v14  ;;  %5737 = vmatpush1.bf16.msra.mxu1 %v7291_v5 }
 0xc9b   :  { %5707 = vmatprep.subr.bf16.mxu0 %v7296_v24  ;;  %5739 = vmatprep.subr.bf16.mxu1 %v7298_v30 }
 0xc9e   :  { %5709 = vmatpush1.bf16.msra.mxu0 %v7300_v59  ;;  %5741 = vmatpush1.bf16.msra.mxu1 %v7303_v46 }
 0xc9f   :  { %5711 = vmatprep.subr.bf16.mxu0 %v7308_v42  ;;  %5743 = vmatprep.subr.bf16.mxu1 %v7310_v33 }
 0xca2   :  { %5713 = vmatpush1.bf16.msra.mxu0 %v7312_v16  ;;  %5745 = vmatpush1.bf16.msra.mxu1 %v7315_v12 }
 0xca3   :  { %5715 = vmatprep.subr.bf16.mxu0 %v7320_v60  ;;  %5747 = vmatprep.subr.bf16.mxu1 %v7322_v21 }
 0xca6   :  { %5717 = vmatpush1.bf16.msra.mxu0 %v7324_v8  ;;  %5749 = vmatpush1.bf16.msra.mxu1 %v7327_v58 }
 0xca7   :  { %5719 = vmatprep.subr.bf16.mxu0 %v7331_v61  ;;  %5751 = vmatprep.subr.bf16.mxu1 %v7334_v48 }
 0xcaa   :  { %5721 = vmatpush1.bf16.msra.mxu0 %v7336_v4  ;;  %5753 = vmatpush1.bf16.msra.mxu1 %v7339_v15 }
 0xcab   :  { %5723 = vmatprep.subr.bf16.mxu0 %v7342_v7  ;;  %5755 = vmatprep.subr.bf16.mxu1 %v7344_v20 }
 0xcae   :  { %5725 = vmatpush1.bf16.msra.mxu0 %v7347_v13  ;;  %5757 = vmatpush1.bf16.msra.mxu1 %v7351_v10 }
 0xcaf   :  { %5727 = vmatprep.subr.bf16.mxu0 %v7353_v19  ;;  %5759 = vmatprep.subr.bf16.mxu1 %v7356_v39 }
 0xcb2   :  { %5729 = vmatpush1.bf16.msra.mxu0 %v7359_v41  ;;  %5761 = vmatpush1.bf16.msra.mxu1 %v7363_v6 }
 0xcb3   :  { %5763 = vmatprep.subr.bf16.mxu0 %v7272_v53  ;;  %5795 = vmatprep.subr.bf16.mxu1 %v7274_v51 }
 0xd68   :  { %v3838_v32 = vpop.f32.mrb[24].mxu0  ;;  %v3909_v40 = vpop.f32.mrb[24].mxu1 }
 0xd69   :  { %v5930_v29 = vadd.f32 %v3838_v32, %v7167_v50  ;;  %v3840_v45 = vpop.f32.mrb[25].mxu0  ;;  %v3911_v55 = vpop.f32.mrb[25].mxu1  ;;  %v5946_v1 = vadd.f32 %v3909_v40, %v7182_v34 }
 0xd6a   :  { %v5931_v47 = vadd.f32 %v3840_v45, %v7171_v26  ;;  %v5947_v2 = vadd.f32 %v3911_v55, %v7177_v43 }
 0xd6b   :  { %v4724_v57 = vmul.f32 -1.442695, %v5930_v29 }
 0xd6c   :  { %v4725_v56 = vmul.f32 -1.442695, %v5931_v47  ;;  %v4726_v31 = vmul.f32 -1.442695, %v5947_v2 }
 0xd6d   :  { %6216 = vpow2.f32 %v4724_v57 }
 0xd6e   :  { %6218 = vpow2.f32 %v4725_v56 }
 0xd6f   :  { %6220 = vpow2.f32 %v4726_v31 }
 0xd70   :  { %6222 = vtanh.f32 %v5946_v1 }
 0xd77   :  { %v6217_v3 = vpop.eup %6216 }
 0xd78   :  { %v6219_v35 = vpop.eup %6218  ;;  %v3921_v38 = vadd.f32 1.0, %v6217_v3 }
 0xd79   :  { %v3927_v37 = vadd.f32 1.0, %v6219_v35  ;;  %v6221_v27 = vpop.eup %6220 }
 0xd7a   :  { %6224 = vrcp.f32 %v3921_v38  ;;  %v6223_v52 = vpop.eup %6222  ;;  %v3934_v63 = vadd.f32 1.0, %v6221_v27 }
 0xd7b   :  { %6226 = vrcp.f32 %v3927_v37 }
 0xd7c   :  { %6228 = vrcp.f32 %v3934_v63 }
 0xd84   :  { %v6225_v18 = vpop.eup %6224 }
 0xd85   :  { %v6227_v25 = vpop.eup %6226  ;;  %v3939_v23 = vmul.f32 %v6225_v18, %v6223_v52 }
 0xd86   :  { %v3938_v54 = vmul.f32 %v6227_v25, %v7375_v17  ;;  %v6229_v62 = vpop.eup %6228 }
 0xd88   :  { %v7417_v36 = vadd.f32 %v3939_v23, %v3938_v54 }
 0xd8a   :  { %6230 = vtanh.f32 %v7417_v36 }
 0xd94   :  { %v6231_v28 = vpop.eup %6230 }
 0xd95   :  { %v3942_v11 = vmul.f32 %v6231_v28, %v6229_v62 }
 0xd97   :  { %4079 = vmatmul.mubr.f32.vlgmr.msra.gmra.mrb[26].mxu0 %v3942_v11  ;;  %4150 = vmatmul.mubr.f32.vlgmr.msra.gmra.mrb[26].mxu1 %v3942_v11 }
 0xd98   :  { %5765 = vmatpush1.bf16.msra.mxu0 %v7276_v44  ;;  %5797 = vmatpush1.bf16.msra.mxu1 %v7279_v49 }
 0xd99   :  { %5767 = vmatprep.subr.bf16.mxu0 %v7284_v22  ;;  %5799 = vmatprep.subr.bf16.mxu1 %v7286_v9 }
 0xd9a   :  { %4320 = vmatprep.mubr.f32.mxu0 %v6355_v0  ;;  %4391 = vmatprep.mubr.f32.mxu1 %v6355_v0 }
 0xd9c   :  { %5769 = vmatpush1.bf16.msra.mxu0 %v7288_v14  ;;  %5801 = vmatpush1.bf16.msra.mxu1 %v7291_v5 }
 0xd9d   :  { %5771 = vmatprep.subr.bf16.mxu0 %v7296_v24  ;;  %5803 = vmatprep.subr.bf16.mxu1 %v7298_v30 }
 0xda0   :  { %5773 = vmatpush1.bf16.msra.mxu0 %v7300_v59  ;;  %5805 = vmatpush1.bf16.msra.mxu1 %v7303_v46 }
 0xda1   :  { %5775 = vmatprep.subr.bf16.mxu0 %v7308_v42  ;;  %5807 = vmatprep.subr.bf16.mxu1 %v7310_v33 }
 0xda4   :  { %5777 = vmatpush1.bf16.msra.mxu0 %v7312_v16  ;;  %5809 = vmatpush1.bf16.msra.mxu1 %v7315_v12 }
 0xda5   :  { %5779 = vmatprep.subr.bf16.mxu0 %v7320_v60  ;;  %5811 = vmatprep.subr.bf16.mxu1 %v7322_v21 }
 0xda8   :  { %5781 = vmatpush1.bf16.msra.mxu0 %v7324_v8  ;;  %5813 = vmatpush1.bf16.msra.mxu1 %v7327_v58 }
 0xda9   :  { %5783 = vmatprep.subr.bf16.mxu0 %v7331_v61  ;;  %5815 = vmatprep.subr.bf16.mxu1 %v7334_v48 }
 0xdac   :  { %5785 = vmatpush1.bf16.msra.mxu0 %v7336_v4  ;;  %5817 = vmatpush1.bf16.msra.mxu1 %v7339_v15 }
 0xdad   :  { %5787 = vmatprep.subr.bf16.mxu0 %v7342_v7  ;;  %5819 = vmatprep.subr.bf16.mxu1 %v7344_v20 }
 0xdb0   :  { %5789 = vmatpush1.bf16.msra.mxu0 %v7347_v13  ;;  %5821 = vmatpush1.bf16.msra.mxu1 %v7351_v10 }
 0xdb1   :  { %5791 = vmatprep.subr.bf16.mxu0 %v7353_v19  ;;  %5823 = vmatprep.subr.bf16.mxu1 %v7356_v39 }
 0xdb4   :  { %5793 = vmatpush1.bf16.msra.mxu0 %v7359_v41  ;;  %5825 = vmatpush1.bf16.msra.mxu1 %v7363_v6 }
 0xdb5   :  { %5827 = vmatprep.subr.bf16.mxu0 %v7272_v53  ;;  %5859 = vmatprep.subr.bf16.mxu1 %v7274_v51 }
 0xe6a   :  { %v4080_v17 = vpop.f32.mrb[26].mxu0  ;;  %v4151_v32 = vpop.f32.mrb[26].mxu1 }
 0xe6b   :  { %v5932_v40 = vadd.f32 %v4080_v17, %v7167_v50  ;;  %v4082_v29 = vpop.f32.mrb[27].mxu0  ;;  %v4153_v45 = vpop.f32.mrb[27].mxu1  ;;  %v5948_v31 = vadd.f32 %v4151_v32, %v7182_v34 }
 0xe6c   :  { %v5933_v55 = vadd.f32 %v4082_v29, %v7171_v26  ;;  %v5949_v56 = vadd.f32 %v4153_v45, %v7177_v43 }
 0xe6d   :  { %v4727_v47 = vmul.f32 -1.442695, %v5932_v40 }
 0xe6e   :  { %v4728_v57 = vmul.f32 -1.442695, %v5933_v55  ;;  %v4729_v2 = vmul.f32 -1.442695, %v5949_v56 }
 0xe6f   :  { %6232 = vpow2.f32 %v4727_v47 }
 0xe70   :  { %6234 = vpow2.f32 %v4728_v57 }
 0xe71   :  { %6236 = vpow2.f32 %v4729_v2 }
 0xe72   :  { %6238 = vtanh.f32 %v5948_v31 }
 0xe79   :  { %v6233_v53 = vpop.eup %6232 }
 0xe7a   :  { %v6235_v1 = vpop.eup %6234  ;;  %v4163_v51 = vadd.f32 1.0, %v6233_v53 }
 0xe7b   :  { %v4169_v3 = vadd.f32 1.0, %v6235_v1  ;;  %v6237_v35 = vpop.eup %6236 }
 0xe7c   :  { %6240 = vrcp.f32 %v4163_v51  ;;  %v6239_v38 = vpop.eup %6238  ;;  %v4176_v18 = vadd.f32 1.0, %v6237_v35 }
 0xe7d   :  { %6242 = vrcp.f32 %v4169_v3 }
 0xe7e   :  { %6244 = vrcp.f32 %v4176_v18 }
 0xe86   :  { %v6241_v37 = vpop.eup %6240 }
 0xe87   :  { %v6243_v27 = vpop.eup %6242  ;;  %v4181_v52 = vmul.f32 %v6241_v37, %v6239_v38 }
 0xe88   :  { %v4180_v25 = vmul.f32 %v6243_v27, %v7417_v36  ;;  %v6245_v63 = vpop.eup %6244 }
 0xe8a   :  { %v7459_v23 = vadd.f32 %v4181_v52, %v4180_v25 }
 0xe8c   :  { %6246 = vtanh.f32 %v7459_v23 }
 0xe96   :  { %v6247_v54 = vpop.eup %6246 }
 0xe97   :  { %v4184_v62 = vmul.f32 %v6247_v54, %v6245_v63 }
 0xe99   :  { %4321 = vmatmul.mubr.f32.vlgmr.msra.gmra.mrb[28].mxu0 %v4184_v62  ;;  %4392 = vmatmul.mubr.f32.vlgmr.msra.gmra.mrb[28].mxu1 %v4184_v62 }
 0xe9a   :  { %5829 = vmatpush1.bf16.msra.mxu0 %v7276_v44  ;;  %5861 = vmatpush1.bf16.msra.mxu1 %v7279_v49 }
 0xe9b   :  { %5831 = vmatprep.subr.bf16.mxu0 %v7284_v22  ;;  %5863 = vmatprep.subr.bf16.mxu1 %v7286_v9 }
 0xe9c   :  { %4562 = vmatprep.mubr.f32.mxu0 %v6355_v0  ;;  %4633 = vmatprep.mubr.f32.mxu1 %v6355_v0 }
 0xe9e   :  { %5833 = vmatpush1.bf16.msra.mxu0 %v7288_v14  ;;  %5865 = vmatpush1.bf16.msra.mxu1 %v7291_v5 }
 0xe9f   :  { %5835 = vmatprep.subr.bf16.mxu0 %v7296_v24  ;;  %5867 = vmatprep.subr.bf16.mxu1 %v7298_v30 }
 0xea2   :  { %5837 = vmatpush1.bf16.msra.mxu0 %v7300_v59  ;;  %5869 = vmatpush1.bf16.msra.mxu1 %v7303_v46 }
 0xea3   :  { %5839 = vmatprep.subr.bf16.mxu0 %v7308_v42  ;;  %5871 = vmatprep.subr.bf16.mxu1 %v7310_v33 }
 0xea6   :  { %5841 = vmatpush1.bf16.msra.mxu0 %v7312_v16  ;;  %5873 = vmatpush1.bf16.msra.mxu1 %v7315_v12 }
 0xea7   :  { %5843 = vmatprep.subr.bf16.mxu0 %v7320_v60  ;;  %5875 = vmatprep.subr.bf16.mxu1 %v7322_v21 }
 0xeaa   :  { %5845 = vmatpush1.bf16.msra.mxu0 %v7324_v8  ;;  %5877 = vmatpush1.bf16.msra.mxu1 %v7327_v58 }
 0xeab   :  { %5847 = vmatprep.subr.bf16.mxu0 %v7331_v61  ;;  %5879 = vmatprep.subr.bf16.mxu1 %v7334_v48 }
 0xeae   :  { %5849 = vmatpush1.bf16.msra.mxu0 %v7336_v4  ;;  %5881 = vmatpush1.bf16.msra.mxu1 %v7339_v15 }
 0xeaf   :  { %5851 = vmatprep.subr.bf16.mxu0 %v7342_v7  ;;  %5883 = vmatprep.subr.bf16.mxu1 %v7344_v20 }
 0xeb2   :  { %5853 = vmatpush1.bf16.msra.mxu0 %v7347_v13  ;;  %5885 = vmatpush1.bf16.msra.mxu1 %v7351_v10 }
 0xeb3   :  { %5855 = vmatprep.subr.bf16.mxu0 %v7353_v19  ;;  %5887 = vmatprep.subr.bf16.mxu1 %v7356_v39 }
 0xeb6   :  { %5857 = vmatpush1.bf16.msra.mxu0 %v7359_v41  ;;  %5889 = vmatpush1.bf16.msra.mxu1 %v7363_v6 }
 0xf6c   :  { %v4322_v0 = vpop.f32.mrb[28].mxu0  ;;  %v4393_v44 = vpop.f32.mrb[28].mxu1 }
 0xf6d   :  { %v5934_v49 = vadd.f32 %v4322_v0, %v7167_v50  ;;  %v4324_v22 = vpop.f32.mrb[29].mxu0  ;;  %v4395_v9 = vpop.f32.mrb[29].mxu1  ;;  %v5950_v46 = vadd.f32 %v4393_v44, %v7182_v34 }
 0xf6e   :  { %v5935_v14 = vadd.f32 %v4324_v22, %v7171_v26  ;;  %v5951_v30 = vadd.f32 %v4395_v9, %v7177_v43 }
 0xf6f   :  { %v4730_v5 = vmul.f32 -1.442695, %v5934_v49 }
 0xf70   :  { %v4731_v24 = vmul.f32 -1.442695, %v5935_v14  ;;  %v4732_v59 = vmul.f32 -1.442695, %v5951_v30 }
 0xf71   :  { %6248 = vpow2.f32 %v4730_v5 }
 0xf72   :  { %6250 = vpow2.f32 %v4731_v24 }
 0xf73   :  { %6252 = vpow2.f32 %v4732_v59 }
 0xf74   :  { %6254 = vtanh.f32 %v5950_v46 }
 0xf7b   :  { %v6249_v42 = vpop.eup %6248 }
 0xf7c   :  { %v6251_v33 = vpop.eup %6250  ;;  %v4405_v16 = vadd.f32 1.0, %v6249_v42 }
 0xf7d   :  { %v4411_v12 = vadd.f32 1.0, %v6251_v33  ;;  %v6253_v60 = vpop.eup %6252 }
 0xf7e   :  { %6256 = vrcp.f32 %v4405_v16  ;;  %v6255_v21 = vpop.eup %6254  ;;  %v4418_v48 = vadd.f32 1.0, %v6253_v60 }
 0xf7f   :  { %6258 = vrcp.f32 %v4411_v12 }
 0xf80   :  { %6260 = vrcp.f32 %v4418_v48 }
 0xf88   :  { %v6257_v8 = vpop.eup %6256 }
 0xf89   :  { %v6259_v58 = vpop.eup %6258  ;;  %v4423_v61 = vmul.f32 %v6257_v8, %v6255_v21 }
 0xf8a   :  { %v4422_v4 = vmul.f32 %v6259_v58, %v7459_v23  ;;  %v6261_v7 = vpop.eup %6260 }
 0xf8c   :  { %v4424_v15 = vadd.f32 %v4423_v61, %v4422_v4 }
 0xf8e   :  { %6262 = vtanh.f32 %v4424_v15 }
 0xf98   :  { %v6263_v20 = vpop.eup %6262 }
 0xf99   :  { %v4426_v13 = vmul.f32 %v6263_v20, %v6261_v7 }
 0xf9b   :  { %4563 = vmatmul.mubr.f32.vlgmr.msra.gmra.mrb[30].mxu0 %v4426_v13  ;;  %4634 = vmatmul.mubr.f32.vlgmr.msra.gmra.mrb[30].mxu1 %v4426_v13 }
0x106e   :  { %v4564_v10 = vpop.f32.mrb[30].mxu0  ;;  %v4635_v19 = vpop.f32.mrb[30].mxu1 }
0x106f   :  { %v5936_v39 = vadd.f32 %v4564_v10, %v7167_v50  ;;  %v4566_v41 = vpop.f32.mrb[31].mxu0  ;;  %v4637_v6 = vpop.f32.mrb[31].mxu1  ;;  %v5952_v40 = vadd.f32 %v4635_v19, %v7182_v34 }
0x1070   :  { %v5937_v36 = vadd.f32 %v4566_v41, %v7171_v26  ;;  %v5953_v17 = vadd.f32 %v4637_v6, %v7177_v43 }
0x1071   :  { %v4733_v28 = vmul.f32 -1.442695, %v5936_v39 }
0x1072   :  { %v4734_v11 = vmul.f32 -1.442695, %v5937_v36  ;;  %v4735_v32 = vmul.f32 -1.442695, %v5953_v17 }
0x1073   :  { %6264 = vpow2.f32 %v4733_v28 }
0x1074   :  { %6266 = vpow2.f32 %v4734_v11 }
0x1075   :  { %6268 = vpow2.f32 %v4735_v32 }
0x1076   :  { %6270 = vtanh.f32 %v5952_v40 }
0x107d   :  { %v6265_v29 = vpop.eup %6264 }
0x107e   :  { %v6267_v45 = vpop.eup %6266  ;;  %v4647_v55 = vadd.f32 1.0, %v6265_v29 }
0x107f   :  { %v4653_v47 = vadd.f32 1.0, %v6267_v45  ;;  %v6269_v50 = vpop.eup %6268 }
0x1080   :  { %6272 = vrcp.f32 %v4647_v55  ;;  %v6271_v57 = vpop.eup %6270  ;;  %v4660_v31 = vadd.f32 1.0, %v6269_v50 }
0x1081   :  { %6274 = vrcp.f32 %v4653_v47 }
0x1082   :  { %6276 = vrcp.f32 %v4660_v31 }
0x108a   :  { %v6273_v26 = vpop.eup %6272 }
0x108b   :  { %v6275_v56 = vpop.eup %6274  ;;  %v4665_v2 = vmul.f32 %v6273_v26, %v6271_v57 }
0x108c   :  { %v4664_v53 = vmul.f32 %v6275_v56, %v4424_v15  ;;  %v6277_v43 = vpop.eup %6276 }
0x108e   :  { %v4666_v1 = vadd.f32 %v4665_v2, %v4664_v53 }
0x1090   :  { %6278 = vtanh.f32 %v4666_v1  ;;  %4737 = vst [vmem:[%s7515_s6 + $0x8] sm:$0xff] %v4666_v1 }
0x109a   :  { %v6279_v34 = vpop.eup %6278 }
0x109b   :  { %v4668_v51 = vmul.f32 %v6279_v34, %v6277_v43 }
0x109d   :  { %4736 = vst [vmem:[%s7514_s5 + $0x8] sm:$0xff] %v4668_v51 }
0x109e   :  { %4685 = vsyncpa [#allocation7], 1 }
0x109f   :  { %4686 = vsyncpa [#allocation9], 1 }

</bundles_post_ra>
